<compile_context>
chip_gen: v5e
topology: v5e:2x2
jax: 0.10.0
libtpu: 0.0.40
codegen_flags: <defaults>
</compile_context>

<pallas_src>
import numpy as np
import jax
import jax.numpy as jnp
from jax.experimental import pallas as pl
from jax.experimental.pallas import tpu as pltpu


NUM_CLASSES = 2
HEAD_CPAD = 8          # head out-channels padded to one 8-sublane tile


def _ceil8(n):
    return (n + 7) // 8 * 8


def _geom(H, W):
    """Flat padded-image geometry of one resolution level.

    An activation is stored as (C_pad, Lbuf): the zero-padded image (Hp x Wp,
    flat, row stride Wp) starts at lane offset B (lane-aligned stores); the
    [0,B) and [B+L, Lbuf) margins are only read by conv taps at halo output
    positions (whose results are discarded/masked) and are kept at zero.
    """
    Hp, Wp = H + 2, W + 2
    L = Hp * Wp
    B = ((Wp + 1 + 127) // 128) * 128          # >= max |tap shift|, 128-aligned
    return {"H": H, "W": W, "Hp": Hp, "Wp": Wp, "L": L, "B": B,
            "Lbuf": B + L + Wp + 1}


# ---------------------------------------------------------------------------
# Compile-time constants (numpy): interior masks, pool / upsample selectors.
# ---------------------------------------------------------------------------
def _interior_mask(g):
    m = np.zeros((1, g["L"]), np.float32)
    for y in range(g["H"]):
        r = (y + 1) * g["Wp"] + 1
        m[0, r:r + g["W"]] = 1.0
    return jnp.asarray(m)


def _pool_select(gs, gd):
    """0/1 (L_src, L_dst): picks the 2x2-max value for each dst interior pixel
    (dst halo columns are all-zero, so halos are re-zeroed on every store)."""
    s = np.zeros((gs["L"], gd["L"]), np.float32)
    for yo in range(gd["H"]):
        for xo in range(gd["W"]):
            ps = (2 * yo + 1) * gs["Wp"] + (2 * xo + 1)
            pd = (yo + 1) * gd["Wp"] + (xo + 1)
            s[ps, pd] = 1.0
    return jnp.asarray(s, jnp.bfloat16)


def _up_select(gs, gd):
    """0/1 (L_src, L_dst) nearest-neighbour 2x upsample (halo columns zero)."""
    u = np.zeros((gs["L"], gd["L"]), np.float32)
    for yd in range(gd["H"]):
        for xd in range(gd["W"]):
            ps = (yd // 2 + 1) * gs["Wp"] + (xd // 2 + 1)
            pd = (yd + 1) * gd["Wp"] + (xd + 1)
            u[ps, pd] = 1.0
    return jnp.asarray(u, jnp.bfloat16)


# ---------------------------------------------------------------------------
# Deterministic parameters: per-source bf16 weights (Cout_pad, 9*Cin_pad)
# laid out to match the in-kernel im2col (tap-major, channel-minor), f32 bias.
# ---------------------------------------------------------------------------
def _make_conv(key, cins, cout, cout_pad=None):
    cout_pad = cout if cout_pad is None else cout_pad
    fan_in = 9 * sum(cins)
    keys = jax.random.split(key, len(cins) + 1)
    ws = []
    for kk, cin in zip(keys[:-1], cins):
        cin_pad = _ceil8(cin)
        w = jax.random.normal(kk, (9, cin, cout), jnp.float32) / np.sqrt(fan_in)
        w = jnp.pad(w, ((0, 0), (0, cin_pad - cin), (0, 0)))
        wt = jnp.transpose(w, (2, 0, 1)).reshape(cout, 9 * cin_pad)
        wt = jnp.pad(wt, ((0, cout_pad - cout), (0, 0)))
        ws.append(wt.astype(jnp.bfloat16))
    b = jax.random.normal(keys[-1], (cout, 1), jnp.float32) * 0.01
    b = jnp.pad(b, ((0, cout_pad - cout), (0, 0)))
    return ws, b


def init_params(key, in_ch=4, c0=8, c1=16, c2=32, classes=NUM_CLASSES):
    ks = jax.random.split(key, 7)
    return {
        # encoder stages
        "enc0": _make_conv(ks[0], [in_ch], c0),
        "enc1": _make_conv(ks[1], [c0], c1),
        "enc2": _make_conv(ks[2], [c1], c2),
        # UNet++ nested decoder blocks (weights split per skip source)
        "dec01": _make_conv(ks[3], [c0, c1], c0),       # X^{0,1}
        "dec11": _make_conv(ks[4], [c1, c2], c1),       # X^{1,1}
        "dec02": _make_conv(ks[5], [c0, c0, c1], c0),   # X^{0,2}
        # segmentation head -> `classes`, padded to one sublane tile
        "head": _make_conv(ks[6], [c0], classes, cout_pad=HEAD_CPAD),
    }


_PARAM_ORDER = ("enc0", "enc1", "enc2", "dec01", "dec11", "dec02", "head")


def _flatten_params(params):
    flat = []
    for name in _PARAM_ORDER:
        ws, b = params[name]
        flat.extend(ws)
        flat.append(b)
    return flat                 # 18 arrays: 11 weights + 7 biases


def _prep_input(x_nchw, g, cin_pad):
    """NCHW image -> (N, cin_pad, Lbuf) flat padded layout (layout plumbing)."""
    N, C, _, _ = x_nchw.shape
    xp = jnp.pad(x_nchw.astype(jnp.float32),
                 ((0, 0), (0, cin_pad - C), (1, 1), (1, 1)))
    xf = xp.reshape(N, cin_pad, g["L"])
    return jnp.pad(xf, ((0, 0), (0, 0), (g["B"], g["Lbuf"] - g["B"] - g["L"])))


# ---------------------------------------------------------------------------
# Fused whole-network kernel (one image per grid step).
# ---------------------------------------------------------------------------
def _build_kernel(g0, g1, g2):

    def _im2col(ref, g):
        # 9 conv taps are contiguous flat shifts of the padded buffer; build
        # the (9*Cin_pad, L) RHS with one sublane-aligned concat, cast once.
        taps = []
        for dy in range(3):
            for dx in range(3):
                off = g["B"] + (dy - 1) * g["Wp"] + (dx - 1)
                taps.append(ref[:, off:off + g["L"]])
        return jnp.concatenate(taps, axis=0).astype(jnp.bfloat16)

    def _conv(srcs, wrefs, bref, relu):
        # One MXU dot per skip source (concat-free partial-K accumulation),
        # f32 accumulation + f32 bias/ReLU epilogue.
        acc = None
        for (ref, g), wref in zip(srcs, wrefs):
            part = jnp.dot(wref[...], _im2col(ref, g),
                           preferred_element_type=jnp.float32)
            acc = part if acc is None else acc + part
        acc = acc + bref[...]
        return jnp.maximum(acc, 0.0) if relu else acc       # (Cout, L) f32

    def _pool(src_ref, g, sel_ref):
        # exact 2x2 max in f32 via 4 contiguous shifted reads, then a tiny
        # constant 0/1 matmul does the stride-2 subsample (halo cols -> 0).
        b0 = g["B"]
        a = src_ref[:, b0:b0 + g["L"]]
        b = src_ref[:, b0 + 1:b0 + 1 + g["L"]]
        c = src_ref[:, b0 + g["Wp"]:b0 + g["Wp"] + g["L"]]
        d = src_ref[:, b0 + g["Wp"] + 1:b0 + g["Wp"] + 1 + g["L"]]
        m = jnp.maximum(jnp.maximum(a, b), jnp.maximum(c, d))
        return jnp.dot(m.astype(jnp.bfloat16), sel_ref[...],
                       preferred_element_type=jnp.float32)

    def _up(val, sel_ref):
        return jnp.dot(val.astype(jnp.bfloat16), sel_ref[...],
                       preferred_element_type=jnp.float32)

    def kernel(x_ref,
               we0, be0, we1, be1, we2, be2,
               wd01a, wd01b, bd01,
               wd11a, wd11b, bd11,
               wd02a, wd02b, wd02c, bd02,
               wh, bh,
               m0, m1, sp01, sp12, up10, up21,
               o_ref,
               pF0, pP0, pF1, pP1, pUF1, pUF2, pX01, pUX11, pX02):

        # Zero only the never-written margins of the persistent scratch
        # buffers (a few dense vregs); padded-image halos are rewritten to
        # zero every step (masks / zero selector columns), interiors are
        # fully rewritten -> no full-buffer zeroing, no cross-image leakage,
        # and no dependence on which core ran the previous grid step.
        for ref, g in ((pF0, g0), (pP0, g1), (pF1, g1), (pP1, g2),
                       (pUF1, g0), (pUF2, g1), (pX01, g0), (pUX11, g0),
                       (pX02, g0)):
            cpad = ref.shape[0]
            ref[:, :g["B"]] = jnp.zeros((cpad, g["B"]), jnp.float32)
            tail = g["Lbuf"] - g["B"] - g["L"]
            ref[:, g["B"] + g["L"]:] = jnp.zeros((cpad, tail), jnp.float32)

        def _store(dst, g, val, mref):
            dst[:, g["B"]:g["B"] + g["L"]] = val * mref[...]

        # ----- encoder: multi-scale global features -----
        f0 = _conv([(x_ref, g0)], [we0], be0, True)                  # (c0, L0)
        _store(pF0, g0, f0, m0)
        pP0[:, g1["B"]:g1["B"] + g1["L"]] = _pool(pF0, g0, sp01)     # (c0, L1)
        f1 = _conv([(pP0, g1)], [we1], be1, True)                    # (c1, L1)
        _store(pF1, g1, f1, m1)
        pP1[:, g2["B"]:g2["B"] + g2["L"]] = _pool(pF1, g1, sp12)     # (c1, L2)
        f2 = _conv([(pP1, g2)], [we2], be2, True)                    # (c2, L2)

        # ----- UNet++ nested decoder -----
        pUF1[:, g0["B"]:g0["B"] + g0["L"]] = _up(f1, up10)           # up2(f1)
        pUF2[:, g1["B"]:g1["B"] + g1["L"]] = _up(f2, up21)           # up2(f2)

        x01 = _conv([(pF0, g0), (pUF1, g0)], [wd01a, wd01b], bd01, True)
        _store(pX01, g0, x01, m0)

        x11 = _conv([(pF1, g1), (pUF2, g1)], [wd11a, wd11b], bd11, True)
        pUX11[:, g0["B"]:g0["B"] + g0["L"]] = _up(x11, up10)         # up2(x11)

        x02 = _conv([(pF0, g0), (pX01, g0), (pUX11, g0)],
                    [wd02a, wd02b, wd02c], bd02, True)
        _store(pX02, g0, x02, m0)

        # ----- segmentation head (no activation): lane-dense HBM store -----
        o_ref[...] = _conv([(pX02, g0)], [wh], bh, False).astype(o_ref.dtype)

    return kernel


# ---------------------------------------------------------------------------
# Forward pass mirroring SegModel.forward (NCHW in, NCHW logits out).
# ---------------------------------------------------------------------------
def seg_model_forward(params, x_nchw):
    N, Cin, H, W = x_nchw.shape
    assert H % 4 == 0 and W % 4 == 0, "spatial dims must be divisible by 4"

    g0, g1, g2 = _geom(H, W), _geom(H // 2, W // 2), _geom(H // 4, W // 4)
    cin_pad = _ceil8(Cin)
    c0 = params["enc0"][1].shape[0]
    c1 = params["enc1"][1].shape[0]
    c2 = params["enc2"][1].shape[0]

    x_prep = _prep_input(x_nchw, g0, cin_pad)            # (N, cin_pad, Lbuf0)
    flat = _flatten_params(params)
    consts = [_interior_mask(g0), _interior_mask(g1),
              _pool_select(g0, g1), _pool_select(g1, g2),
              _up_select(g1, g0), _up_select(g2, g1)]

    def _const_spec(p):
        r = p.ndim
        return pl.BlockSpec(p.shape, lambda n, _r=r: (0,) * _r)

    in_specs = [pl.BlockSpec((None, cin_pad, g0["Lbuf"]), lambda n: (n, 0, 0))]
    in_specs += [_const_spec(p) for p in flat + consts]

    scratch_shapes = [
        pltpu.VMEM((c0, g0["Lbuf"]), jnp.float32),   # pF0
        pltpu.VMEM((c0, g1["Lbuf"]), jnp.float32),   # pP0
        pltpu.VMEM((c1, g1["Lbuf"]), jnp.float32),   # pF1
        pltpu.VMEM((c1, g2["Lbuf"]), jnp.float32),   # pP1
        pltpu.VMEM((c1, g0["Lbuf"]), jnp.float32),   # pUF1  up2(f1)
        pltpu.VMEM((c2, g1["Lbuf"]), jnp.float32),   # pUF2  up2(f2)
        pltpu.VMEM((c0, g0["Lbuf"]), jnp.float32),   # pX01
        pltpu.VMEM((c1, g0["Lbuf"]), jnp.float32),   # pUX11 up2(x11)
        pltpu.VMEM((c0, g0["Lbuf"]), jnp.float32),   # pX02
    ]

    out = pl.pallas_call(
        _build_kernel(g0, g1, g2),
        out_shape=jax.ShapeDtypeStruct((N, HEAD_CPAD, g0["L"]), jnp.float32),
        grid=(N,),
        in_specs=in_specs,
        out_specs=pl.BlockSpec((None, HEAD_CPAD, g0["L"]), lambda n: (n, 0, 0)),
        scratch_shapes=scratch_shapes,
        compiler_params=pltpu.CompilerParams(
            dimension_semantics=("parallel",)),
    )(x_prep, *flat, *consts)

    # layout plumbing back to NCHW logits: drop class padding + 1-pixel halo.
    logits = out.reshape(N, HEAD_CPAD, g0["Hp"], g0["Wp"])
    return logits[:, :NUM_CLASSES, 1:1 + H, 1:1 + W]


if __name__ == "__main__":
    key = jax.random.PRNGKey(0)
    k_param, k_x = jax.random.split(key)

    N, C, H, W = 2, 4, 16, 16
    x = jax.random.normal(k_x, (N, C, H, W), jnp.float32)
    params = init_params(k_param, in_ch=C)

    fwd = jax.jit(seg_model_forward)
    out = jax.block_until_ready(fwd(params, x))

    assert out.shape == (N, NUM_CLASSES, H, W), out.shape
    assert out.dtype == jnp.float32
    assert bool(jnp.isfinite(out).all())
    print("KERNEL_OK")
</pallas_src>

<mosaic_0001>
module attributes {stable_mosaic.version = 11 : i64} {
  func.func @kernel(%arg0: i32, %arg1: memref<1x8x471xf32, #tpu.memory_space<vmem>>, %arg2: memref<8x72xbf16, #tpu.memory_space<vmem>>, %arg3: memref<8x1xf32, #tpu.memory_space<vmem>>, %arg4: memref<16x72xbf16, #tpu.memory_space<vmem>>, %arg5: memref<16x1xf32, #tpu.memory_space<vmem>>, %arg6: memref<32x144xbf16, #tpu.memory_space<vmem>>, %arg7: memref<32x1xf32, #tpu.memory_space<vmem>>, %arg8: memref<8x72xbf16, #tpu.memory_space<vmem>>, %arg9: memref<8x144xbf16, #tpu.memory_space<vmem>>, %arg10: memref<8x1xf32, #tpu.memory_space<vmem>>, %arg11: memref<16x144xbf16, #tpu.memory_space<vmem>>, %arg12: memref<16x288xbf16, #tpu.memory_space<vmem>>, %arg13: memref<16x1xf32, #tpu.memory_space<vmem>>, %arg14: memref<8x72xbf16, #tpu.memory_space<vmem>>, %arg15: memref<8x72xbf16, #tpu.memory_space<vmem>>, %arg16: memref<8x144xbf16, #tpu.memory_space<vmem>>, %arg17: memref<8x1xf32, #tpu.memory_space<vmem>>, %arg18: memref<8x72xbf16, #tpu.memory_space<vmem>>, %arg19: memref<8x1xf32, #tpu.memory_space<vmem>>, %arg20: memref<1x324xf32, #tpu.memory_space<vmem>>, %arg21: memref<1x100xf32, #tpu.memory_space<vmem>>, %arg22: memref<324x100xbf16, #tpu.memory_space<vmem>>, %arg23: memref<100x36xbf16, #tpu.memory_space<vmem>>, %arg24: memref<100x324xbf16, #tpu.memory_space<vmem>>, %arg25: memref<36x100xbf16, #tpu.memory_space<vmem>>, %arg26: memref<1x8x324xf32, #tpu.memory_space<vmem>>, %arg27: memref<8x471xf32, #tpu.memory_space<vmem>>, %arg28: memref<8x239xf32, #tpu.memory_space<vmem>>, %arg29: memref<16x239xf32, #tpu.memory_space<vmem>>, %arg30: memref<16x171xf32, #tpu.memory_space<vmem>>, %arg31: memref<16x471xf32, #tpu.memory_space<vmem>>, %arg32: memref<32x239xf32, #tpu.memory_space<vmem>>, %arg33: memref<8x471xf32, #tpu.memory_space<vmem>>, %arg34: memref<16x471xf32, #tpu.memory_space<vmem>>, %arg35: memref<8x471xf32, #tpu.memory_space<vmem>>) attributes {dimension_semantics = [#tpu.dimension_semantics<parallel>], iteration_bounds = array<i64: 2>, scalar_prefetch = 0 : i64, scratch_operands = 9 : i64, tpu.core_type = #tpu.core_type<tc>, window_params = [{transform_indices = @transform_0, window_bounds = array<i64: 1, 8, 471>}, {pipeline_mode = #tpu.pipeline_mode<synchronous>, transform_indices = @transform_1, window_bounds = array<i64: 8, 72>}, {pipeline_mode = #tpu.pipeline_mode<synchronous>, transform_indices = @transform_2, window_bounds = array<i64: 8, 1>}, {pipeline_mode = #tpu.pipeline_mode<synchronous>, transform_indices = @transform_3, window_bounds = array<i64: 16, 72>}, {pipeline_mode = #tpu.pipeline_mode<synchronous>, transform_indices = @transform_4, window_bounds = array<i64: 16, 1>}, {pipeline_mode = #tpu.pipeline_mode<synchronous>, transform_indices = @transform_5, window_bounds = array<i64: 32, 144>}, {pipeline_mode = #tpu.pipeline_mode<synchronous>, transform_indices = @transform_6, window_bounds = array<i64: 32, 1>}, {pipeline_mode = #tpu.pipeline_mode<synchronous>, transform_indices = @transform_7, window_bounds = array<i64: 8, 72>}, {pipeline_mode = #tpu.pipeline_mode<synchronous>, transform_indices = @transform_8, window_bounds = array<i64: 8, 144>}, {pipeline_mode = #tpu.pipeline_mode<synchronous>, transform_indices = @transform_9, window_bounds = array<i64: 8, 1>}, {pipeline_mode = #tpu.pipeline_mode<synchronous>, transform_indices = @transform_10, window_bounds = array<i64: 16, 144>}, {pipeline_mode = #tpu.pipeline_mode<synchronous>, transform_indices = @transform_11, window_bounds = array<i64: 16, 288>}, {pipeline_mode = #tpu.pipeline_mode<synchronous>, transform_indices = @transform_12, window_bounds = array<i64: 16, 1>}, {pipeline_mode = #tpu.pipeline_mode<synchronous>, transform_indices = @transform_13, window_bounds = array<i64: 8, 72>}, {pipeline_mode = #tpu.pipeline_mode<synchronous>, transform_indices = @transform_14, window_bounds = array<i64: 8, 72>}, {pipeline_mode = #tpu.pipeline_mode<synchronous>, transform_indices = @transform_15, window_bounds = array<i64: 8, 144>}, {pipeline_mode = #tpu.pipeline_mode<synchronous>, transform_indices = @transform_16, window_bounds = array<i64: 8, 1>}, {pipeline_mode = #tpu.pipeline_mode<synchronous>, transform_indices = @transform_17, window_bounds = array<i64: 8, 72>}, {pipeline_mode = #tpu.pipeline_mode<synchronous>, transform_indices = @transform_18, window_bounds = array<i64: 8, 1>}, {pipeline_mode = #tpu.pipeline_mode<synchronous>, transform_indices = @transform_19, window_bounds = array<i64: 1, 324>}, {pipeline_mode = #tpu.pipeline_mode<synchronous>, transform_indices = @transform_20, window_bounds = array<i64: 1, 100>}, {pipeline_mode = #tpu.pipeline_mode<synchronous>, transform_indices = @transform_21, window_bounds = array<i64: 324, 100>}, {pipeline_mode = #tpu.pipeline_mode<synchronous>, transform_indices = @transform_22, window_bounds = array<i64: 100, 36>}, {pipeline_mode = #tpu.pipeline_mode<synchronous>, transform_indices = @transform_23, window_bounds = array<i64: 100, 324>}, {pipeline_mode = #tpu.pipeline_mode<synchronous>, transform_indices = @transform_24, window_bounds = array<i64: 36, 100>}, {transform_indices = @transform_25, window_bounds = array<i64: 1, 8, 324>}]} {
    %cst = arith.constant 0.000000e+00 : f32
    %0 = vector.broadcast %cst : f32 to vector<8x128xf32>
    %c0 = arith.constant 0 : index
    %c0_0 = arith.constant 0 : index
    %1 = vector.load %arg27[%c0, %c0_0] : memref<8x471xf32, #tpu.memory_space<vmem>>, vector<8x128xf32>
    tpu.vector_store %arg27[%c0, %c0_0], %0 {strides = array<i32>} : memref<8x471xf32, #tpu.memory_space<vmem>>, vector<8x128xf32>,
    %cst_1 = arith.constant 0.000000e+00 : f32
    %2 = vector.broadcast %cst_1 : f32 to vector<8x19xf32>
    %c0_2 = arith.constant 0 : index
    %c452 = arith.constant 452 : index
    %3 = vector.load %arg27[%c0_2, %c452] : memref<8x471xf32, #tpu.memory_space<vmem>>, vector<8x19xf32>
    tpu.vector_store %arg27[%c0_2, %c452], %2 {strides = array<i32>} : memref<8x471xf32, #tpu.memory_space<vmem>>, vector<8x19xf32>,
    %cst_3 = arith.constant 0.000000e+00 : f32
    %4 = vector.broadcast %cst_3 : f32 to vector<8x128xf32>
    %c0_4 = arith.constant 0 : index
    %c0_5 = arith.constant 0 : index
    %5 = vector.load %arg28[%c0_4, %c0_5] : memref<8x239xf32, #tpu.memory_space<vmem>>, vector<8x128xf32>
    tpu.vector_store %arg28[%c0_4, %c0_5], %4 {strides = array<i32>} : memref<8x239xf32, #tpu.memory_space<vmem>>, vector<8x128xf32>,
    %cst_6 = arith.constant 0.000000e+00 : f32
    %6 = vector.broadcast %cst_6 : f32 to vector<8x11xf32>
    %c0_7 = arith.constant 0 : index
    %c228 = arith.constant 228 : index
    %7 = vector.load %arg28[%c0_7, %c228] : memref<8x239xf32, #tpu.memory_space<vmem>>, vector<8x11xf32>
    tpu.vector_store %arg28[%c0_7, %c228], %6 {strides = array<i32>} : memref<8x239xf32, #tpu.memory_space<vmem>>, vector<8x11xf32>,
    %cst_8 = arith.constant 0.000000e+00 : f32
    %8 = vector.broadcast %cst_8 : f32 to vector<16x128xf32>
    %c0_9 = arith.constant 0 : index
    %c0_10 = arith.constant 0 : index
    %9 = vector.load %arg29[%c0_9, %c0_10] : memref<16x239xf32, #tpu.memory_space<vmem>>, vector<16x128xf32>
    tpu.vector_store %arg29[%c0_9, %c0_10], %8 {strides = array<i32>} : memref<16x239xf32, #tpu.memory_space<vmem>>, vector<16x128xf32>,
    %cst_11 = arith.constant 0.000000e+00 : f32
    %10 = vector.broadcast %cst_11 : f32 to vector<16x11xf32>
    %c0_12 = arith.constant 0 : index
    %c228_13 = arith.constant 228 : index
    %11 = vector.load %arg29[%c0_12, %c228_13] : memref<16x239xf32, #tpu.memory_space<vmem>>, vector<16x11xf32>
    tpu.vector_store %arg29[%c0_12, %c228_13], %10 {strides = array<i32>} : memref<16x239xf32, #tpu.memory_space<vmem>>, vector<16x11xf32>,
    %cst_14 = arith.constant 0.000000e+00 : f32
    %12 = vector.broadcast %cst_14 : f32 to vector<16x128xf32>
    %c0_15 = arith.constant 0 : index
    %c0_16 = arith.constant 0 : index
    %13 = vector.load %arg30[%c0_15, %c0_16] : memref<16x171xf32, #tpu.memory_space<vmem>>, vector<16x128xf32>
    tpu.vector_store %arg30[%c0_15, %c0_16], %12 {strides = array<i32>} : memref<16x171xf32, #tpu.memory_space<vmem>>, vector<16x128xf32>,
    %cst_17 = arith.constant 0.000000e+00 : f32
    %14 = vector.broadcast %cst_17 : f32 to vector<16x7xf32>
    %c0_18 = arith.constant 0 : index
    %c164 = arith.constant 164 : index
    %15 = vector.load %arg30[%c0_18, %c164] : memref<16x171xf32, #tpu.memory_space<vmem>>, vector<16x7xf32>
    tpu.vector_store %arg30[%c0_18, %c164], %14 {strides = array<i32>} : memref<16x171xf32, #tpu.memory_space<vmem>>, vector<16x7xf32>,
    %cst_19 = arith.constant 0.000000e+00 : f32
    %16 = vector.broadcast %cst_19 : f32 to vector<16x128xf32>
    %c0_20 = arith.constant 0 : index
    %c0_21 = arith.constant 0 : index
    %17 = vector.load %arg31[%c0_20, %c0_21] : memref<16x471xf32, #tpu.memory_space<vmem>>, vector<16x128xf32>
    tpu.vector_store %arg31[%c0_20, %c0_21], %16 {strides = array<i32>} : memref<16x471xf32, #tpu.memory_space<vmem>>, vector<16x128xf32>,
    %cst_22 = arith.constant 0.000000e+00 : f32
    %18 = vector.broadcast %cst_22 : f32 to vector<16x19xf32>
    %c0_23 = arith.constant 0 : index
    %c452_24 = arith.constant 452 : index
    %19 = vector.load %arg31[%c0_23, %c452_24] : memref<16x471xf32, #tpu.memory_space<vmem>>, vector<16x19xf32>
    tpu.vector_store %arg31[%c0_23, %c452_24], %18 {strides = array<i32>} : memref<16x471xf32, #tpu.memory_space<vmem>>, vector<16x19xf32>,
    %cst_25 = arith.constant 0.000000e+00 : f32
    %20 = vector.broadcast %cst_25 : f32 to vector<32x128xf32>
    %c0_26 = arith.constant 0 : index
    %c0_27 = arith.constant 0 : index
    %21 = vector.load %arg32[%c0_26, %c0_27] : memref<32x239xf32, #tpu.memory_space<vmem>>, vector<32x128xf32>
    tpu.vector_store %arg32[%c0_26, %c0_27], %20 {strides = array<i32>} : memref<32x239xf32, #tpu.memory_space<vmem>>, vector<32x128xf32>,
    %cst_28 = arith.constant 0.000000e+00 : f32
    %22 = vector.broadcast %cst_28 : f32 to vector<32x11xf32>
    %c0_29 = arith.constant 0 : index
    %c228_30 = arith.constant 228 : index
    %23 = vector.load %arg32[%c0_29, %c228_30] : memref<32x239xf32, #tpu.memory_space<vmem>>, vector<32x11xf32>
    tpu.vector_store %arg32[%c0_29, %c228_30], %22 {strides = array<i32>} : memref<32x239xf32, #tpu.memory_space<vmem>>, vector<32x11xf32>,
    %cst_31 = arith.constant 0.000000e+00 : f32
    %24 = vector.broadcast %cst_31 : f32 to vector<8x128xf32>
    %c0_32 = arith.constant 0 : index
    %c0_33 = arith.constant 0 : index
    %25 = vector.load %arg33[%c0_32, %c0_33] : memref<8x471xf32, #tpu.memory_space<vmem>>, vector<8x128xf32>
    tpu.vector_store %arg33[%c0_32, %c0_33], %24 {strides = array<i32>} : memref<8x471xf32, #tpu.memory_space<vmem>>, vector<8x128xf32>,
    %cst_34 = arith.constant 0.000000e+00 : f32
    %26 = vector.broadcast %cst_34 : f32 to vector<8x19xf32>
    %c0_35 = arith.constant 0 : index
    %c452_36 = arith.constant 452 : index
    %27 = vector.load %arg33[%c0_35, %c452_36] : memref<8x471xf32, #tpu.memory_space<vmem>>, vector<8x19xf32>
    tpu.vector_store %arg33[%c0_35, %c452_36], %26 {strides = array<i32>} : memref<8x471xf32, #tpu.memory_space<vmem>>, vector<8x19xf32>,
    %cst_37 = arith.constant 0.000000e+00 : f32
    %28 = vector.broadcast %cst_37 : f32 to vector<16x128xf32>
    %c0_38 = arith.constant 0 : index
    %c0_39 = arith.constant 0 : index
    %29 = vector.load %arg34[%c0_38, %c0_39] : memref<16x471xf32, #tpu.memory_space<vmem>>, vector<16x128xf32>
    tpu.vector_store %arg34[%c0_38, %c0_39], %28 {strides = array<i32>} : memref<16x471xf32, #tpu.memory_space<vmem>>, vector<16x128xf32>,
    %cst_40 = arith.constant 0.000000e+00 : f32
    %30 = vector.broadcast %cst_40 : f32 to vector<16x19xf32>
    %c0_41 = arith.constant 0 : index
    %c452_42 = arith.constant 452 : index
    %31 = vector.load %arg34[%c0_41, %c452_42] : memref<16x471xf32, #tpu.memory_space<vmem>>, vector<16x19xf32>
    tpu.vector_store %arg34[%c0_41, %c452_42], %30 {strides = array<i32>} : memref<16x471xf32, #tpu.memory_space<vmem>>, vector<16x19xf32>,
    %cst_43 = arith.constant 0.000000e+00 : f32
    %32 = vector.broadcast %cst_43 : f32 to vector<8x128xf32>
    %c0_44 = arith.constant 0 : index
    %c0_45 = arith.constant 0 : index
    %33 = vector.load %arg35[%c0_44, %c0_45] : memref<8x471xf32, #tpu.memory_space<vmem>>, vector<8x128xf32>
    tpu.vector_store %arg35[%c0_44, %c0_45], %32 {strides = array<i32>} : memref<8x471xf32, #tpu.memory_space<vmem>>, vector<8x128xf32>,
    %cst_46 = arith.constant 0.000000e+00 : f32
    %34 = vector.broadcast %cst_46 : f32 to vector<8x19xf32>
    %c0_47 = arith.constant 0 : index
    %c452_48 = arith.constant 452 : index
    %35 = vector.load %arg35[%c0_47, %c452_48] : memref<8x471xf32, #tpu.memory_space<vmem>>, vector<8x19xf32>
    tpu.vector_store %arg35[%c0_47, %c452_48], %34 {strides = array<i32>} : memref<8x471xf32, #tpu.memory_space<vmem>>, vector<8x19xf32>,
    %c0_49 = arith.constant 0 : index
    %c0_50 = arith.constant 0 : index
    %36 = vector.load %arg2[%c0_49, %c0_50] : memref<8x72xbf16, #tpu.memory_space<vmem>>, vector<8x72xbf16>
    %c0_51 = arith.constant 0 : index
    %c0_52 = arith.constant 0 : index
    %c109 = arith.constant 109 : index
    %37 = vector.load %arg1[%c0_51, %c0_52, %c109] : memref<1x8x471xf32, #tpu.memory_space<vmem>>, vector<1x8x324xf32>
    %38 = vector.shape_cast %37 : vector<1x8x324xf32> to vector<8x324xf32>
    %c0_53 = arith.constant 0 : index
    %c0_54 = arith.constant 0 : index
    %c110 = arith.constant 110 : index
    %39 = vector.load %arg1[%c0_53, %c0_54, %c110] : memref<1x8x471xf32, #tpu.memory_space<vmem>>, vector<1x8x324xf32>
    %40 = vector.shape_cast %39 : vector<1x8x324xf32> to vector<8x324xf32>
    %c0_55 = arith.constant 0 : index
    %c0_56 = arith.constant 0 : index
    %c111 = arith.constant 111 : index
    %41 = vector.load %arg1[%c0_55, %c0_56, %c111] : memref<1x8x471xf32, #tpu.memory_space<vmem>>, vector<1x8x324xf32>
    %42 = vector.shape_cast %41 : vector<1x8x324xf32> to vector<8x324xf32>
    %c0_57 = arith.constant 0 : index
    %c0_58 = arith.constant 0 : index
    %c127 = arith.constant 127 : index
    %43 = vector.load %arg1[%c0_57, %c0_58, %c127] : memref<1x8x471xf32, #tpu.memory_space<vmem>>, vector<1x8x324xf32>
    %44 = vector.shape_cast %43 : vector<1x8x324xf32> to vector<8x324xf32>
    %c0_59 = arith.constant 0 : index
    %c0_60 = arith.constant 0 : index
    %c128 = arith.constant 128 : index
    %45 = vector.load %arg1[%c0_59, %c0_60, %c128] : memref<1x8x471xf32, #tpu.memory_space<vmem>>, vector<1x8x324xf32>
    %46 = vector.shape_cast %45 : vector<1x8x324xf32> to vector<8x324xf32>
    %c0_61 = arith.constant 0 : index
    %c0_62 = arith.constant 0 : index
    %c129 = arith.constant 129 : index
    %47 = vector.load %arg1[%c0_61, %c0_62, %c129] : memref<1x8x471xf32, #tpu.memory_space<vmem>>, vector<1x8x324xf32>
    %48 = vector.shape_cast %47 : vector<1x8x324xf32> to vector<8x324xf32>
    %c0_63 = arith.constant 0 : index
    %c0_64 = arith.constant 0 : index
    %c145 = arith.constant 145 : index
    %49 = vector.load %arg1[%c0_63, %c0_64, %c145] : memref<1x8x471xf32, #tpu.memory_space<vmem>>, vector<1x8x324xf32>
    %50 = vector.shape_cast %49 : vector<1x8x324xf32> to vector<8x324xf32>
    %c0_65 = arith.constant 0 : index
    %c0_66 = arith.constant 0 : index
    %c146 = arith.constant 146 : index
    %51 = vector.load %arg1[%c0_65, %c0_66, %c146] : memref<1x8x471xf32, #tpu.memory_space<vmem>>, vector<1x8x324xf32>
    %52 = vector.shape_cast %51 : vector<1x8x324xf32> to vector<8x324xf32>
    %c0_67 = arith.constant 0 : index
    %c0_68 = arith.constant 0 : index
    %c147 = arith.constant 147 : index
    %53 = vector.load %arg1[%c0_67, %c0_68, %c147] : memref<1x8x471xf32, #tpu.memory_space<vmem>>, vector<1x8x324xf32>
    %54 = vector.shape_cast %53 : vector<1x8x324xf32> to vector<8x324xf32>
    %55 = tpu.concatenate %38, %40, %42, %44, %46, %48, %50, %52, %54 in 0 : vector<8x324xf32>, vector<8x324xf32>, vector<8x324xf32>, vector<8x324xf32>, vector<8x324xf32>, vector<8x324xf32>, vector<8x324xf32>, vector<8x324xf32>, vector<8x324xf32> -> vector<72x324xf32>
    %56 = arith.truncf %55 : vector<72x324xf32> to vector<72x324xbf16>
    %cst_69 = arith.constant dense<0.000000e+00> : vector<8x324xf32>
    %57 = tpu.matmul %36, %56, %cst_69 {dimension_numbers = #tpu.dot_dimension_numbers<[1], [0], [0], [1], [0, 0, 1, 1], [], []>} : vector<8x72xbf16>, vector<72x324xbf16>, vector<8x324xf32> -> vector<8x324xf32>
    %c0_70 = arith.constant 0 : index
    %c0_71 = arith.constant 0 : index
    %58 = vector.load %arg3[%c0_70, %c0_71] : memref<8x1xf32, #tpu.memory_space<vmem>>, vector<8x1xf32>
    %59 = vector.broadcast %58 : vector<8x1xf32> to vector<8x324xf32>
    %60 = arith.addf %57, %59 : vector<8x324xf32>
    %cst_72 = arith.constant 0.000000e+00 : f32
    %61 = vector.broadcast %cst_72 : f32 to vector<8x324xf32>
    %62 = arith.maximumf %60, %61 : vector<8x324xf32>
    %c0_73 = arith.constant 0 : index
    %c0_74 = arith.constant 0 : index
    %63 = vector.load %arg20[%c0_73, %c0_74] : memref<1x324xf32, #tpu.memory_space<vmem>>, vector<1x324xf32>
    %64 = vector.broadcast %63 : vector<1x324xf32> to vector<8x324xf32>
    %65 = arith.mulf %62, %64 : vector<8x324xf32>
    %c0_75 = arith.constant 0 : index
    %c128_76 = arith.constant 128 : index
    %66 = vector.load %arg27[%c0_75, %c128_76] : memref<8x471xf32, #tpu.memory_space<vmem>>, vector<8x324xf32>
    tpu.vector_store %arg27[%c0_75, %c128_76], %65 {strides = array<i32>} : memref<8x471xf32, #tpu.memory_space<vmem>>, vector<8x324xf32>,
    %c0_77 = arith.constant 0 : index
    %c128_78 = arith.constant 128 : index
    %67 = vector.load %arg27[%c0_77, %c128_78] : memref<8x471xf32, #tpu.memory_space<vmem>>, vector<8x324xf32>
    %c0_79 = arith.constant 0 : index
    %c129_80 = arith.constant 129 : index
    %68 = vector.load %arg27[%c0_79, %c129_80] : memref<8x471xf32, #tpu.memory_space<vmem>>, vector<8x324xf32>
    %c0_81 = arith.constant 0 : index
    %c146_82 = arith.constant 146 : index
    %69 = vector.load %arg27[%c0_81, %c146_82] : memref<8x471xf32, #tpu.memory_space<vmem>>, vector<8x324xf32>
    %c0_83 = arith.constant 0 : index
    %c147_84 = arith.constant 147 : index
    %70 = vector.load %arg27[%c0_83, %c147_84] : memref<8x471xf32, #tpu.memory_space<vmem>>, vector<8x324xf32>
    %71 = arith.maximumf %67, %68 : vector<8x324xf32>
    %72 = arith.maximumf %69, %70 : vector<8x324xf32>
    %73 = arith.maximumf %71, %72 : vector<8x324xf32>
    %74 = arith.truncf %73 : vector<8x324xf32> to vector<8x324xbf16>
    %c0_85 = arith.constant 0 : index
    %c0_86 = arith.constant 0 : index
    %75 = vector.load %arg22[%c0_85, %c0_86] : memref<324x100xbf16, #tpu.memory_space<vmem>>, vector<324x100xbf16>
    %cst_87 = arith.constant dense<0.000000e+00> : vector<8x100xf32>
    %76 = tpu.matmul %74, %75, %cst_87 {dimension_numbers = #tpu.dot_dimension_numbers<[1], [0], [0], [1], [0, 0, 1, 1], [], []>} : vector<8x324xbf16>, vector<324x100xbf16>, vector<8x100xf32> -> vector<8x100xf32>
    %c0_88 = arith.constant 0 : index
    %c128_89 = arith.constant 128 : index
    %77 = vector.load %arg28[%c0_88, %c128_89] : memref<8x239xf32, #tpu.memory_space<vmem>>, vector<8x100xf32>
    tpu.vector_store %arg28[%c0_88, %c128_89], %76 {strides = array<i32>} : memref<8x239xf32, #tpu.memory_space<vmem>>, vector<8x100xf32>,
    %c0_90 = arith.constant 0 : index
    %c0_91 = arith.constant 0 : index
    %78 = vector.load %arg4[%c0_90, %c0_91] : memref<16x72xbf16, #tpu.memory_space<vmem>>, vector<16x72xbf16>
    %c0_92 = arith.constant 0 : index
    %c117 = arith.constant 117 : index
    %79 = vector.load %arg28[%c0_92, %c117] : memref<8x239xf32, #tpu.memory_space<vmem>>, vector<8x100xf32>
    %c0_93 = arith.constant 0 : index
    %c118 = arith.constant 118 : index
    %80 = vector.load %arg28[%c0_93, %c118] : memref<8x239xf32, #tpu.memory_space<vmem>>, vector<8x100xf32>
    %c0_94 = arith.constant 0 : index
    %c119 = arith.constant 119 : index
    %81 = vector.load %arg28[%c0_94, %c119] : memref<8x239xf32, #tpu.memory_space<vmem>>, vector<8x100xf32>
    %c0_95 = arith.constant 0 : index
    %c127_96 = arith.constant 127 : index
    %82 = vector.load %arg28[%c0_95, %c127_96] : memref<8x239xf32, #tpu.memory_space<vmem>>, vector<8x100xf32>
    %c0_97 = arith.constant 0 : index
    %c128_98 = arith.constant 128 : index
    %83 = vector.load %arg28[%c0_97, %c128_98] : memref<8x239xf32, #tpu.memory_space<vmem>>, vector<8x100xf32>
    %c0_99 = arith.constant 0 : index
    %c129_100 = arith.constant 129 : index
    %84 = vector.load %arg28[%c0_99, %c129_100] : memref<8x239xf32, #tpu.memory_space<vmem>>, vector<8x100xf32>
    %c0_101 = arith.constant 0 : index
    %c137 = arith.constant 137 : index
    %85 = vector.load %arg28[%c0_101, %c137] : memref<8x239xf32, #tpu.memory_space<vmem>>, vector<8x100xf32>
    %c0_102 = arith.constant 0 : index
    %c138 = arith.constant 138 : index
    %86 = vector.load %arg28[%c0_102, %c138] : memref<8x239xf32, #tpu.memory_space<vmem>>, vector<8x100xf32>
    %c0_103 = arith.constant 0 : index
    %c139 = arith.constant 139 : index
    %87 = vector.load %arg28[%c0_103, %c139] : memref<8x239xf32, #tpu.memory_space<vmem>>, vector<8x100xf32>
    %88 = tpu.concatenate %79, %80, %81, %82, %83, %84, %85, %86, %87 in 0 : vector<8x100xf32>, vector<8x100xf32>, vector<8x100xf32>, vector<8x100xf32>, vector<8x100xf32>, vector<8x100xf32>, vector<8x100xf32>, vector<8x100xf32>, vector<8x100xf32> -> vector<72x100xf32>
    %89 = arith.truncf %88 : vector<72x100xf32> to vector<72x100xbf16>
    %cst_104 = arith.constant dense<0.000000e+00> : vector<16x100xf32>
    %90 = tpu.matmul %78, %89, %cst_104 {dimension_numbers = #tpu.dot_dimension_numbers<[1], [0], [0], [1], [0, 0, 1, 1], [], []>} : vector<16x72xbf16>, vector<72x100xbf16>, vector<16x100xf32> -> vector<16x100xf32>
    %c0_105 = arith.constant 0 : index
    %c0_106 = arith.constant 0 : index
    %91 = vector.load %arg5[%c0_105, %c0_106] : memref<16x1xf32, #tpu.memory_space<vmem>>, vector<16x1xf32>
    %92 = vector.broadcast %91 : vector<16x1xf32> to vector<16x100xf32>
    %93 = arith.addf %90, %92 : vector<16x100xf32>
    %cst_107 = arith.constant 0.000000e+00 : f32
    %94 = vector.broadcast %cst_107 : f32 to vector<16x100xf32>
    %95 = arith.maximumf %93, %94 : vector<16x100xf32>
    %c0_108 = arith.constant 0 : index
    %c0_109 = arith.constant 0 : index
    %96 = vector.load %arg21[%c0_108, %c0_109] : memref<1x100xf32, #tpu.memory_space<vmem>>, vector<1x100xf32>
    %97 = vector.broadcast %96 : vector<1x100xf32> to vector<16x100xf32>
    %98 = arith.mulf %95, %97 : vector<16x100xf32>
    %c0_110 = arith.constant 0 : index
    %c128_111 = arith.constant 128 : index
    %99 = vector.load %arg29[%c0_110, %c128_111] : memref<16x239xf32, #tpu.memory_space<vmem>>, vector<16x100xf32>
    tpu.vector_store %arg29[%c0_110, %c128_111], %98 {strides = array<i32>} : memref<16x239xf32, #tpu.memory_space<vmem>>, vector<16x100xf32>,
    %c0_112 = arith.constant 0 : index
    %c128_113 = arith.constant 128 : index
    %100 = vector.load %arg29[%c0_112, %c128_113] : memref<16x239xf32, #tpu.memory_space<vmem>>, vector<16x100xf32>
    %c0_114 = arith.constant 0 : index
    %c129_115 = arith.constant 129 : index
    %101 = vector.load %arg29[%c0_114, %c129_115] : memref<16x239xf32, #tpu.memory_space<vmem>>, vector<16x100xf32>
    %c0_116 = arith.constant 0 : index
    %c138_117 = arith.constant 138 : index
    %102 = vector.load %arg29[%c0_116, %c138_117] : memref<16x239xf32, #tpu.memory_space<vmem>>, vector<16x100xf32>
    %c0_118 = arith.constant 0 : index
    %c139_119 = arith.constant 139 : index
    %103 = vector.load %arg29[%c0_118, %c139_119] : memref<16x239xf32, #tpu.memory_space<vmem>>, vector<16x100xf32>
    %104 = arith.maximumf %100, %101 : vector<16x100xf32>
    %105 = arith.maximumf %102, %103 : vector<16x100xf32>
    %106 = arith.maximumf %104, %105 : vector<16x100xf32>
    %107 = arith.truncf %106 : vector<16x100xf32> to vector<16x100xbf16>
    %c0_120 = arith.constant 0 : index
    %c0_121 = arith.constant 0 : index
    %108 = vector.load %arg23[%c0_120, %c0_121] : memref<100x36xbf16, #tpu.memory_space<vmem>>, vector<100x36xbf16>
    %cst_122 = arith.constant dense<0.000000e+00> : vector<16x36xf32>
    %109 = tpu.matmul %107, %108, %cst_122 {dimension_numbers = #tpu.dot_dimension_numbers<[1], [0], [0], [1], [0, 0, 1, 1], [], []>} : vector<16x100xbf16>, vector<100x36xbf16>, vector<16x36xf32> -> vector<16x36xf32>
    %c0_123 = arith.constant 0 : index
    %c128_124 = arith.constant 128 : index
    %110 = vector.load %arg30[%c0_123, %c128_124] : memref<16x171xf32, #tpu.memory_space<vmem>>, vector<16x36xf32>
    tpu.vector_store %arg30[%c0_123, %c128_124], %109 {strides = array<i32>} : memref<16x171xf32, #tpu.memory_space<vmem>>, vector<16x36xf32>,
    %c0_125 = arith.constant 0 : index
    %c0_126 = arith.constant 0 : index
    %111 = vector.load %arg6[%c0_125, %c0_126] : memref<32x144xbf16, #tpu.memory_space<vmem>>, vector<32x144xbf16>
    %c0_127 = arith.constant 0 : index
    %c121 = arith.constant 121 : index
    %112 = vector.load %arg30[%c0_127, %c121] : memref<16x171xf32, #tpu.memory_space<vmem>>, vector<16x36xf32>
    %c0_128 = arith.constant 0 : index
    %c122 = arith.constant 122 : index
    %113 = vector.load %arg30[%c0_128, %c122] : memref<16x171xf32, #tpu.memory_space<vmem>>, vector<16x36xf32>
    %c0_129 = arith.constant 0 : index
    %c123 = arith.constant 123 : index
    %114 = vector.load %arg30[%c0_129, %c123] : memref<16x171xf32, #tpu.memory_space<vmem>>, vector<16x36xf32>
    %c0_130 = arith.constant 0 : index
    %c127_131 = arith.constant 127 : index
    %115 = vector.load %arg30[%c0_130, %c127_131] : memref<16x171xf32, #tpu.memory_space<vmem>>, vector<16x36xf32>
    %c0_132 = arith.constant 0 : index
    %c128_133 = arith.constant 128 : index
    %116 = vector.load %arg30[%c0_132, %c128_133] : memref<16x171xf32, #tpu.memory_space<vmem>>, vector<16x36xf32>
    %c0_134 = arith.constant 0 : index
    %c129_135 = arith.constant 129 : index
    %117 = vector.load %arg30[%c0_134, %c129_135] : memref<16x171xf32, #tpu.memory_space<vmem>>, vector<16x36xf32>
    %c0_136 = arith.constant 0 : index
    %c133 = arith.constant 133 : index
    %118 = vector.load %arg30[%c0_136, %c133] : memref<16x171xf32, #tpu.memory_space<vmem>>, vector<16x36xf32>
    %c0_137 = arith.constant 0 : index
    %c134 = arith.constant 134 : index
    %119 = vector.load %arg30[%c0_137, %c134] : memref<16x171xf32, #tpu.memory_space<vmem>>, vector<16x36xf32>
    %c0_138 = arith.constant 0 : index
    %c135 = arith.constant 135 : index
    %120 = vector.load %arg30[%c0_138, %c135] : memref<16x171xf32, #tpu.memory_space<vmem>>, vector<16x36xf32>
    %121 = tpu.concatenate %112, %113, %114, %115, %116, %117, %118, %119, %120 in 0 : vector<16x36xf32>, vector<16x36xf32>, vector<16x36xf32>, vector<16x36xf32>, vector<16x36xf32>, vector<16x36xf32>, vector<16x36xf32>, vector<16x36xf32>, vector<16x36xf32> -> vector<144x36xf32>
    %122 = arith.truncf %121 : vector<144x36xf32> to vector<144x36xbf16>
    %cst_139 = arith.constant dense<0.000000e+00> : vector<32x36xf32>
    %123 = tpu.matmul %111, %122, %cst_139 {dimension_numbers = #tpu.dot_dimension_numbers<[1], [0], [0], [1], [0, 0, 1, 1], [], []>} : vector<32x144xbf16>, vector<144x36xbf16>, vector<32x36xf32> -> vector<32x36xf32>
    %c0_140 = arith.constant 0 : index
    %c0_141 = arith.constant 0 : index
    %124 = vector.load %arg7[%c0_140, %c0_141] : memref<32x1xf32, #tpu.memory_space<vmem>>, vector<32x1xf32>
    %125 = vector.broadcast %124 : vector<32x1xf32> to vector<32x36xf32>
    %126 = arith.addf %123, %125 : vector<32x36xf32>
    %cst_142 = arith.constant 0.000000e+00 : f32
    %127 = vector.broadcast %cst_142 : f32 to vector<32x36xf32>
    %128 = arith.maximumf %126, %127 : vector<32x36xf32>
    %129 = arith.truncf %95 : vector<16x100xf32> to vector<16x100xbf16>
    %c0_143 = arith.constant 0 : index
    %c0_144 = arith.constant 0 : index
    %130 = vector.load %arg24[%c0_143, %c0_144] : memref<100x324xbf16, #tpu.memory_space<vmem>>, vector<100x324xbf16>
    %cst_145 = arith.constant dense<0.000000e+00> : vector<16x324xf32>
    %131 = tpu.matmul %129, %130, %cst_145 {dimension_numbers = #tpu.dot_dimension_numbers<[1], [0], [0], [1], [0, 0, 1, 1], [], []>} : vector<16x100xbf16>, vector<100x324xbf16>, vector<16x324xf32> -> vector<16x324xf32>
    %c0_146 = arith.constant 0 : index
    %c128_147 = arith.constant 128 : index
    %132 = vector.load %arg31[%c0_146, %c128_147] : memref<16x471xf32, #tpu.memory_space<vmem>>, vector<16x324xf32>
    tpu.vector_store %arg31[%c0_146, %c128_147], %131 {strides = array<i32>} : memref<16x471xf32, #tpu.memory_space<vmem>>, vector<16x324xf32>,
    %133 = arith.truncf %128 : vector<32x36xf32> to vector<32x36xbf16>
    %c0_148 = arith.constant 0 : index
    %c0_149 = arith.constant 0 : index
    %134 = vector.load %arg25[%c0_148, %c0_149] : memref<36x100xbf16, #tpu.memory_space<vmem>>, vector<36x100xbf16>
    %cst_150 = arith.constant dense<0.000000e+00> : vector<32x100xf32>
    %135 = tpu.matmul %133, %134, %cst_150 {dimension_numbers = #tpu.dot_dimension_numbers<[1], [0], [0], [1], [0, 0, 1, 1], [], []>} : vector<32x36xbf16>, vector<36x100xbf16>, vector<32x100xf32> -> vector<32x100xf32>
    %c0_151 = arith.constant 0 : index
    %c128_152 = arith.constant 128 : index
    %136 = vector.load %arg32[%c0_151, %c128_152] : memref<32x239xf32, #tpu.memory_space<vmem>>, vector<32x100xf32>
    tpu.vector_store %arg32[%c0_151, %c128_152], %135 {strides = array<i32>} : memref<32x239xf32, #tpu.memory_space<vmem>>, vector<32x100xf32>,
    %c0_153 = arith.constant 0 : index
    %c0_154 = arith.constant 0 : index
    %137 = vector.load %arg8[%c0_153, %c0_154] : memref<8x72xbf16, #tpu.memory_space<vmem>>, vector<8x72xbf16>
    %c0_155 = arith.constant 0 : index
    %c109_156 = arith.constant 109 : index
    %138 = vector.load %arg27[%c0_155, %c109_156] : memref<8x471xf32, #tpu.memory_space<vmem>>, vector<8x324xf32>
    %c0_157 = arith.constant 0 : index
    %c110_158 = arith.constant 110 : index
    %139 = vector.load %arg27[%c0_157, %c110_158] : memref<8x471xf32, #tpu.memory_space<vmem>>, vector<8x324xf32>
    %c0_159 = arith.constant 0 : index
    %c111_160 = arith.constant 111 : index
    %140 = vector.load %arg27[%c0_159, %c111_160] : memref<8x471xf32, #tpu.memory_space<vmem>>, vector<8x324xf32>
    %c0_161 = arith.constant 0 : index
    %c127_162 = arith.constant 127 : index
    %141 = vector.load %arg27[%c0_161, %c127_162] : memref<8x471xf32, #tpu.memory_space<vmem>>, vector<8x324xf32>
    %c0_163 = arith.constant 0 : index
    %c128_164 = arith.constant 128 : index
    %142 = vector.load %arg27[%c0_163, %c128_164] : memref<8x471xf32, #tpu.memory_space<vmem>>, vector<8x324xf32>
    %c0_165 = arith.constant 0 : index
    %c129_166 = arith.constant 129 : index
    %143 = vector.load %arg27[%c0_165, %c129_166] : memref<8x471xf32, #tpu.memory_space<vmem>>, vector<8x324xf32>
    %c0_167 = arith.constant 0 : index
    %c145_168 = arith.constant 145 : index
    %144 = vector.load %arg27[%c0_167, %c145_168] : memref<8x471xf32, #tpu.memory_space<vmem>>, vector<8x324xf32>
    %c0_169 = arith.constant 0 : index
    %c146_170 = arith.constant 146 : index
    %145 = vector.load %arg27[%c0_169, %c146_170] : memref<8x471xf32, #tpu.memory_space<vmem>>, vector<8x324xf32>
    %c0_171 = arith.constant 0 : index
    %c147_172 = arith.constant 147 : index
    %146 = vector.load %arg27[%c0_171, %c147_172] : memref<8x471xf32, #tpu.memory_space<vmem>>, vector<8x324xf32>
    %147 = tpu.concatenate %138, %139, %140, %141, %142, %143, %144, %145, %146 in 0 : vector<8x324xf32>, vector<8x324xf32>, vector<8x324xf32>, vector<8x324xf32>, vector<8x324xf32>, vector<8x324xf32>, vector<8x324xf32>, vector<8x324xf32>, vector<8x324xf32> -> vector<72x324xf32>
    %148 = arith.truncf %147 : vector<72x324xf32> to vector<72x324xbf16>
    %cst_173 = arith.constant dense<0.000000e+00> : vector<8x324xf32>
    %149 = tpu.matmul %137, %148, %cst_173 {dimension_numbers = #tpu.dot_dimension_numbers<[1], [0], [0], [1], [0, 0, 1, 1], [], []>} : vector<8x72xbf16>, vector<72x324xbf16>, vector<8x324xf32> -> vector<8x324xf32>
    %c0_174 = arith.constant 0 : index
    %c0_175 = arith.constant 0 : index
    %150 = vector.load %arg9[%c0_174, %c0_175] : memref<8x144xbf16, #tpu.memory_space<vmem>>, vector<8x144xbf16>
    %c0_176 = arith.constant 0 : index
    %c109_177 = arith.constant 109 : index
    %151 = vector.load %arg31[%c0_176, %c109_177] : memref<16x471xf32, #tpu.memory_space<vmem>>, vector<16x324xf32>
    %c0_178 = arith.constant 0 : index
    %c110_179 = arith.constant 110 : index
    %152 = vector.load %arg31[%c0_178, %c110_179] : memref<16x471xf32, #tpu.memory_space<vmem>>, vector<16x324xf32>
    %c0_180 = arith.constant 0 : index
    %c111_181 = arith.constant 111 : index
    %153 = vector.load %arg31[%c0_180, %c111_181] : memref<16x471xf32, #tpu.memory_space<vmem>>, vector<16x324xf32>
    %c0_182 = arith.constant 0 : index
    %c127_183 = arith.constant 127 : index
    %154 = vector.load %arg31[%c0_182, %c127_183] : memref<16x471xf32, #tpu.memory_space<vmem>>, vector<16x324xf32>
    %c0_184 = arith.constant 0 : index
    %c128_185 = arith.constant 128 : index
    %155 = vector.load %arg31[%c0_184, %c128_185] : memref<16x471xf32, #tpu.memory_space<vmem>>, vector<16x324xf32>
    %c0_186 = arith.constant 0 : index
    %c129_187 = arith.constant 129 : index
    %156 = vector.load %arg31[%c0_186, %c129_187] : memref<16x471xf32, #tpu.memory_space<vmem>>, vector<16x324xf32>
    %c0_188 = arith.constant 0 : index
    %c145_189 = arith.constant 145 : index
    %157 = vector.load %arg31[%c0_188, %c145_189] : memref<16x471xf32, #tpu.memory_space<vmem>>, vector<16x324xf32>
    %c0_190 = arith.constant 0 : index
    %c146_191 = arith.constant 146 : index
    %158 = vector.load %arg31[%c0_190, %c146_191] : memref<16x471xf32, #tpu.memory_space<vmem>>, vector<16x324xf32>
    %c0_192 = arith.constant 0 : index
    %c147_193 = arith.constant 147 : index
    %159 = vector.load %arg31[%c0_192, %c147_193] : memref<16x471xf32, #tpu.memory_space<vmem>>, vector<16x324xf32>
    %160 = tpu.concatenate %151, %152, %153, %154, %155, %156, %157, %158, %159 in 0 : vector<16x324xf32>, vector<16x324xf32>, vector<16x324xf32>, vector<16x324xf32>, vector<16x324xf32>, vector<16x324xf32>, vector<16x324xf32>, vector<16x324xf32>, vector<16x324xf32> -> vector<144x324xf32>
    %161 = arith.truncf %160 : vector<144x324xf32> to vector<144x324xbf16>
    %cst_194 = arith.constant dense<0.000000e+00> : vector<8x324xf32>
    %162 = tpu.matmul %150, %161, %cst_194 {dimension_numbers = #tpu.dot_dimension_numbers<[1], [0], [0], [1], [0, 0, 1, 1], [], []>} : vector<8x144xbf16>, vector<144x324xbf16>, vector<8x324xf32> -> vector<8x324xf32>
    %163 = arith.addf %149, %162 : vector<8x324xf32>
    %c0_195 = arith.constant 0 : index
    %c0_196 = arith.constant 0 : index
    %164 = vector.load %arg10[%c0_195, %c0_196] : memref<8x1xf32, #tpu.memory_space<vmem>>, vector<8x1xf32>
    %165 = vector.broadcast %164 : vector<8x1xf32> to vector<8x324xf32>
    %166 = arith.addf %163, %165 : vector<8x324xf32>
    %cst_197 = arith.constant 0.000000e+00 : f32
    %167 = vector.broadcast %cst_197 : f32 to vector<8x324xf32>
    %168 = arith.maximumf %166, %167 : vector<8x324xf32>
    %c0_198 = arith.constant 0 : index
    %c0_199 = arith.constant 0 : index
    %169 = vector.load %arg20[%c0_198, %c0_199] : memref<1x324xf32, #tpu.memory_space<vmem>>, vector<1x324xf32>
    %170 = vector.broadcast %169 : vector<1x324xf32> to vector<8x324xf32>
    %171 = arith.mulf %168, %170 : vector<8x324xf32>
    %c0_200 = arith.constant 0 : index
    %c128_201 = arith.constant 128 : index
    %172 = vector.load %arg33[%c0_200, %c128_201] : memref<8x471xf32, #tpu.memory_space<vmem>>, vector<8x324xf32>
    tpu.vector_store %arg33[%c0_200, %c128_201], %171 {strides = array<i32>} : memref<8x471xf32, #tpu.memory_space<vmem>>, vector<8x324xf32>,
    %c0_202 = arith.constant 0 : index
    %c0_203 = arith.constant 0 : index
    %173 = vector.load %arg11[%c0_202, %c0_203] : memref<16x144xbf16, #tpu.memory_space<vmem>>, vector<16x144xbf16>
    %c0_204 = arith.constant 0 : index
    %c117_205 = arith.constant 117 : index
    %174 = vector.load %arg29[%c0_204, %c117_205] : memref<16x239xf32, #tpu.memory_space<vmem>>, vector<16x100xf32>
    %c0_206 = arith.constant 0 : index
    %c118_207 = arith.constant 118 : index
    %175 = vector.load %arg29[%c0_206, %c118_207] : memref<16x239xf32, #tpu.memory_space<vmem>>, vector<16x100xf32>
    %c0_208 = arith.constant 0 : index
    %c119_209 = arith.constant 119 : index
    %176 = vector.load %arg29[%c0_208, %c119_209] : memref<16x239xf32, #tpu.memory_space<vmem>>, vector<16x100xf32>
    %c0_210 = arith.constant 0 : index
    %c127_211 = arith.constant 127 : index
    %177 = vector.load %arg29[%c0_210, %c127_211] : memref<16x239xf32, #tpu.memory_space<vmem>>, vector<16x100xf32>
    %c0_212 = arith.constant 0 : index
    %c128_213 = arith.constant 128 : index
    %178 = vector.load %arg29[%c0_212, %c128_213] : memref<16x239xf32, #tpu.memory_space<vmem>>, vector<16x100xf32>
    %c0_214 = arith.constant 0 : index
    %c129_215 = arith.constant 129 : index
    %179 = vector.load %arg29[%c0_214, %c129_215] : memref<16x239xf32, #tpu.memory_space<vmem>>, vector<16x100xf32>
    %c0_216 = arith.constant 0 : index
    %c137_217 = arith.constant 137 : index
    %180 = vector.load %arg29[%c0_216, %c137_217] : memref<16x239xf32, #tpu.memory_space<vmem>>, vector<16x100xf32>
    %c0_218 = arith.constant 0 : index
    %c138_219 = arith.constant 138 : index
    %181 = vector.load %arg29[%c0_218, %c138_219] : memref<16x239xf32, #tpu.memory_space<vmem>>, vector<16x100xf32>
    %c0_220 = arith.constant 0 : index
    %c139_221 = arith.constant 139 : index
    %182 = vector.load %arg29[%c0_220, %c139_221] : memref<16x239xf32, #tpu.memory_space<vmem>>, vector<16x100xf32>
    %183 = tpu.concatenate %174, %175, %176, %177, %178, %179, %180, %181, %182 in 0 : vector<16x100xf32>, vector<16x100xf32>, vector<16x100xf32>, vector<16x100xf32>, vector<16x100xf32>, vector<16x100xf32>, vector<16x100xf32>, vector<16x100xf32>, vector<16x100xf32> -> vector<144x100xf32>
    %184 = arith.truncf %183 : vector<144x100xf32> to vector<144x100xbf16>
    %cst_222 = arith.constant dense<0.000000e+00> : vector<16x100xf32>
    %185 = tpu.matmul %173, %184, %cst_222 {dimension_numbers = #tpu.dot_dimension_numbers<[1], [0], [0], [1], [0, 0, 1, 1], [], []>} : vector<16x144xbf16>, vector<144x100xbf16>, vector<16x100xf32> -> vector<16x100xf32>
    %c0_223 = arith.constant 0 : index
    %c0_224 = arith.constant 0 : index
    %186 = vector.load %arg12[%c0_223, %c0_224] : memref<16x288xbf16, #tpu.memory_space<vmem>>, vector<16x288xbf16>
    %c0_225 = arith.constant 0 : index
    %c117_226 = arith.constant 117 : index
    %187 = vector.load %arg32[%c0_225, %c117_226] : memref<32x239xf32, #tpu.memory_space<vmem>>, vector<32x100xf32>
    %c0_227 = arith.constant 0 : index
    %c118_228 = arith.constant 118 : index
    %188 = vector.load %arg32[%c0_227, %c118_228] : memref<32x239xf32, #tpu.memory_space<vmem>>, vector<32x100xf32>
    %c0_229 = arith.constant 0 : index
    %c119_230 = arith.constant 119 : index
    %189 = vector.load %arg32[%c0_229, %c119_230] : memref<32x239xf32, #tpu.memory_space<vmem>>, vector<32x100xf32>
    %c0_231 = arith.constant 0 : index
    %c127_232 = arith.constant 127 : index
    %190 = vector.load %arg32[%c0_231, %c127_232] : memref<32x239xf32, #tpu.memory_space<vmem>>, vector<32x100xf32>
    %c0_233 = arith.constant 0 : index
    %c128_234 = arith.constant 128 : index
    %191 = vector.load %arg32[%c0_233, %c128_234] : memref<32x239xf32, #tpu.memory_space<vmem>>, vector<32x100xf32>
    %c0_235 = arith.constant 0 : index
    %c129_236 = arith.constant 129 : index
    %192 = vector.load %arg32[%c0_235, %c129_236] : memref<32x239xf32, #tpu.memory_space<vmem>>, vector<32x100xf32>
    %c0_237 = arith.constant 0 : index
    %c137_238 = arith.constant 137 : index
    %193 = vector.load %arg32[%c0_237, %c137_238] : memref<32x239xf32, #tpu.memory_space<vmem>>, vector<32x100xf32>
    %c0_239 = arith.constant 0 : index
    %c138_240 = arith.constant 138 : index
    %194 = vector.load %arg32[%c0_239, %c138_240] : memref<32x239xf32, #tpu.memory_space<vmem>>, vector<32x100xf32>
    %c0_241 = arith.constant 0 : index
    %c139_242 = arith.constant 139 : index
    %195 = vector.load %arg32[%c0_241, %c139_242] : memref<32x239xf32, #tpu.memory_space<vmem>>, vector<32x100xf32>
    %196 = tpu.concatenate %187, %188, %189, %190, %191, %192, %193, %194, %195 in 0 : vector<32x100xf32>, vector<32x100xf32>, vector<32x100xf32>, vector<32x100xf32>, vector<32x100xf32>, vector<32x100xf32>, vector<32x100xf32>, vector<32x100xf32>, vector<32x100xf32> -> vector<288x100xf32>
    %197 = arith.truncf %196 : vector<288x100xf32> to vector<288x100xbf16>
    %cst_243 = arith.constant dense<0.000000e+00> : vector<16x100xf32>
    %198 = tpu.matmul %186, %197, %cst_243 {dimension_numbers = #tpu.dot_dimension_numbers<[1], [0], [0], [1], [0, 0, 1, 1], [], []>} : vector<16x288xbf16>, vector<288x100xbf16>, vector<16x100xf32> -> vector<16x100xf32>
    %199 = arith.addf %185, %198 : vector<16x100xf32>
    %c0_244 = arith.constant 0 : index
    %c0_245 = arith.constant 0 : index
    %200 = vector.load %arg13[%c0_244, %c0_245] : memref<16x1xf32, #tpu.memory_space<vmem>>, vector<16x1xf32>
    %201 = vector.broadcast %200 : vector<16x1xf32> to vector<16x100xf32>
    %202 = arith.addf %199, %201 : vector<16x100xf32>
    %cst_246 = arith.constant 0.000000e+00 : f32
    %203 = vector.broadcast %cst_246 : f32 to vector<16x100xf32>
    %204 = arith.maximumf %202, %203 : vector<16x100xf32>
    %205 = arith.truncf %204 : vector<16x100xf32> to vector<16x100xbf16>
    %c0_247 = arith.constant 0 : index
    %c0_248 = arith.constant 0 : index
    %206 = vector.load %arg24[%c0_247, %c0_248] : memref<100x324xbf16, #tpu.memory_space<vmem>>, vector<100x324xbf16>
    %cst_249 = arith.constant dense<0.000000e+00> : vector<16x324xf32>
    %207 = tpu.matmul %205, %206, %cst_249 {dimension_numbers = #tpu.dot_dimension_numbers<[1], [0], [0], [1], [0, 0, 1, 1], [], []>} : vector<16x100xbf16>, vector<100x324xbf16>, vector<16x324xf32> -> vector<16x324xf32>
    %c0_250 = arith.constant 0 : index
    %c128_251 = arith.constant 128 : index
    %208 = vector.load %arg34[%c0_250, %c128_251] : memref<16x471xf32, #tpu.memory_space<vmem>>, vector<16x324xf32>
    tpu.vector_store %arg34[%c0_250, %c128_251], %207 {strides = array<i32>} : memref<16x471xf32, #tpu.memory_space<vmem>>, vector<16x324xf32>,
    %c0_252 = arith.constant 0 : index
    %c0_253 = arith.constant 0 : index
    %209 = vector.load %arg14[%c0_252, %c0_253] : memref<8x72xbf16, #tpu.memory_space<vmem>>, vector<8x72xbf16>
    %c0_254 = arith.constant 0 : index
    %c109_255 = arith.constant 109 : index
    %210 = vector.load %arg27[%c0_254, %c109_255] : memref<8x471xf32, #tpu.memory_space<vmem>>, vector<8x324xf32>
    %c0_256 = arith.constant 0 : index
    %c110_257 = arith.constant 110 : index
    %211 = vector.load %arg27[%c0_256, %c110_257] : memref<8x471xf32, #tpu.memory_space<vmem>>, vector<8x324xf32>
    %c0_258 = arith.constant 0 : index
    %c111_259 = arith.constant 111 : index
    %212 = vector.load %arg27[%c0_258, %c111_259] : memref<8x471xf32, #tpu.memory_space<vmem>>, vector<8x324xf32>
    %c0_260 = arith.constant 0 : index
    %c127_261 = arith.constant 127 : index
    %213 = vector.load %arg27[%c0_260, %c127_261] : memref<8x471xf32, #tpu.memory_space<vmem>>, vector<8x324xf32>
    %c0_262 = arith.constant 0 : index
    %c128_263 = arith.constant 128 : index
    %214 = vector.load %arg27[%c0_262, %c128_263] : memref<8x471xf32, #tpu.memory_space<vmem>>, vector<8x324xf32>
    %c0_264 = arith.constant 0 : index
    %c129_265 = arith.constant 129 : index
    %215 = vector.load %arg27[%c0_264, %c129_265] : memref<8x471xf32, #tpu.memory_space<vmem>>, vector<8x324xf32>
    %c0_266 = arith.constant 0 : index
    %c145_267 = arith.constant 145 : index
    %216 = vector.load %arg27[%c0_266, %c145_267] : memref<8x471xf32, #tpu.memory_space<vmem>>, vector<8x324xf32>
    %c0_268 = arith.constant 0 : index
    %c146_269 = arith.constant 146 : index
    %217 = vector.load %arg27[%c0_268, %c146_269] : memref<8x471xf32, #tpu.memory_space<vmem>>, vector<8x324xf32>
    %c0_270 = arith.constant 0 : index
    %c147_271 = arith.constant 147 : index
    %218 = vector.load %arg27[%c0_270, %c147_271] : memref<8x471xf32, #tpu.memory_space<vmem>>, vector<8x324xf32>
    %219 = tpu.concatenate %210, %211, %212, %213, %214, %215, %216, %217, %218 in 0 : vector<8x324xf32>, vector<8x324xf32>, vector<8x324xf32>, vector<8x324xf32>, vector<8x324xf32>, vector<8x324xf32>, vector<8x324xf32>, vector<8x324xf32>, vector<8x324xf32> -> vector<72x324xf32>
    %220 = arith.truncf %219 : vector<72x324xf32> to vector<72x324xbf16>
    %cst_272 = arith.constant dense<0.000000e+00> : vector<8x324xf32>
    %221 = tpu.matmul %209, %220, %cst_272 {dimension_numbers = #tpu.dot_dimension_numbers<[1], [0], [0], [1], [0, 0, 1, 1], [], []>} : vector<8x72xbf16>, vector<72x324xbf16>, vector<8x324xf32> -> vector<8x324xf32>
    %c0_273 = arith.constant 0 : index
    %c0_274 = arith.constant 0 : index
    %222 = vector.load %arg15[%c0_273, %c0_274] : memref<8x72xbf16, #tpu.memory_space<vmem>>, vector<8x72xbf16>
    %c0_275 = arith.constant 0 : index
    %c109_276 = arith.constant 109 : index
    %223 = vector.load %arg33[%c0_275, %c109_276] : memref<8x471xf32, #tpu.memory_space<vmem>>, vector<8x324xf32>
    %c0_277 = arith.constant 0 : index
    %c110_278 = arith.constant 110 : index
    %224 = vector.load %arg33[%c0_277, %c110_278] : memref<8x471xf32, #tpu.memory_space<vmem>>, vector<8x324xf32>
    %c0_279 = arith.constant 0 : index
    %c111_280 = arith.constant 111 : index
    %225 = vector.load %arg33[%c0_279, %c111_280] : memref<8x471xf32, #tpu.memory_space<vmem>>, vector<8x324xf32>
    %c0_281 = arith.constant 0 : index
    %c127_282 = arith.constant 127 : index
    %226 = vector.load %arg33[%c0_281, %c127_282] : memref<8x471xf32, #tpu.memory_space<vmem>>, vector<8x324xf32>
    %c0_283 = arith.constant 0 : index
    %c128_284 = arith.constant 128 : index
    %227 = vector.load %arg33[%c0_283, %c128_284] : memref<8x471xf32, #tpu.memory_space<vmem>>, vector<8x324xf32>
    %c0_285 = arith.constant 0 : index
    %c129_286 = arith.constant 129 : index
    %228 = vector.load %arg33[%c0_285, %c129_286] : memref<8x471xf32, #tpu.memory_space<vmem>>, vector<8x324xf32>
    %c0_287 = arith.constant 0 : index
    %c145_288 = arith.constant 145 : index
    %229 = vector.load %arg33[%c0_287, %c145_288] : memref<8x471xf32, #tpu.memory_space<vmem>>, vector<8x324xf32>
    %c0_289 = arith.constant 0 : index
    %c146_290 = arith.constant 146 : index
    %230 = vector.load %arg33[%c0_289, %c146_290] : memref<8x471xf32, #tpu.memory_space<vmem>>, vector<8x324xf32>
    %c0_291 = arith.constant 0 : index
    %c147_292 = arith.constant 147 : index
    %231 = vector.load %arg33[%c0_291, %c147_292] : memref<8x471xf32, #tpu.memory_space<vmem>>, vector<8x324xf32>
    %232 = tpu.concatenate %223, %224, %225, %226, %227, %228, %229, %230, %231 in 0 : vector<8x324xf32>, vector<8x324xf32>, vector<8x324xf32>, vector<8x324xf32>, vector<8x324xf32>, vector<8x324xf32>, vector<8x324xf32>, vector<8x324xf32>, vector<8x324xf32> -> vector<72x324xf32>
    %233 = arith.truncf %232 : vector<72x324xf32> to vector<72x324xbf16>
    %cst_293 = arith.constant dense<0.000000e+00> : vector<8x324xf32>
    %234 = tpu.matmul %222, %233, %cst_293 {dimension_numbers = #tpu.dot_dimension_numbers<[1], [0], [0], [1], [0, 0, 1, 1], [], []>} : vector<8x72xbf16>, vector<72x324xbf16>, vector<8x324xf32> -> vector<8x324xf32>
    %235 = arith.addf %221, %234 : vector<8x324xf32>
    %c0_294 = arith.constant 0 : index
    %c0_295 = arith.constant 0 : index
    %236 = vector.load %arg16[%c0_294, %c0_295] : memref<8x144xbf16, #tpu.memory_space<vmem>>, vector<8x144xbf16>
    %c0_296 = arith.constant 0 : index
    %c109_297 = arith.constant 109 : index
    %237 = vector.load %arg34[%c0_296, %c109_297] : memref<16x471xf32, #tpu.memory_space<vmem>>, vector<16x324xf32>
    %c0_298 = arith.constant 0 : index
    %c110_299 = arith.constant 110 : index
    %238 = vector.load %arg34[%c0_298, %c110_299] : memref<16x471xf32, #tpu.memory_space<vmem>>, vector<16x324xf32>
    %c0_300 = arith.constant 0 : index
    %c111_301 = arith.constant 111 : index
    %239 = vector.load %arg34[%c0_300, %c111_301] : memref<16x471xf32, #tpu.memory_space<vmem>>, vector<16x324xf32>
    %c0_302 = arith.constant 0 : index
    %c127_303 = arith.constant 127 : index
    %240 = vector.load %arg34[%c0_302, %c127_303] : memref<16x471xf32, #tpu.memory_space<vmem>>, vector<16x324xf32>
    %c0_304 = arith.constant 0 : index
    %c128_305 = arith.constant 128 : index
    %241 = vector.load %arg34[%c0_304, %c128_305] : memref<16x471xf32, #tpu.memory_space<vmem>>, vector<16x324xf32>
    %c0_306 = arith.constant 0 : index
    %c129_307 = arith.constant 129 : index
    %242 = vector.load %arg34[%c0_306, %c129_307] : memref<16x471xf32, #tpu.memory_space<vmem>>, vector<16x324xf32>
    %c0_308 = arith.constant 0 : index
    %c145_309 = arith.constant 145 : index
    %243 = vector.load %arg34[%c0_308, %c145_309] : memref<16x471xf32, #tpu.memory_space<vmem>>, vector<16x324xf32>
    %c0_310 = arith.constant 0 : index
    %c146_311 = arith.constant 146 : index
    %244 = vector.load %arg34[%c0_310, %c146_311] : memref<16x471xf32, #tpu.memory_space<vmem>>, vector<16x324xf32>
    %c0_312 = arith.constant 0 : index
    %c147_313 = arith.constant 147 : index
    %245 = vector.load %arg34[%c0_312, %c147_313] : memref<16x471xf32, #tpu.memory_space<vmem>>, vector<16x324xf32>
    %246 = tpu.concatenate %237, %238, %239, %240, %241, %242, %243, %244, %245 in 0 : vector<16x324xf32>, vector<16x324xf32>, vector<16x324xf32>, vector<16x324xf32>, vector<16x324xf32>, vector<16x324xf32>, vector<16x324xf32>, vector<16x324xf32>, vector<16x324xf32> -> vector<144x324xf32>
    %247 = arith.truncf %246 : vector<144x324xf32> to vector<144x324xbf16>
    %cst_314 = arith.constant dense<0.000000e+00> : vector<8x324xf32>
    %248 = tpu.matmul %236, %247, %cst_314 {dimension_numbers = #tpu.dot_dimension_numbers<[1], [0], [0], [1], [0, 0, 1, 1], [], []>} : vector<8x144xbf16>, vector<144x324xbf16>, vector<8x324xf32> -> vector<8x324xf32>
    %249 = arith.addf %235, %248 : vector<8x324xf32>
    %c0_315 = arith.constant 0 : index
    %c0_316 = arith.constant 0 : index
    %250 = vector.load %arg17[%c0_315, %c0_316] : memref<8x1xf32, #tpu.memory_space<vmem>>, vector<8x1xf32>
    %251 = vector.broadcast %250 : vector<8x1xf32> to vector<8x324xf32>
    %252 = arith.addf %249, %251 : vector<8x324xf32>
    %cst_317 = arith.constant 0.000000e+00 : f32
    %253 = vector.broadcast %cst_317 : f32 to vector<8x324xf32>
    %254 = arith.maximumf %252, %253 : vector<8x324xf32>
    %c0_318 = arith.constant 0 : index
    %c0_319 = arith.constant 0 : index
    %255 = vector.load %arg20[%c0_318, %c0_319] : memref<1x324xf32, #tpu.memory_space<vmem>>, vector<1x324xf32>
    %256 = vector.broadcast %255 : vector<1x324xf32> to vector<8x324xf32>
    %257 = arith.mulf %254, %256 : vector<8x324xf32>
    %c0_320 = arith.constant 0 : index
    %c128_321 = arith.constant 128 : index
    %258 = vector.load %arg35[%c0_320, %c128_321] : memref<8x471xf32, #tpu.memory_space<vmem>>, vector<8x324xf32>
    tpu.vector_store %arg35[%c0_320, %c128_321], %257 {strides = array<i32>} : memref<8x471xf32, #tpu.memory_space<vmem>>, vector<8x324xf32>,
    %c0_322 = arith.constant 0 : index
    %c0_323 = arith.constant 0 : index
    %259 = vector.load %arg18[%c0_322, %c0_323] : memref<8x72xbf16, #tpu.memory_space<vmem>>, vector<8x72xbf16>
    %c0_324 = arith.constant 0 : index
    %c109_325 = arith.constant 109 : index
    %260 = vector.load %arg35[%c0_324, %c109_325] : memref<8x471xf32, #tpu.memory_space<vmem>>, vector<8x324xf32>
    %c0_326 = arith.constant 0 : index
    %c110_327 = arith.constant 110 : index
    %261 = vector.load %arg35[%c0_326, %c110_327] : memref<8x471xf32, #tpu.memory_space<vmem>>, vector<8x324xf32>
    %c0_328 = arith.constant 0 : index
    %c111_329 = arith.constant 111 : index
    %262 = vector.load %arg35[%c0_328, %c111_329] : memref<8x471xf32, #tpu.memory_space<vmem>>, vector<8x324xf32>
    %c0_330 = arith.constant 0 : index
    %c127_331 = arith.constant 127 : index
    %263 = vector.load %arg35[%c0_330, %c127_331] : memref<8x471xf32, #tpu.memory_space<vmem>>, vector<8x324xf32>
    %c0_332 = arith.constant 0 : index
    %c128_333 = arith.constant 128 : index
    %264 = vector.load %arg35[%c0_332, %c128_333] : memref<8x471xf32, #tpu.memory_space<vmem>>, vector<8x324xf32>
    %c0_334 = arith.constant 0 : index
    %c129_335 = arith.constant 129 : index
    %265 = vector.load %arg35[%c0_334, %c129_335] : memref<8x471xf32, #tpu.memory_space<vmem>>, vector<8x324xf32>
    %c0_336 = arith.constant 0 : index
    %c145_337 = arith.constant 145 : index
    %266 = vector.load %arg35[%c0_336, %c145_337] : memref<8x471xf32, #tpu.memory_space<vmem>>, vector<8x324xf32>
    %c0_338 = arith.constant 0 : index
    %c146_339 = arith.constant 146 : index
    %267 = vector.load %arg35[%c0_338, %c146_339] : memref<8x471xf32, #tpu.memory_space<vmem>>, vector<8x324xf32>
    %c0_340 = arith.constant 0 : index
    %c147_341 = arith.constant 147 : index
    %268 = vector.load %arg35[%c0_340, %c147_341] : memref<8x471xf32, #tpu.memory_space<vmem>>, vector<8x324xf32>
    %269 = tpu.concatenate %260, %261, %262, %263, %264, %265, %266, %267, %268 in 0 : vector<8x324xf32>, vector<8x324xf32>, vector<8x324xf32>, vector<8x324xf32>, vector<8x324xf32>, vector<8x324xf32>, vector<8x324xf32>, vector<8x324xf32>, vector<8x324xf32> -> vector<72x324xf32>
    %270 = arith.truncf %269 : vector<72x324xf32> to vector<72x324xbf16>
    %cst_342 = arith.constant dense<0.000000e+00> : vector<8x324xf32>
    %271 = tpu.matmul %259, %270, %cst_342 {dimension_numbers = #tpu.dot_dimension_numbers<[1], [0], [0], [1], [0, 0, 1, 1], [], []>} : vector<8x72xbf16>, vector<72x324xbf16>, vector<8x324xf32> -> vector<8x324xf32>
    %c0_343 = arith.constant 0 : index
    %c0_344 = arith.constant 0 : index
    %272 = vector.load %arg19[%c0_343, %c0_344] : memref<8x1xf32, #tpu.memory_space<vmem>>, vector<8x1xf32>
    %273 = vector.broadcast %272 : vector<8x1xf32> to vector<8x324xf32>
    %274 = arith.addf %271, %273 : vector<8x324xf32>
    %c0_345 = arith.constant 0 : index
    %c0_346 = arith.constant 0 : index
    %c0_347 = arith.constant 0 : index
    %275 = vector.load %arg26[%c0_345, %c0_346, %c0_347] : memref<1x8x324xf32, #tpu.memory_space<vmem>>, vector<1x8x324xf32>
    %276 = vector.shape_cast %275 : vector<1x8x324xf32> to vector<8x324xf32>
    %277 = vector.shape_cast %274 : vector<8x324xf32> to vector<1x8x324xf32>
    tpu.vector_store %arg26[%c0_345, %c0_346, %c0_347], %277 {strides = array<i32>} : memref<1x8x324xf32, #tpu.memory_space<vmem>>, vector<1x8x324xf32>,
    return
  }
  func.func @transform_0(%arg0: i32) -> (i32, i32, i32) {
    %c0_i32 = arith.constant 0 : i32
    %c0_i32_0 = arith.constant 0 : i32
    %c0_i32_1 = arith.constant 0 : i32
    return %arg0, %c0_i32, %c0_i32_0 : i32, i32, i32
  }
  func.func @transform_1(%arg0: i32) -> (i32, i32) {
    %c0_i32 = arith.constant 0 : i32
    %c0_i32_0 = arith.constant 0 : i32
    %c0_i32_1 = arith.constant 0 : i32
    return %c0_i32, %c0_i32_0 : i32, i32
  }
  func.func @transform_2(%arg0: i32) -> (i32, i32) {
    %c0_i32 = arith.constant 0 : i32
    %c0_i32_0 = arith.constant 0 : i32
    %c0_i32_1 = arith.constant 0 : i32
    return %c0_i32, %c0_i32_0 : i32, i32
  }
  func.func @transform_3(%arg0: i32) -> (i32, i32) {
    %c0_i32 = arith.constant 0 : i32
    %c0_i32_0 = arith.constant 0 : i32
    %c0_i32_1 = arith.constant 0 : i32
    return %c0_i32, %c0_i32_0 : i32, i32
  }
  func.func @transform_4(%arg0: i32) -> (i32, i32) {
    %c0_i32 = arith.constant 0 : i32
    %c0_i32_0 = arith.constant 0 : i32
    %c0_i32_1 = arith.constant 0 : i32
    return %c0_i32, %c0_i32_0 : i32, i32
  }
  func.func @transform_5(%arg0: i32) -> (i32, i32) {
    %c0_i32 = arith.constant 0 : i32
    %c0_i32_0 = arith.constant 0 : i32
    %c0_i32_1 = arith.constant 0 : i32
    return %c0_i32, %c0_i32_0 : i32, i32
  }
  func.func @transform_6(%arg0: i32) -> (i32, i32) {
    %c0_i32 = arith.constant 0 : i32
    %c0_i32_0 = arith.constant 0 : i32
    %c0_i32_1 = arith.constant 0 : i32
    return %c0_i32, %c0_i32_0 : i32, i32
  }
  func.func @transform_7(%arg0: i32) -> (i32, i32) {
    %c0_i32 = arith.constant 0 : i32
    %c0_i32_0 = arith.constant 0 : i32
    %c0_i32_1 = arith.constant 0 : i32
    return %c0_i32, %c0_i32_0 : i32, i32
  }
  func.func @transform_8(%arg0: i32) -> (i32, i32) {
    %c0_i32 = arith.constant 0 : i32
    %c0_i32_0 = arith.constant 0 : i32
    %c0_i32_1 = arith.constant 0 : i32
    return %c0_i32, %c0_i32_0 : i32, i32
  }
  func.func @transform_9(%arg0: i32) -> (i32, i32) {
    %c0_i32 = arith.constant 0 : i32
    %c0_i32_0 = arith.constant 0 : i32
    %c0_i32_1 = arith.constant 0 : i32
    return %c0_i32, %c0_i32_0 : i32, i32
  }
  func.func @transform_10(%arg0: i32) -> (i32, i32) {
    %c0_i32 = arith.constant 0 : i32
    %c0_i32_0 = arith.constant 0 : i32
    %c0_i32_1 = arith.constant 0 : i32
    return %c0_i32, %c0_i32_0 : i32, i32
  }
  func.func @transform_11(%arg0: i32) -> (i32, i32) {
    %c0_i32 = arith.constant 0 : i32
    %c0_i32_0 = arith.constant 0 : i32
    %c0_i32_1 = arith.constant 0 : i32
    return %c0_i32, %c0_i32_0 : i32, i32
  }
  func.func @transform_12(%arg0: i32) -> (i32, i32) {
    %c0_i32 = arith.constant 0 : i32
    %c0_i32_0 = arith.constant 0 : i32
    %c0_i32_1 = arith.constant 0 : i32
    return %c0_i32, %c0_i32_0 : i32, i32
  }
  func.func @transform_13(%arg0: i32) -> (i32, i32) {
    %c0_i32 = arith.constant 0 : i32
    %c0_i32_0 = arith.constant 0 : i32
    %c0_i32_1 = arith.constant 0 : i32
    return %c0_i32, %c0_i32_0 : i32, i32
  }
  func.func @transform_14(%arg0: i32) -> (i32, i32) {
    %c0_i32 = arith.constant 0 : i32
    %c0_i32_0 = arith.constant 0 : i32
    %c0_i32_1 = arith.constant 0 : i32
    return %c0_i32, %c0_i32_0 : i32, i32
  }
  func.func @transform_15(%arg0: i32) -> (i32, i32) {
    %c0_i32 = arith.constant 0 : i32
    %c0_i32_0 = arith.constant 0 : i32
    %c0_i32_1 = arith.constant 0 : i32
    return %c0_i32, %c0_i32_0 : i32, i32
  }
  func.func @transform_16(%arg0: i32) -> (i32, i32) {
    %c0_i32 = arith.constant 0 : i32
    %c0_i32_0 = arith.constant 0 : i32
    %c0_i32_1 = arith.constant 0 : i32
    return %c0_i32, %c0_i32_0 : i32, i32
  }
  func.func @transform_17(%arg0: i32) -> (i32, i32) {
    %c0_i32 = arith.constant 0 : i32
    %c0_i32_0 = arith.constant 0 : i32
    %c0_i32_1 = arith.constant 0 : i32
    return %c0_i32, %c0_i32_0 : i32, i32
  }
  func.func @transform_18(%arg0: i32) -> (i32, i32) {
    %c0_i32 = arith.constant 0 : i32
    %c0_i32_0 = arith.constant 0 : i32
    %c0_i32_1 = arith.constant 0 : i32
    return %c0_i32, %c0_i32_0 : i32, i32
  }
  func.func @transform_19(%arg0: i32) -> (i32, i32) {
    %c0_i32 = arith.constant 0 : i32
    %c0_i32_0 = arith.constant 0 : i32
    %c0_i32_1 = arith.constant 0 : i32
    return %c0_i32, %c0_i32_0 : i32, i32
  }
  func.func @transform_20(%arg0: i32) -> (i32, i32) {
    %c0_i32 = arith.constant 0 : i32
    %c0_i32_0 = arith.constant 0 : i32
    %c0_i32_1 = arith.constant 0 : i32
    return %c0_i32, %c0_i32_0 : i32, i32
  }
  func.func @transform_21(%arg0: i32) -> (i32, i32) {
    %c0_i32 = arith.constant 0 : i32
    %c0_i32_0 = arith.constant 0 : i32
    %c0_i32_1 = arith.constant 0 : i32
    return %c0_i32, %c0_i32_0 : i32, i32
  }
  func.func @transform_22(%arg0: i32) -> (i32, i32) {
    %c0_i32 = arith.constant 0 : i32
    %c0_i32_0 = arith.constant 0 : i32
    %c0_i32_1 = arith.constant 0 : i32
    return %c0_i32, %c0_i32_0 : i32, i32
  }
  func.func @transform_23(%arg0: i32) -> (i32, i32) {
    %c0_i32 = arith.constant 0 : i32
    %c0_i32_0 = arith.constant 0 : i32
    %c0_i32_1 = arith.constant 0 : i32
    return %c0_i32, %c0_i32_0 : i32, i32
  }
  func.func @transform_24(%arg0: i32) -> (i32, i32) {
    %c0_i32 = arith.constant 0 : i32
    %c0_i32_0 = arith.constant 0 : i32
    %c0_i32_1 = arith.constant 0 : i32
    return %c0_i32, %c0_i32_0 : i32, i32
  }
  func.func @transform_25(%arg0: i32) -> (i32, i32, i32) {
    %c0_i32 = arith.constant 0 : i32
    %c0_i32_0 = arith.constant 0 : i32
    %c0_i32_1 = arith.constant 0 : i32
    return %arg0, %c0_i32, %c0_i32_0 : i32, i32, i32
  }
}

</mosaic_0001>

<bundles_post_ra>
// kernel: seg_model_forward.1
= control target key start
LH: loop header
LB: loop body
LE: loop exit
PB: predicated region body
PF: predicated region fallthrough
CT: control target
= control target key end

     0   :  { %s6501_s29 = smov 0   ;;  %s9552_s0 = inlined_call_operand.vmem [shape: f32[2,8,471], index: 0, kind: input, shape index: {}]   ;;  %s9553_s1 = inlined_call_operand.vmem [shape: bf16[8,72], index: 1, kind: input, shape index: {}]   ;;  %s9554_s2 = inlined_call_operand.vmem [shape: f32[8,1], index: 2, kind: input, shape index: {}]   ;;  %s9555_s3 = inlined_call_operand.vmem [shape: bf16[16,72], index: 3, kind: input, shape index: {}]   ;;  %s9556_s4 = inlined_call_operand.vmem [shape: f32[16,1], index: 4, kind: input, shape index: {}]   ;;  %s9557_s5 = inlined_call_operand.vmem [shape: bf16[32,144], index: 5, kind: input, shape index: {}]   ;;  %s9558_s6 = inlined_call_operand.vmem [shape: f32[32,1], index: 6, kind: input, shape index: {}]   ;;  %s9559_s7 = inlined_call_operand.vmem [shape: bf16[8,72], index: 7, kind: input, shape index: {}]   ;;  %s9560_s8 = inlined_call_operand.vmem [shape: bf16[8,144], index: 8, kind: input, shape index: {}]   ;;  %s9561_s9 = inlined_call_operand.vmem [shape: f32[8,1], index: 9, kind: input, shape index: {}]   ;;  %s9562_s10 = inlined_call_operand.vmem [shape: bf16[16,144], index: 10, kind: input, shape index: {}]   ;;  %s9563_s11 = inlined_call_operand.vmem [shape: bf16[16,288], index: 11, kind: input, shape index: {}]   ;;  %s9564_s12 = inlined_call_operand.vmem [shape: f32[16,1], index: 12, kind: input, shape index: {}]   ;;  %s9565_s13 = inlined_call_operand.vmem [shape: bf16[8,72], index: 13, kind: input, shape index: {}]   ;;  %s9566_s14 = inlined_call_operand.vmem [shape: bf16[8,72], index: 14, kind: input, shape index: {}]   ;;  %s9567_s15 = inlined_call_operand.vmem [shape: bf16[8,144], index: 15, kind: input, shape index: {}]   ;;  %s9568_s16 = inlined_call_operand.vmem [shape: f32[8,1], index: 16, kind: input, shape index: {}]   ;;  %s9569_s17 = inlined_call_operand.vmem [shape: bf16[8,72], index: 17, kind: input, shape index: {}]   ;;  %s9570_s18 = inlined_call_operand.vmem [shape: f32[8,1], index: 18, kind: input, shape index: {}]   ;;  %s9571_s19 = inlined_call_operand.vmem [shape: f32[1,324], index: 19, kind: input, shape index: {}]   ;;  %s9572_s20 = inlined_call_operand.vmem [shape: f32[1,100], index: 20, kind: input, shape index: {}]   ;;  %s9573_s21 = inlined_call_operand.vmem [shape: bf16[324,100], index: 21, kind: input, shape index: {}]   ;;  %s9574_s22 = inlined_call_operand.vmem [shape: bf16[100,36], index: 22, kind: input, shape index: {}]   ;;  %s9575_s23 = inlined_call_operand.vmem [shape: bf16[100,324], index: 23, kind: input, shape index: {}]   ;;  %s9576_s24 = inlined_call_operand.vmem [shape: bf16[36,100], index: 24, kind: input, shape index: {}]   ;;  %s9577_s25 = inlined_call_operand.vmem [shape: f32[2,8,324], index: 25, kind: output, shape index: {}]  }
   0x1   :  { %9718 = sst [smem:[#allocation42_spill]] %s9552_s0 }
   0x2   :  { %9719 = sst [smem:[#allocation43_spill]] %s9553_s1 }
   0x3   :  { %9720 = sst [smem:[#allocation44_spill]] %s9554_s2 }
   0x4   :  { %9721 = sst [smem:[#allocation45_spill]] %s9555_s3 }
   0x5   :  { %9722 = sst [smem:[#allocation46_spill]] %s9556_s4 }
   0x6   :  { %9723 = sst [smem:[#allocation47_spill]] %s9557_s5 }
   0x7   :  { %9724 = sst [smem:[#allocation48_spill]] %s9558_s6 }
   0x8   :  { %9725 = sst [smem:[#allocation49_spill]] %s9559_s7 }
   0x9   :  { %9726 = sst [smem:[#allocation50_spill]] %s9560_s8 }
   0xa   :  { %9727 = sst [smem:[#allocation51_spill]] %s9561_s9 }
   0xb   :  { %9728 = sst [smem:[#allocation52_spill]] %s9567_s15 }
   0xc   :  { %9729 = sst [smem:[#allocation53_spill]] %s9569_s17 }
   0xd   :  { %9730 = sst [smem:[#allocation54_spill]] %s9570_s18 }
   0xe   :  { %9731 = sst [smem:[#allocation55_spill]] %s9572_s20 }
   0xf   :  { %9732 = sst [smem:[#allocation56_spill]] %s9573_s21 }
  0x10   :  { %9733 = sst [smem:[#allocation57_spill]] %s9574_s22 }
  0x11   :  { %9734 = sst [smem:[#allocation58_spill]] %s9577_s25 }
  0x12 LB: > { %9735 = sst [smem:[#allocation11_spill]] %s6345_s29  ;;  %s5050_s2 = sadd.s32 4294967295, %s6345_s29   ;;  %s6345_s29 = sphi %s6501_s29, %s35_s29  }
  0x13   : > { %p5054_p0 = scmp.ge.s32.totalorder %s6345_s29, 1  ;;  %p687_p1 = scmp.lt.s32.totalorder %s6345_s29, 3 }
  0x15   : > { %p688_p2 = pnand %p5054_p0, %p687_p1 }
  0x17   : > { %691 = sbr.rel (%p688_p2) target bundleno = 4692 (0x1254), region = 120 }
  0x1c   : > { %p755_p3 = scmp.lt.s32.totalorder %s5050_s2, 1  ;;  %s9737_s3 = sld [smem:[#allocation42_spill]]  ;;  %vm834_vm0 = vcmask 1031168   ;;  %vm850_vm1 = vcmask 900096   ;;  %vm916_vm2 = vcmask 736256   ;;  %vm890_vm3 = vcmask 752640  }
  0x1d   : > { %s9587_s1 = smov 91   ;;  %s9583_s8 = smov 90   ;;  %vm903_vm4 = vcmask 744448   ;;  %vm864_vm5 = vcmask 891904   ;;  %vm877_vm6 = vcmask 883712   ;;  %vm818_vm7 = vcmask 1039360  }
  0x1e   : > { %s9958_s2 = smov (!%p755_p3, %s5050_s2), 1  ;;  %s9589_s27 = smov 109   ;;  %vm9696_vm8 = vcmask 1043456   ;;  %vm1009_vm9 = vcmask 154624   ;;  %vm9617_vm10 = vcmask 588800   ;;  %vm767_vm11 = vcmask 712224  }
  0x1f   : > { %9736 = sst [smem:[#allocation12_spill]] %s9958_s2  ;;  %s5392_s6 = sshll.u32 %s9958_s2, 5  ;;  %vm9613_vm12 = vcmask 556032   ;;  %vm1315_vm13 = vcmask 1041408   ;;  %vm770_vm14 = vcmask 909088   ;;  %vm1358_vm15 = vcmask 818176  }
  0x20   : > { %s9585_s4 = smov 92   ;;  %s9601_s28 = smov 108  }
  0x21   : > { %s9605_s9 = smov 126   ;;  %s9591_s5 = smov 110  }
  0x22   : > { %s759_s26 = scalar_lea.vmem %s9737_s3, %s5392_s6  ;;  %s9609_s0 = smov 127  }
  0x23   : > { %v6515_v0 = vld [vmem:[%s759_s26 + $0x10] sm:$0xff]  ;;  %v6517_v1 = vld [vmem:[%s759_s26 + $0x18] sm:$0xff]  ;;  %v6524_v3 = vld [vmem:[%s759_s26 + $0x8] sm:$0xff]  ;;  %s9581_s6 = smov 19   ;;  %s9738_s3 = sld [smem:[#allocation44_spill]] }
  0x24   : > { %v5509_v2 = vpack.i.bf16 %v6517_v1, %v6515_v0  ;;  %v6538_v4 = vld [vmem:[%s759_s26] sm:$0xff]  ;;  %s9739_s7 = sld [smem:[#allocation43_spill]]  ;;  %s9595_s30 = smov 107  }
  0x25   : > { %v5539_v5 = vpack.i.bf16 %v6524_v3, %v6538_v4  ;;  %s9740_s21 = sld [smem:[#allocation56_spill]]  ;;  %s9806_s15 = smov 106  }
  0x26   : > { %5510 = vrot.lane.b32.xlu1 %v5509_v2, %s9587_s1  ;;  %5500 = vrot.lane.b32.xlu0 %v5509_v2, %s9583_s8  ;;  %s9743_s26 = sld [smem:[#allocation45_spill]]  ;;  %s9827_s17 = smov 11  }
  0x27   : > { %5515 = vrot.lane.b32.xlu2 %v5509_v2, %s9589_s27  ;;  %s9744_s20 = sld [smem:[#allocation55_spill]] }
  0x28   : > { %s9745_s22 = sld [smem:[#allocation57_spill]] }
  0x29   : > { %s9864_s25 = sld [smem:[#allocation50_spill]] }
  0x2a   : > { %s9940_s18 = sld [smem:[#allocation52_spill]] }
  0x2e   : > { %5505 = vrot.lane.b32.xlu0 %v5509_v2, %s9585_s4  ;;  %910 = vrot.lane.b32.xlu1 %v6524_v3, %s9583_s8  ;;  %s9747_s8 = smov 127  }
  0x2f   : > { %5520 = vrot.lane.b32.xlu2 %v5509_v2, %s9601_s28 }
  0x36   : > { %884 = vrot.lane.b32.xlu0 %v6524_v3, %s9585_s4  ;;  %897 = vrot.lane.b32.xlu1 %v6524_v3, %s9587_s1  ;;  %s9603_s1 = smov 116   ;;  %s9597_s4 = smov 117  }
  0x37   : > { %5525 = vrot.lane.b32.xlu2 %v5509_v2, %s9605_s9 }
  0x3e   : > { %5530 = vrot.lane.b32.xlu0 %v5509_v2, %s9591_s5  ;;  %858 = vrot.lane.b32.xlu1 %v6524_v3, %s9589_s27  ;;  %s9607_s27 = smov 118  }
  0x3f   : > { %871 = vrot.lane.b32.xlu2 %v6524_v3, %s9601_s28 }
  0x46   : > { %5540 = vrot.lane.b32.xlu1 %v5539_v5, %s9605_s9  ;;  %5535 = vrot.lane.b32.xlu0 %v5509_v2, %s9609_s0 }
  0x47   : > { %5545 = vrot.lane.b32.xlu2 %v5539_v5, %s9591_s5 }
  0x4e   : > { %5550 = vrot.lane.b32.xlu0 %v5539_v5, %s9609_s0 }
  0x81   : > { %v6548_v6 = vpop.permute.xlu2 %5515 }
  0x82   : > { %v5518_v19 = vunpack.i.h.bf16 %v6548_v6  ;;  %v5517_v41 = vunpack.i.l.bf16 %v6548_v6 }
  0x84   : > { %v866_v57 = vsel %vm864_vm5, %v5517_v41, %v5518_v19 }
  0x89   : > { %v6555_v10 = vpop.permute.xlu2 %5520 }
  0x8a   : > { %v5523_v20 = vunpack.i.h.bf16 %v6555_v10  ;;  %v5522_v44 = vunpack.i.l.bf16 %v6555_v10 }
  0x8c   : > { %v934_v24 = vpack.c.bf16 %v5523_v20, %v5518_v19  ;;  %v879_v58 = vsel %vm877_vm6, %v5522_v44, %v5523_v20 }
  0x8d   : > { %v933_v63 = vpack.c.bf16 %v879_v58, %v866_v57 }
  0x91   : > { %v6566_v18 = vpop.permute.xlu2 %5525 }
  0x92   : > { %v5528_v25 = vunpack.i.h.bf16 %v6566_v18  ;;  %v5527_v26 = vunpack.i.l.bf16 %v6566_v18 }
  0x94   : > { %v837_v35 = vsel %vm834_vm0, %v5527_v26, %v5528_v25 }
  0x98   : > { %v6550_v7 = vpop.permute.xlu1 %5510  ;;  %v6552_v8 = vpop.permute.xlu0 %5500 }
  0x99   : > { %v5503_v9 = vunpack.i.h.bf16 %v6552_v8  ;;  %v5513_v14 = vunpack.i.h.bf16 %v6550_v7  ;;  %v872_v27 = vpop.permute.xlu2 %871  ;;  %v5502_v33 = vunpack.i.l.bf16 %v6552_v8  ;;  %v5512_v39 = vunpack.i.l.bf16 %v6550_v7 }
  0x9a   : > { %v878_v50 = vsel %vm877_vm6, %v872_v27, %v5522_v44 }
  0x9b   : > { %v942_v11 = vpack.c.bf16 %v5503_v9, %v5503_v9  ;;  %v918_v40 = vsel %vm916_vm2, %v5502_v33, %v5503_v9  ;;  %v905_v49 = vsel %vm903_vm4, %v5512_v39, %v5513_v14 }
  0x9c   : > { %v941_v46 = vpack.c.bf16 %v918_v40, %v918_v40 }
  0x9d   : > { %1007 = vrot.lane.b32.xlu2 %v942_v11, %s9581_s6 }
  0xa0   : > { %v6558_v12 = vpop.permute.xlu0 %5505  ;;  %v6560_v13 = vpop.permute.xlu1 %910 }
  0xa1   : > { %v5508_v15 = vunpack.i.h.bf16 %v6558_v12  ;;  %v939_v16 = vpack.c.bf16 %v6560_v13, %v6560_v13  ;;  %v5507_v37 = vunpack.i.l.bf16 %v6558_v12  ;;  %v5546_v47 = vpop.permute.xlu2 %5545  ;;  %v917_v61 = vsel %vm916_vm2, %v6560_v13, %v5502_v33 }
  0xa2   : > { %v5547_v51 = vunpack.i.l.bf16 %v5546_v47  ;;  %v5548_v55 = vunpack.i.h.bf16 %v5546_v47  ;;  %v940_v7 = vpack.c.bf16 %v917_v61, %v917_v61  ;;  %v6356_v33 = vmov 0  }
  0xa3   : > { %v938_v17 = vpack.c.bf16 %v5513_v14, %v5508_v15  ;;  %v892_v42 = vsel %vm890_vm3, %v5507_v37, %v5508_v15  ;;  %5554 = vset.pattern.permute.xlu0 %v6356_v33  ;;  %5580 = vset.pattern.permute.xlu1 %v6356_v33 }
  0xa4   : > { %v937_v53 = vpack.c.bf16 %v905_v49, %v892_v42  ;;  %v851_v60 = vsel %vm850_vm1, %v5547_v51, %v5548_v55  ;;  %5591 = vset.pattern.permute.xlu2 %v6356_v33 }
  0xa5   : > { %1001 = vrot.lane.b32.xlu2 %v939_v16, %s9581_s6  ;;  %999 = vrot.lane.b32.xlu1 %v938_v17, %s9581_s6 }
  0xa8   : > { %v6572_v21 = vpop.permute.xlu0 %884  ;;  %v6574_v22 = vpop.permute.xlu1 %897 }
  0xa9   : > { %v935_v23 = vpack.c.bf16 %v6574_v22, %v6572_v21  ;;  %v891_v9 = vsel %vm890_vm3, %v6572_v21, %v5507_v37  ;;  %v904_v10 = vsel %vm903_vm4, %v6574_v22, %v5512_v39 }
  0xaa   : > { %v936_v13 = vpack.c.bf16 %v904_v10, %v891_v9 }
  0xab   : > { %993 = vrot.lane.b32.xlu0 %v935_v23, %s9581_s6 }
  0xad   : > { %991 = vrot.lane.b32.xlu2 %v934_v24, %s9581_s6 }
  0xb0   : > { %v6582_v28 = vpop.permute.xlu0 %5530  ;;  %v859_v29 = vpop.permute.xlu1 %858 }
  0xb1   : > { %v5533_v30 = vunpack.i.h.bf16 %v6582_v28  ;;  %v5532_v31 = vunpack.i.l.bf16 %v6582_v28  ;;  %v931_v32 = vpack.c.bf16 %v872_v27, %v859_v29  ;;  %v865_v45 = vsel %vm864_vm5, %v859_v29, %v5517_v41 }
  0xb2   : > { %v932_v54 = vpack.c.bf16 %v878_v50, %v865_v45 }
  0xb3   : > { %985 = vrot.lane.b32.xlu1 %v931_v32, %s9581_s6  ;;  %v930_v34 = vpack.c.bf16 %v5533_v30, %v5528_v25  ;;  %v853_v36 = vsel %vm850_vm1, %v5532_v31, %v5533_v30  ;;  %v852_v20 = vsel %vm850_vm1, %v5548_v55, %v5532_v31 }
  0xb4   : > { %v929_v38 = vpack.c.bf16 %v853_v36, %v837_v35 }
  0xb5   : > { %983 = vrot.lane.b32.xlu0 %v930_v34, %s9581_s6 }
  0xb6   : > { %981 = vrot.lane.b32.xlu2 %v929_v38, %s9581_s6 }
  0xb8   : > { %v5536_v43 = vpop.permute.xlu0 %5535  ;;  %v5541_v48 = vpop.permute.xlu1 %5540 }
  0xb9   : > { %v5542_v52 = vunpack.i.l.bf16 %v5541_v48  ;;  %v5543_v56 = vunpack.i.h.bf16 %v5541_v48  ;;  %v5538_v2 = vunpack.i.h.bf16 %v5536_v43  ;;  %v5537_v5 = vunpack.i.l.bf16 %v5536_v43 }
  0xbb   : > { %1005 = vrot.lane.b32.xlu1 %v941_v46, %s9581_s6  ;;  %v835_v59 = vsel %vm834_vm0, %v5542_v52, %v5543_v56  ;;  %v821_v11 = vsel %vm818_vm7, %v5537_v5, %v5538_v2  ;;  %v836_v17 = vsel %vm834_vm0, %v5543_v56, %v5527_v26  ;;  %v926_v19 = vpack.c.bf16 %v5538_v2, %v6517_v1 }
  0xbc   : > { %v927_v6 = vpack.c.bf16 %v851_v60, %v835_v59  ;;  %v925_v14 = vpack.c.bf16 %v821_v11, %v6515_v0  ;;  %v928_v0 = vpack.c.bf16 %v852_v20, %v836_v17  ;;  %v6357_v60 = vmov 0.0  }
  0xbd   : > { %997 = vrot.lane.b32.xlu0 %v937_v53, %s9581_s6  ;;  %v801_v53 = vld [vmem:[%s9739_s7] sm:$0xf]  ;;  %768 = vst.msk [vmem:[#allocation2 + $0x18] sm:$0xff] %vm767_vm11, %v6357_v60  ;;  %s9593_s7 = smov 106  }
  0xbe   : > { %987 = vrot.lane.b32.xlu2 %v932_v54, %s9581_s6  ;;  %766 = vst [vmem:[#allocation2] sm:$0xff] %v6357_v60 }
  0xbf   : > { %783 = vst.msk [vmem:[#allocation6 + $0x18] sm:$0xff] %vm767_vm11, %v6357_v60 }
  0xc0   : > { %v5551_v62 = vpop.permute.xlu0 %5550  ;;  %784 = vst.msk [vmem:[#allocation6 + $0x38] sm:$0xff] %vm767_vm11, %v6357_v60 }
  0xc1   : > { %v5553_v8 = vunpack.i.h.bf16 %v5551_v62  ;;  %v5552_v16 = vunpack.i.l.bf16 %v5551_v62  ;;  %794 = vst.msk [vmem:[#allocation8 + $0x18] sm:$0xff] %vm767_vm11, %v6357_v60  ;;  %v1093_v62 = vld [vmem:[%s9571_s19] sm:$0x7] }
  0xc2   : > { %797 = vst.msk [vmem:[#allocation9 + $0x18] sm:$0xff] %vm767_vm11, %v6357_v60 }
  0xc3   : > { %989 = vrot.lane.b32.xlu1 %v933_v63, %s9581_s6  ;;  %v820_v12 = vsel %vm818_vm7, %v5553_v8, %v5537_v5  ;;  %798 = vst.msk [vmem:[#allocation9 + $0x38] sm:$0xff] %vm767_vm11, %v6357_v60 }
  0xc4   : > { %v924_v15 = vpack.c.bf16 %v820_v12, %v6524_v3  ;;  %v819_v3 = vsel %vm818_vm7, %v5552_v16, %v5553_v8  ;;  %800 = vst.msk [vmem:[#allocation10 + $0x18] sm:$0xff] %vm767_vm11, %v6357_v60  ;;  %v1097_v8 = vperm.slane %v1093_v62, 2  ;;  %vm1384_vm11 = vcmask 965632  }
  0xc5   : > { %1003 = vrot.lane.b32.xlu0 %v940_v7, %s9581_s6  ;;  %v923_v21 = vpack.c.bf16 %v819_v3, %v6538_v4  ;;  %v943_v4 = vld [vmem:[%s9738_s3] sm:$0xff]  ;;  %v1096_v7 = vperm.slane %v1093_v62, 1  ;;  %771 = vst.msk [vmem:[#allocation3 + $0x8] sm:$0xff] %vm770_vm14, %v6357_v60  ;;  %s9741_s3 = sld [smem:[#allocation46_spill]] }
  0xc6   : > { %977 = vrot.lane.b32.xlu2 %v927_v6, %s9581_s6  ;;  %774 = vst.msk [vmem:[#allocation4 + $0x8] sm:$0xff] %vm770_vm14, %v6357_v60 }
  0xc7   : > { %775 = vst.msk [vmem:[#allocation4 + $0x18] sm:$0xff] %vm770_vm14, %v6357_v60 }
  0xc8   : > { %789 = vst.msk [vmem:[#allocation7 + $0x8] sm:$0xff] %vm770_vm14, %v6357_v60 }
  0xc9   : > { %790 = vst.msk [vmem:[#allocation7 + $0x18] sm:$0xff] %vm770_vm14, %v6357_v60 }
  0xca   : > { %791 = vst.msk [vmem:[#allocation7 + $0x28] sm:$0xff] %vm770_vm14, %v6357_v60 }
  0xcb   : > { %995 = vrot.lane.b32.xlu1 %v936_v13, %s9581_s6  ;;  %v1095_v13 = vperm.slane %v1093_v62, 0  ;;  %792 = vst.msk [vmem:[#allocation7 + $0x38] sm:$0xff] %vm770_vm14, %v6357_v60  ;;  %vm9612_vm14 = vcmask 89088  }
  0xcd   : > { %973 = vrot.lane.b32.xlu0 %v925_v14, %s9581_s6 }
  0xce   : > { %971 = vrot.lane.b32.xlu2 %v924_v15, %s9581_s6 }
  0xd3   : > { %975 = vrot.lane.b32.xlu1 %v926_v19, %s9581_s6 }
  0xd5   : > { %979 = vrot.lane.b32.xlu0 %v928_v0, %s9581_s6 }
  0xdb   : > { %969 = vrot.lane.b32.xlu1 %v923_v21, %s9581_s6  ;;  %s6365_s6 = smov 7  }
  0xdd   : > { %946 = vperm.xlu0 %5554, %v943_v4  }
  0xf7   : > { %v1008_v18 = vpop.permute.xlu2 %1007 }
  0xff   : > { %v1002_v22 = vpop.permute.xlu2 %1001 }
 0x107   : > { %v992_v1 = vpop.permute.xlu2 %991 }
 0x110   : > { %v982_v27 = vpop.permute.xlu2 %981 }
 0x117   : > { %v1000_v23 = vpop.permute.xlu1 %999 }
 0x118   : > { %v988_v36 = vpop.permute.xlu2 %987 }
 0x11d   : > { %v994_v24 = vpop.permute.xlu0 %993 }
 0x120   : > { %v978_v47 = vpop.permute.xlu2 %977 }
 0x125   : > { %v986_v25 = vpop.permute.xlu1 %985 }
 0x126   : > { %v1016_v48 = vsel %vm1009_vm9, %v986_v25, %v988_v36 }
 0x127   : > { %v984_v26 = vpop.permute.xlu0 %983 }
 0x128   : > { %v1015_v42 = vsel %vm1009_vm9, %v982_v27, %v984_v26  ;;  %v972_v56 = vpop.permute.xlu2 %971  ;;  %v5412_v26 = vld [vmem:[%s9740_s21 + $0x98] sm:$0xff] }
 0x12d   : > { %v1006_v28 = vpop.permute.xlu1 %1005 }
 0x12e   : > { %v1024_v29 = vsel %vm1009_vm9, %v1006_v28, %v1008_v18  ;;  %v1188_v18 = vld [vmem:[%s9740_s21 + $0xa0] sm:$0x3] }
 0x12f   : > { %v998_v30 = vpop.permute.xlu0 %997  ;;  %v1049_v31 = vsel %vm9696_vm8, %v1024_v29, 0 }
 0x130   : > { %1080 = vmatpush.bf16.msra.mxu2 %v1049_v31  ;;  %v1021_v32 = vsel %vm1009_vm9, %v998_v30, %v1000_v23 }
 0x134   : > { %1081 = vmatpush.bf16.msra.mxu2 %v1021_v32 }
 0x135   : > { %v990_v34 = vpop.permute.xlu1 %989 }
 0x136   : > { %v1018_v35 = vsel %vm1009_vm9, %v990_v34, %v992_v1  ;;  %v1017_v49 = vsel %vm1009_vm9, %v988_v36, %v990_v34  ;;  %v5409_v36 = vld [vmem:[%s9740_s21 + $0x80] sm:$0xff] }
 0x137   : > { %v1004_v37 = vpop.permute.xlu0 %1003 }
 0x138   : > { %1082 = vmatpush.bf16.msra.mxu2 %v1018_v35  ;;  %v1022_v38 = vsel %vm1009_vm9, %v1002_v22, %v1004_v37  ;;  %v1023_v39 = vsel %vm1009_vm9, %v1004_v37, %v1006_v28  ;;  %v1270_v22 = vunpack.c.l.b16 %v1188_v18  ;;  %v5410_v28 = vld [vmem:[%s9740_s21 + $0x88] sm:$0xff]  ;;  %v5400_v37 = vld [vmem:[%s9740_s21 + $0x38] sm:$0xff] }
 0x139   : > { %v1043_v40 = vsel %vm9696_vm8, %v1022_v38, 0  ;;  %v1046_v41 = vsel %vm9696_vm8, %v1023_v39, 0  ;;  %v5408_v38 = vld [vmem:[%s9740_s21 + $0x78] sm:$0xff]  ;;  %1319 = vmatpush.bf16.msra.mxu3 %v5400_v37  ;;  %v5399_v39 = vld [vmem:[%s9740_s21 + $0x30] sm:$0xff] }
 0x13a   : > { %1054 = vmatpush.bf16.msra.mxu0 %v1043_v40  ;;  %1067 = vmatpush.bf16.msra.mxu1 %v1046_v41  ;;  %v1291_v23 = vpack.c.b16 %v1270_v22, %v1270_v22  ;;  %v5407_v40 = vld [vmem:[%s9740_s21 + $0x70] sm:$0xff]  ;;  %v5398_v41 = vld [vmem:[%s9740_s21 + $0x28] sm:$0xff] }
 0x13c   : > { %1083 = vmatpush.bf16.msra.mxu2 %v1015_v42  ;;  %v1317_v1 = vsel %vm1315_vm13, %v1291_v23, 0  ;;  %v5406_v42 = vld [vmem:[%s9740_s21 + $0x68] sm:$0xff] }
 0x13d   : > { %v996_v43 = vpop.permute.xlu1 %995  ;;  %1320 = vmatpush.bf16.msra.mxu3 %v5399_v39  ;;  %v1410_v39 = vld [vmem:[%s9741_s3] sm:$0xff] }
 0x13e   : > { %v1019_v44 = vsel %vm1009_vm9, %v994_v24, %v996_v43  ;;  %v1020_v45 = vsel %vm1009_vm9, %v996_v43, %v998_v30  ;;  %v5397_v43 = vld [vmem:[%s9740_s21 + $0x20] sm:$0xff] }
 0x13f   : > { %v974_v46 = vpop.permute.xlu0 %973  ;;  %1055 = vmatpush.bf16.msra.mxu0 %v1019_v44  ;;  %1068 = vmatpush.bf16.msra.mxu1 %v1020_v45  ;;  %v5405_v44 = vld [vmem:[%s9740_s21 + $0x60] sm:$0xff]  ;;  %v5396_v45 = vld [vmem:[%s9740_s21 + $0x18] sm:$0xff] }
 0x140   : > { %v1011_v57 = vsel %vm1009_vm9, %v972_v56, %v974_v46 }
 0x141   : > { %1321 = vmatpush.bf16.msra.mxu3 %v5398_v41 }
 0x143   : > { %1056 = vmatpush.bf16.msra.mxu0 %v1016_v48  ;;  %1069 = vmatpush.bf16.msra.mxu1 %v1017_v49  ;;  %v5403_v48 = vld [vmem:[%s9740_s21 + $0x50] sm:$0xff] }
 0x145   : > { %v976_v50 = vpop.permute.xlu1 %975  ;;  %1322 = vmatpush.bf16.msra.mxu3 %v5397_v43  ;;  %v1411_v43 = vld [vmem:[%s9741_s3 + $0x8] sm:$0xff]  ;;  %s9751_s3 = smov 109  }
 0x146   : > { %v1012_v51 = vsel %vm1009_vm9, %v974_v46, %v976_v50  ;;  %v5404_v46 = vld [vmem:[%s9740_s21 + $0x58] sm:$0xff] }
 0x147   : > { %1084 = vmatpush.bf16.msra.mxu2 %v1012_v51  ;;  %v980_v52 = vpop.permute.xlu0 %979 }
 0x148   : > { %v1013_v54 = vsel %vm1009_vm9, %v978_v47, %v980_v52  ;;  %v1014_v55 = vsel %vm1009_vm9, %v980_v52, %v982_v27  ;;  %v5411_v27 = vld [vmem:[%s9740_s21 + $0x90] sm:$0xff]  ;;  %v5394_v52 = vld [vmem:[%s9740_s21 + $0x8] sm:$0xff] }
 0x149   : > { %1057 = vmatpush.bf16.msra.mxu0 %v1013_v54  ;;  %1070 = vmatpush.bf16.msra.mxu1 %v1014_v55  ;;  %v5395_v47 = vld [vmem:[%s9740_s21 + $0x10] sm:$0xff]  ;;  %v5393_v54 = vld [vmem:[%s9740_s21] sm:$0xff] }
 0x14a   : > { %5060 = vmatmul.msk.bf16.vlgmr.msra.gmra.mxu2 %vm9617_vm10, %v801_v53  ;;  %1323 = vmatpush.bf16.msra.mxu3 %v5396_v45  ;;  %v5401_v55 = vld [vmem:[%s9740_s21 + $0x40] sm:$0xff] }
 0x14d   : > { %v970_v58 = vpop.permute.xlu1 %969  ;;  %1071 = vmatpush.bf16.msra.mxu1 %v1011_v57 }
 0x14e   : > { %v1010_v59 = vsel %vm1009_vm9, %v970_v58, %v972_v56  ;;  %1324 = vmatpush.bf16.msra.mxu3 %v5395_v47  ;;  %v5252_v47 = vld [vmem:[%s9575_s23 + $0x78] sm:$0xf] }
 0x14f   : > { %1058 = vmatpush.bf16.msra.mxu0 %v1010_v59  ;;  %v947_v61 = vpop.permute.xlu0 %946 }
 0x150   : > { %5059 = vmatmul.msk.bf16.vlgmr.msra.gmra.mxu1 %vm9617_vm10, %v801_v53 }
 0x151   : > { %1348 = vmatpush.bf16.msrb.mxu1 %v1317_v1 }
 0x152   : > { %5058 = vmatmul.msk.bf16.vlgmr.msra.gmra.mxu0 %vm9617_vm10, %v801_v53  ;;  %v5402_v53 = vld [vmem:[%s9740_s21 + $0x48] sm:$0xff]  ;;  %1325 = vmatpush.bf16.msra.mxu3 %v5394_v52  ;;  %s9804_s21 = smov 117  }
 0x153   : > { %1332 = vmatpush.bf16.msrb.mxu0 %v5408_v38 }
 0x155   : > { %1349 = vmatpush.bf16.msrb.mxu1 %v5412_v26 }
 0x156   : > { %1326 = vmatpush.bf16.msra.mxu3 %v5393_v54  ;;  %v5437_v54 = vld [vmem:[%s9575_s23 + $0x68] sm:$0xf0] }
 0x157   : > { %1333 = vmatpush.bf16.msrb.mxu0 %v5407_v40 }
 0x159   : > { %1350 = vmatpush.bf16.msrb.mxu1 %v5411_v27 }
 0x15b   : > { %1334 = vmatpush.bf16.msrb.mxu0 %v5406_v42 }
 0x15d   : > { %1351 = vmatpush.bf16.msrb.mxu1 %v5410_v28 }
 0x15f   : > { %1335 = vmatpush.bf16.msrb.mxu0 %v5405_v44  ;;  %v6807_v44 = vld [vmem:[%s9575_s23 + $0x90] sm:$0x33] }
 0x160   : > { %v1914_v45 = vunpack.c.l.b16 %v6807_v44 }
 0x161   : > { %1352 = vmatpush.bf16.msrb.mxu1 %v5409_v36 }
 0x163   : > { %1336 = vmatpush.bf16.msrb.mxu0 %v5404_v46  ;;  %v1935_v46 = vpack.c.b16 %v1914_v45, %v1914_v45 }
 0x167   : > { %1337 = vmatpush.bf16.msrb.mxu0 %v5403_v48  ;;  %v5440_v48 = vld [vmem:[%s9575_s23 + $0x80] sm:$0xf0] }
 0x168   : > { %v5253_v52 = vor.u32 %v5440_v48, %v5252_v47  ;;  %v5417_v47 = vld [vmem:[%s9745_s22 + $0x18] sm:$0xff] }
 0x169   : > { %v1851_v48 = vld [vmem:[%s9575_s23 + $0x98] sm:$0x3] }
 0x16b   : > { %1338 = vmatpush.bf16.msrb.mxu0 %v5402_v53  ;;  %v5240_v53 = vld [vmem:[%s9575_s23 + $0x60] sm:$0xf] }
 0x16f   : > { %1339 = vmatpush.bf16.msrb.mxu0 %v5401_v55  ;;  %v5241_v55 = vor.u32 %v5437_v54, %v5240_v53 }
 0x1cd   : > { %v1086_v63 = vpop.f32.mrf.mxu2  ;;  %v1073_v2 = vpop.f32.mrf.mxu1 }
 0x1ce   : > { %v1087_v5 = vadd.f32 %v1086_v63, %v947_v61  ;;  %v1074_v6 = vadd.f32 %v1073_v2, %v947_v61 }
 0x1cf   : > { %v1060_v9 = vpop.f32.mrf.mxu0 }
 0x1d0   : > { %v1092_v10 = vmax.f32 %v1087_v5, 0.0  ;;  %v1091_v11 = vmax.f32 %v1074_v6, 0.0  ;;  %v1061_v12 = vadd.f32 %v1060_v9, %v947_v61 }
 0x1d2   : > { %v6678_v14 = vmul.f32 %v1096_v7, %v1091_v11  ;;  %v1103_v15 = vmul.f32 %v1097_v8, %v1092_v10  ;;  %v1090_v16 = vmax.f32 %v1061_v12, 0.0 }
 0x1d4   : > { %1105 = vst [vmem:[#allocation2 + $0x10] sm:$0xff] %v6678_v14  ;;  %v6681_v17 = vmul.f32 %v1095_v13, %v1090_v16 }
 0x1d5   : > { %1107 = vst.msk [vmem:[#allocation2 + $0x18] sm:$0xff] %vm9613_vm12, %v1103_v15  ;;  %v1075_v19 = vpop.f32.mrf.mxu1  ;;  %v1088_v20 = vpop.f32.mrf.mxu2 }
 0x1d6   : > { %1104 = vst [vmem:[#allocation2 + $0x8] sm:$0xff] %v6681_v17  ;;  %v6687_v0 = vpack.i.bf16 %v6678_v14, %v6681_v17 }
 0x1d7   : > { %v1062_v3 = vpop.f32.mrf.mxu0 }
 0x1d8   : > { %5556 = vrot.lane.b32.xlu1 %v6687_v0, %s9609_s0 }
 0x1dc   : > { %v6691_v21 = vld [vmem:[#allocation2 + $0x18] sm:$0xff] }
 0x1dd   : > { %1118 = vrot.lane.b32.xlu2 %v6691_v21, %s9609_s0 }
 0x237   : > { %v1119_v24 = vpop.permute.xlu2 %1118 }
 0x238   : > { %v1127_v25 = vmax.f32 %v6691_v21, %v1119_v24 }
 0x23a   : > { %1135 = vrot.lane.b32.xlu2 %v1127_v25, %s9591_s5 }
 0x24a   : > { %v5557_v29 = vpop.permute.xlu1 %5556 }
 0x24b   : > { %v5559_v30 = vunpack.i.h.bf16 %v5557_v29  ;;  %v5558_v31 = vunpack.i.l.bf16 %v5557_v29 }
 0x24d   : > { %v1120_v4 = vsel %vm818_vm7, %v5558_v31, %v5559_v30  ;;  %v1121_v32 = vsel %vm818_vm7, %v5559_v30, %v1119_v24 }
 0x24e   : > { %v1125_v33 = vmax.f32 %v6681_v17, %v1120_v4  ;;  %v1126_v34 = vmax.f32 %v6678_v14, %v1121_v32 }
 0x250   : > { %v5560_v35 = vpack.i.bf16 %v1126_v34, %v1125_v33 }
 0x252   : > { %5561 = vrot.lane.b32.xlu1 %v5560_v35, %s9591_s5  ;;  %s9599_s5 = smov 11  }
 0x294   : > { %v1136_v49 = vpop.permute.xlu2 %1135 }
 0x295   : > { %v1144_v50 = vmax.f32 %v1127_v25, %v1136_v49 }
 0x297   : > { %v1147_v51 = vpack.c.bf16 %v1144_v50, %v1144_v50  ;;  %v1960_v50 = vsel %vm1315_vm13, %v1935_v46, 0  ;;  %v5418_v46 = vld [vmem:[%s9745_s22 + $0x20] sm:$0xff] }
 0x298   : > { %1969 = vmatpush.bf16.msra.mxu0 %v1960_v50  ;;  %v5416_v50 = vld [vmem:[%s9745_s22 + $0x10] sm:$0xff] }
 0x299   : > { %5141 = vmatmul.msk.bf16.vlgmr.msrb.gmra.mxu1 %vm9613_vm12, %v1147_v51 }
 0x29c   : > { %1970 = vmatpush.bf16.msra.mxu0 %v5253_v52  ;;  %v5415_v52 = vld [vmem:[%s9745_s22 + $0x8] sm:$0xff] }
 0x2a0   : > { %1971 = vmatpush.bf16.msra.mxu0 %v5241_v55  ;;  %v5414_v55 = vld [vmem:[%s9745_s22] sm:$0xff] }
 0x2c4   : > { %v5562_v56 = vpop.permute.xlu1 %5561 }
 0x2c5   : > { %v5564_v57 = vunpack.i.h.bf16 %v5562_v56  ;;  %v5563_v58 = vunpack.i.l.bf16 %v5562_v56  ;;  %v5228_v56 = vld [vmem:[%s9575_s23 + $0x48] sm:$0xf] }
 0x2c7   : > { %v1137_v59 = vsel %vm850_vm1, %v5563_v58, %v5564_v57  ;;  %v1138_v61 = vsel %vm850_vm1, %v5564_v57, %v1136_v49  ;;  %v5434_v57 = vld [vmem:[%s9575_s23 + $0x50] sm:$0xf0] }
 0x2c8   : > { %v1142_v62 = vmax.f32 %v1125_v33, %v1137_v59  ;;  %v1143_v63 = vmax.f32 %v1126_v34, %v1138_v61  ;;  %v5229_v59 = vor.u32 %v5434_v57, %v5228_v56  ;;  %v6921_v56 = vpack.i.bf16 %v6691_v21, %v6678_v14  ;;  %v5248_v14 = vld [vmem:[%s9575_s23 + $0x68] sm:$0xf] }
 0x2ca   : > { %v1145_v2 = vpack.c.bf16 %v1142_v62, %v1142_v62  ;;  %v1146_v5 = vpack.c.bf16 %v1143_v63, %v1143_v63  ;;  %1972 = vmatpush.bf16.msra.mxu0 %v5229_v59  ;;  %v5441_v59 = vld [vmem:[%s9575_s23 + $0x88] sm:$0xf0] }
 0x2cc   : > { %1327 = vmatmul.bf16.vlgmr.msra.gmra.mxu3 %v1145_v2  ;;  %1340 = vmatmul.bf16.vlgmr.msrb.gmra.mxu0 %v1146_v5 }
 0x316   : > { %v1354_v6 = vpop.f32.mrf.mxu1 }
 0x31e   : > { %v1356_v7 = vpop.f32.mrf.mxu1 }
 0x31f   : > { %v5413_v7 = vld [vmem:[%s9743_s26] sm:$0xff]  ;;  %s6369_s26 = smov 115  }
 0x349   : > { %v1341_v8 = vpop.f32.mrf.mxu0 }
 0x34f   : > { %v1328_v9 = vpop.f32.mrf.mxu3 }
 0x350   : > { %v1342_v10 = vadd.f32 %v1341_v8, %v1328_v9  ;;  %v5216_v8 = vld [vmem:[%s9575_s23 + $0x30] sm:$0xf]  ;;  %v5431_v9 = vld [vmem:[%s9575_s23 + $0x38] sm:$0xf0] }
 0x351   : > { %v1343_v11 = vpop.f32.mrf.mxu0 }
 0x352   : > { %v1355_v12 = vadd.f32 %v1354_v6, %v1342_v10  ;;  %v5217_v10 = vor.u32 %v5431_v9, %v5216_v8  ;;  %v5204_v11 = vld [vmem:[%s9575_s23 + $0x18] sm:$0xf]  ;;  %v5432_v9 = vld [vmem:[%s9575_s23 + $0x40] sm:$0xf0] }
 0x353   : > { %v5224_v8 = vld [vmem:[%s9575_s23 + $0x38] sm:$0xf] }
 0x354   : > { %1359 = vst.msk [vmem:[#allocation3 + $0x8] sm:$0xff] %vm1358_vm15, %v1355_v12  ;;  %1973 = vmatpush.bf16.msra.mxu0 %v5217_v10  ;;  %v5428_v12 = vld [vmem:[%s9575_s23 + $0x20] sm:$0xf0]  ;;  %v5225_v10 = vor.u32 %v5432_v9, %v5224_v8 }
 0x357   : > { %v1330_v13 = vpop.f32.mrf.mxu3 }
 0x358   : > { %v5205_v13 = vor.u32 %v5428_v12, %v5204_v11  ;;  %v5212_v11 = vld [vmem:[%s9575_s23 + $0x20] sm:$0xf]  ;;  %v5429_v12 = vld [vmem:[%s9575_s23 + $0x28] sm:$0xf0] }
 0x35a   : > { %1974 = vmatpush.bf16.msra.mxu0 %v5205_v13  ;;  %v5213_v13 = vor.u32 %v5429_v12, %v5212_v11 }
 0x35b   : > { %v1363_v15 = vld [vmem:[#allocation3 + $0x8] sm:$0xff] }
 0x35c   : > { %1397 = vrot.lane.b32.xlu2 %v1363_v15, %s9595_s30  ;;  %1394 = vrot.lane.b32.xlu1 %v1363_v15, %s9601_s28  ;;  %v5565_v16 = vpack.i.bf16 %v1363_v15, %v6357_v60  ;;  %s9746_s30 = smov 118   ;;  %s6366_s28 = smov 122  }
 0x35d   : > { %1400 = vrot.lane.b32.xlu0 %v1363_v15, %s9593_s7  ;;  %s6368_s7 = smov 121  }
 0x364   : > { %5566 = vrot.lane.b32.xlu2 %v5565_v16, %s9605_s9  ;;  %1391 = vrot.lane.b32.xlu1 %v1363_v15, %s9603_s1  ;;  %s9750_s1 = smov 110   ;;  %s9752_s9 = smov 108  }
 0x365   : > { %1388 = vrot.lane.b32.xlu0 %v1363_v15, %s9597_s4  ;;  %s9742_s4 = sld [smem:[#allocation48_spill]] }
 0x36b   : > { %v1682_v51 = vld [vmem:[%s9742_s4 + $0x8] sm:$0xff]  ;;  %v1681_v45 = vld [vmem:[%s9742_s4] sm:$0xff] }
 0x36c   : > { %5576 = vrot.lane.b32.xlu1 %v5565_v16, %s9609_s0 }
 0x36d   : > { %5571 = vrot.lane.b32.xlu0 %v5565_v16, %s9607_s27  ;;  %v5425_v16 = vld [vmem:[%s9575_s23 + $0x8] sm:$0xf0]  ;;  %s9748_s27 = smov 126  }
 0x3b6   : > { %v1398_v19 = vpop.permute.xlu2 %1397 }
 0x3be   : > { %v5567_v25 = vpop.permute.xlu2 %5566 }
 0x3bf   : > { %v5569_v26 = vunpack.i.h.bf16 %v5567_v25  ;;  %v5568_v27 = vunpack.i.l.bf16 %v5567_v25 }
 0x3c1   : > { %v1377_v36 = vsel %vm834_vm0, %v5568_v27, %v5569_v26 }
 0x3ce   : > { %v1395_v20 = vpop.permute.xlu1 %1394 }
 0x3cf   : > { %v1408_v3 = vpack.c.bf16 %v1398_v19, %v1395_v20  ;;  %v1401_v18 = vpop.permute.xlu0 %1400 }
 0x3d0   : > { %v1409_v22 = vpack.c.bf16 %v1401_v18, %v1401_v18 }
 0x3d1   : > { %1444 = vrot.lane.b32.xlu0 %v1408_v3, %s9599_s5 }
 0x3d2   : > { %1446 = vrot.lane.b32.xlu2 %v1409_v22, %s9599_s5  ;;  %v6327_v22 = vld [vmem:[%s9744_s20] ss:$0 sm:$0xff]  ;;  %s9758_s20 = sld [smem:[#allocation47_spill]] }
 0x3d6   : > { %v1392_v23 = vpop.permute.xlu1 %1391 }
 0x3d7   : > { %v1389_v24 = vpop.permute.xlu0 %1388 }
 0x3d8   : > { %v1407_v1 = vpack.c.bf16 %v1392_v23, %v1389_v24 }
 0x3da   : > { %1442 = vrot.lane.b32.xlu1 %v1407_v1, %s9599_s5 }
 0x3de   : > { %v5577_v28 = vpop.permute.xlu1 %5576 }
 0x3df   : > { %v5579_v29 = vunpack.i.h.bf16 %v5577_v28  ;;  %v5578_v30 = vunpack.i.l.bf16 %v5577_v28  ;;  %v5572_v31 = vpop.permute.xlu0 %5571 }
 0x3e0   : > { %v5574_v4 = vunpack.i.h.bf16 %v5572_v31  ;;  %v5573_v32 = vunpack.i.l.bf16 %v5572_v31 }
 0x3e1   : > { %v1370_v33 = vsel %vm818_vm7, %v5578_v30, %v5579_v29  ;;  %v1404_v40 = vpack.c.bf16 %v5579_v29, %v1363_v15  ;;  %v5192_v15 = vld [vmem:[%s9575_s23] sm:$0xf] }
 0x3e2   : > { %v1406_v34 = vpack.c.bf16 %v5574_v4, %v5569_v26  ;;  %v1403_v35 = vpack.c.bf16 %v1370_v33, %v6357_v60  ;;  %v1385_v37 = vsel %vm1384_vm11, %v5573_v32, %v5574_v4  ;;  %v5193_v19 = vor.u32 %v5425_v16, %v5192_v15  ;;  %v1683_v32 = vld [vmem:[%s9742_s4 + $0x10] sm:$0xff]  ;;  %v5200_v15 = vld [vmem:[%s9575_s23 + $0x8] sm:$0xf] }
 0x3e3   : > { %v1405_v38 = vpack.c.bf16 %v1385_v37, %v1377_v36  ;;  %v6874_v33 = vpack.i.bf16 %v6681_v17, %v6357_v60  ;;  %v1520_v37 = vld [vmem:[%s9745_s22 + $0x30] sm:$0x3]  ;;  %v5426_v16 = vld [vmem:[%s9575_s23 + $0x10] sm:$0xf0] }
 0x3e4   : > { %1440 = vrot.lane.b32.xlu0 %v1406_v34, %s9599_s5  ;;  %1434 = vrot.lane.b32.xlu1 %v1403_v35, %s9599_s5 }
 0x3e5   : > { %1438 = vrot.lane.b32.xlu2 %v1405_v38, %s9599_s5  ;;  %1975 = vmatpush.bf16.msra.mxu0 %v5193_v19  ;;  %v5201_v19 = vor.u32 %v5426_v16, %v5200_v15 }
 0x3ec   : > { %1414 = vperm.xlu0 %5554, %v1410_v39   ;;  %1419 = vperm.xlu1 %5580, %v1411_v43   ;;  %v5419_v43 = vld [vmem:[%s9745_s22 + $0x28] sm:$0xff]  ;;  %s9805_s22 = smov 107  }
 0x3ed   : > { %1436 = vrot.lane.b32.xlu2 %v1404_v40, %s9599_s5  ;;  %v1546_v40 = vunpack.c.l.b16 %v1520_v37  ;;  %s6367_s5 = smov 120  }
 0x3f4   : > { %1692 = vperm.xlu1 %5580, %v1682_v51   ;;  %v1916_v51 = vunpack.c.l.b16 %v1851_v48 }
 0x3f6   : > { %v1937_v54 = vpack.c.b16 %v1916_v51, %v1916_v51 }
 0x3f8   : > { %v1966_v57 = vsel %vm1315_vm13, %v1937_v54, 0 }
 0x42c   : > { %v1447_v41 = vpop.permute.xlu2 %1446 }
 0x42d   : > { %v1459_v42 = vsel %vm9696_vm8, %v1447_v41, 0  ;;  %v1553_v41 = vpack.c.b16 %v1546_v40, %v1546_v40 }
 0x42e   : > { %1464 = vmatpush.bf16.msrb.mxu2 %v1459_v42 }
 0x42f   : > { %v1564_v42 = vsel %vm1315_vm13, %v1553_v41, 0 }
 0x430   : > { %1567 = vmatpush.bf16.msrb.mxu3 %v1564_v42 }
 0x434   : > { %1568 = vmatpush.bf16.msrb.mxu3 %v5419_v43 }
 0x438   : > { %1569 = vmatpush.bf16.msrb.mxu3 %v5418_v46 }
 0x43c   : > { %1570 = vmatpush.bf16.msrb.mxu3 %v5417_v47 }
 0x43f   : > { %v1439_v61 = vpop.permute.xlu2 %1438 }
 0x440   : > { %1571 = vmatpush.bf16.msrb.mxu3 %v5416_v50 }
 0x443   : > { %v1445_v49 = vpop.permute.xlu0 %1444 }
 0x444   : > { %1465 = vmatpush.bf16.msrb.mxu2 %v1445_v49  ;;  %v1684_v49 = vld [vmem:[%s9742_s4 + $0x18] sm:$0xff]  ;;  %1572 = vmatpush.bf16.msrb.mxu3 %v5415_v52 }
 0x447   : > { %v1437_v5 = vpop.permute.xlu2 %1436 }
 0x448   : > { %1573 = vmatpush.bf16.msrb.mxu3 %v5414_v55 }
 0x44c   : > { %v1443_v58 = vpop.permute.xlu1 %1442  ;;  %1997 = vmatpush.bf16.msra.mxu3 %v1966_v57 }
 0x44d   : > { %1466 = vmatpush.bf16.msrb.mxu2 %v1443_v58  ;;  %v5260_v58 = vld [vmem:[%s9575_s23 + $0x80] sm:$0xf] }
 0x456   : > { %v1441_v62 = vpop.permute.xlu0 %1440  ;;  %v1435_v2 = vpop.permute.xlu1 %1434 }
 0x457   : > { %v1450_v63 = vsel %vm9612_vm14, %v1439_v61, %v1441_v62  ;;  %v1449_v6 = vsel %vm9612_vm14, %v1435_v2, %v1437_v5  ;;  %v5261_v62 = vor.u32 %v5441_v59, %v5260_v58  ;;  %v5236_v5 = vld [vmem:[%s9575_s23 + $0x50] sm:$0xf]  ;;  %vm778_vm14 = vcmask 351520  }
 0x458   : > { %1467 = vmatpush.bf16.msrb.mxu2 %v1450_v63  ;;  %v5438_v63 = vld [vmem:[%s9575_s23 + $0x70] sm:$0xf0]  ;;  %779 = vst.msk [vmem:[#allocation5 + $0x8] sm:$0xff] %vm778_vm14, %v6357_v60 }
 0x459   : > { %1998 = vmatpush.bf16.msra.mxu3 %v5261_v62  ;;  %v5249_v2 = vor.u32 %v5438_v63, %v5248_v14  ;;  %780 = vst.msk [vmem:[#allocation5 + $0x18] sm:$0xff] %vm778_vm14, %v6357_v60  ;;  %vm1580_vm14 = vcmask 293888  }
 0x45c   : > { %1468 = vmatpush.bf16.msrb.mxu2 %v1449_v6  ;;  %v5435_v6 = vld [vmem:[%s9575_s23 + $0x58] sm:$0xf0] }
 0x45d   : > { %1999 = vmatpush.bf16.msra.mxu3 %v5249_v2 }
 0x45e   : > { %v1415_v20 = vpop.permute.xlu0 %1414  ;;  %v1420_v1 = vpop.permute.xlu1 %1419 }
 0x45f   : > { %5146 = vmatmul.msk.bf16.vlgmr.msrb.gmra.mxu2 %vm9617_vm10, %v5413_v7  ;;  %v5237_v7 = vor.u32 %v5435_v6, %v5236_v5  ;;  %vm1762_vm10 = vcmask 56320  }
 0x461   : > { %2000 = vmatpush.bf16.msra.mxu3 %v5237_v7 }
 0x465   : > { %2001 = vmatpush.bf16.msra.mxu3 %v5225_v10 }
 0x469   : > { %2002 = vmatpush.bf16.msra.mxu3 %v5213_v13 }
 0x46d   : > { %2003 = vmatpush.bf16.msra.mxu3 %v5201_v19 }
 0x4e2   : > { %v1470_v3 = vpop.f32.mrf.mxu2 }
 0x4e3   : > { %v1471_v18 = vadd.f32 %v1470_v3, %v1415_v20 }
 0x4e5   : > { %v1475_v23 = vmax.f32 %v1471_v18, 0.0 }
 0x4e7   : > { %v1481_v24 = vmul.f32 %v6327_v22, %v1475_v23 }
 0x4e9   : > { %1483 = vst.msk [vmem:[#allocation4 + $0x8] sm:$0xff] %vm1358_vm15, %v1481_v24 }
 0x4ea   : > { %v1472_v25 = vpop.f32.mrf.mxu2 }
 0x4eb   : > { %v1473_v26 = vadd.f32 %v1472_v25, %v1420_v1 }
 0x4ed   : > { %v1476_v27 = vmax.f32 %v1473_v26, 0.0 }
 0x4ef   : > { %v1482_v28 = vmul.f32 %v6327_v22, %v1476_v27  ;;  %v6860_v29 = vpack.c.bf16 %v1476_v27, %v1475_v23 }
 0x4f0   : > { %v6865_v30 = vld [vmem:[#allocation4 + $0x8] sm:$0xff] }
 0x4f1   : > { %1484 = vst.msk [vmem:[#allocation4 + $0x18] sm:$0xff] %vm1358_vm15, %v1482_v28  ;;  %5262 = vmatmul.msk.bf16.vlgmr.msra.gmra.mxu0 %vm1358_vm15, %v6860_v29 }
 0x4f8   : > { %v1486_v31 = vld [vmem:[#allocation4 + $0x18] sm:$0xff] }
 0x4f9   : > { %v5581_v4 = vpack.i.bf16 %v1486_v31, %v6865_v30 }
 0x4fb   : > { %5582 = vrot.lane.b32.xlu2 %v5581_v4, %s9609_s0  ;;  %v6364_v4 = vmov 0.0|0.0  }
 0x4fc   : > { %1736 = vrot.lane.b32.xlu1 %v6364_v4, %s6365_s6 }
 0x503   : > { %1697 = vperm.xlu2 %5591, %v1683_v32  }
 0x50b   : > { %5593 = vrot.lane.b32.xlu2 %v6874_v33, %s9609_s0  ;;  %s9749_s0 = smov 116  }
 0x555   : > { %v5583_v34 = vpop.permute.xlu2 %5582 }
 0x556   : > { %v5585_v35 = vunpack.i.h.bf16 %v5583_v34  ;;  %v5584_v36 = vunpack.i.l.bf16 %v5583_v34 }
 0x558   : > { %v6881_v38 = vmax.f32 %v1486_v31, %v5585_v35  ;;  %v6884_v39 = vmax.f32 %v6865_v30, %v5584_v36 }
 0x55a   : > { %v5586_v17 = vpack.i.bf16 %v6881_v38, %v6884_v39 }
 0x55c   : > { %5587 = vrot.lane.b32.xlu0 %v5586_v17, %s9746_s30 }
 0x55d   : > { %v7020_v42 = vpop.permute.xlu2 %1697 }
 0x564   : > { %1687 = vperm.xlu0 %5554, %v1681_v45  }
 0x565   : > { %v7022_v43 = vpop.permute.xlu2 %5593 }
 0x56c   : > { %1702 = vperm.xlu0 %5554, %v1684_v49  }
 0x56e   : > { %v6914_v53 = vpop.f32.mrf.mxu0 }
 0x56f   : > { %v7005_v41 = vpack.i.bf16 %v6914_v53, %v6691_v21 }
 0x574   : > { %5598 = vrot.lane.b32.xlu0 %v6921_v56, %s9747_s8 }
 0x576   : > { %v6932_v61 = vpop.f32.mrf.mxu0 }
 0x5ce   : > { %v5588_v20 = vpop.permute.xlu0 %5587 }
 0x5cf   : > { %v5590_v3 = vunpack.i.h.bf16 %v5588_v20  ;;  %v5589_v18 = vunpack.i.l.bf16 %v5588_v20 }
 0x5d1   : > { %v1506_v22 = vmax.f32 %v6881_v38, %v5590_v3  ;;  %v1505_v23 = vmax.f32 %v6884_v39, %v5589_v18 }
 0x5d3   : > { %v1507_v24 = vpack.c.bf16 %v1506_v22, %v1505_v23 }
 0x5d5   : > { %5171 = vmatmul.msk.bf16.vlgmr.msrb.gmra.mxu3 %vm1358_vm15, %v1507_v24 }
 0x5d6   : > { %v6969_v1 = vpop.permute.xlu0 %1687 }
 0x5de   : > { %v6971_v25 = vpop.permute.xlu0 %1702 }
 0x5e5   : > { %5264 = vmatmul.msk.bf16.vlgmr.msra.gmra.mxu3 %vm1358_vm15, %v6860_v29 }
 0x5e6   : > { %v6975_v26 = vpop.permute.xlu0 %5598 }
 0x5e7   : > { %v9637_v27 = vunpack.i.h.bf16 %v6975_v26  ;;  %v9636_v28 = vunpack.i.l.bf16 %v6975_v26 }
 0x5e9   : > { %v6984_v31 = vsel %vm818_vm7, %v9636_v28, %v9637_v27 }
 0x658   : > { %v1575_v32 = vpop.f32.mrf.mxu3 }
 0x659   : > { %1581 = vst.msk [vmem:[#allocation5 + $0x8] sm:$0xff] %vm1580_vm14, %v1575_v32 }
 0x660   : > { %v1577_v34 = vpop.f32.mrf.mxu3  ;;  %v1588_v35 = vld [vmem:[#allocation5 + $0x8] sm:$0xff] }
 0x661   : > { %1582 = vst.msk [vmem:[#allocation5 + $0x18] sm:$0xff] %vm1580_vm14, %v1577_v34  ;;  %v5612_v36 = vpack.i.bf16 %v1588_v35, %v6357_v60 }
 0x663   : > { %5613 = vrot.lane.b32.xlu2 %v5612_v36, %s6366_s28  ;;  %5608 = vrot.lane.b32.xlu0 %v5612_v36, %s9748_s27 }
 0x664   : > { %5603 = vrot.lane.b32.xlu1 %v5612_v36, %s9747_s8 }
 0x668   : > { %v2005_v37 = vpop.f32.mrf.mxu3  ;;  %v1590_v38 = vld [vmem:[#allocation5 + $0x18] sm:$0xff] }
 0x669   : > { %2012 = vst.msk [vmem:[#allocation6 + $0x18] sm:$0xff] %vm9613_vm12, %v2005_v37  ;;  %v5627_v39 = vpack.i.bf16 %v1590_v38, %v6357_v60  ;;  %v5642_v17 = vpack.i.bf16 %v1590_v38, %v1588_v35  ;;  %v1669_v21 = vpack.c.bf16 %v1590_v38, %v1588_v35 }
 0x66b   : > { %5628 = vrot.lane.b32.xlu0 %v5627_v39, %s6366_s28  ;;  %5618 = vrot.lane.b32.xlu2 %v5627_v39, %s9747_s8  ;;  %s6370_s28 = smov 114  }
 0x66c   : > { %5623 = vrot.lane.b32.xlu1 %v5627_v39, %s9748_s27 }
 0x670   : > { %v2007_v40 = vpop.f32.mrf.mxu3 }
 0x671   : > { %2015 = vst.msk [vmem:[#allocation6 + $0x38] sm:$0xff] %vm9613_vm12, %v2007_v40  ;;  %vm1631_vm12 = vcmask 998400  }
 0x673   : > { %5643 = vrot.lane.b32.xlu0 %v5642_v17, %s9749_s0  ;;  %5638 = vrot.lane.b32.xlu2 %v5642_v17, %s6367_s5  ;;  %s9753_s5 = smov 91  }
 0x674   : > { %5633 = vrot.lane.b32.xlu1 %v5642_v17, %s6368_s7  ;;  %s9754_s7 = smov 92  }
 0x67b   : > { %5663 = vrot.lane.b32.xlu0 %v6874_v33, %s9750_s1  ;;  %5658 = vrot.lane.b32.xlu2 %v6921_v56, %s9748_s27 }
 0x67c   : > { %5648 = vrot.lane.b32.xlu1 %v5642_v17, %s6369_s26  ;;  %s9755_s26 = smov 90  }
 0x683   : > { %5678 = vrot.lane.b32.xlu0 %v7005_v41, %s9751_s3  ;;  %5673 = vrot.lane.b32.xlu2 %v6687_v0, %s9751_s3 }
 0x684   : > { %5653 = vrot.lane.b32.xlu1 %v6874_v33, %s9748_s27  ;;  %v7026_v33 = vpop.permute.xlu1 %1692 }
 0x68b   : > { %5688 = vrot.lane.b32.xlu2 %v7005_v41, %s9752_s9 }
 0x68c   : > { %5668 = vrot.lane.b32.xlu1 %v6921_v56, %s9750_s1  ;;  %v7030_v47 = vpop.permute.xlu1 %1736 }
 0x693   : > { %5693 = vrot.lane.b32.xlu2 %v5642_v17, %s6370_s28  ;;  %s9826_s28 = sld [smem:[#allocation51_spill]] }
 0x694   : > { %5683 = vrot.lane.b32.xlu1 %v6687_v0, %s9752_s9 }
 0x69b   : > { %1738 = vrot.lane.b32.xlu2 %v1669_v21, %s6365_s6 }
 0x6bd   : > { %v7024_v45 = vpop.permute.xlu2 %5613 }
 0x6be   : > { %v5616_v62 = vunpack.i.h.bf16 %v7024_v45 }
 0x6c5   : > { %v7028_v46 = vpop.permute.xlu2 %5618 }
 0x6c6   : > { %v5621_v52 = vunpack.i.h.bf16 %v7028_v46 }
 0x6cd   : > { %v5639_v48 = vpop.permute.xlu2 %5638 }
 0x6ce   : > { %v5641_v56 = vunpack.i.h.bf16 %v5639_v48  ;;  %v5640_v57 = vunpack.i.l.bf16 %v5639_v48  ;;  %v5615_v48 = vunpack.i.l.bf16 %v7024_v45 }
 0x6d0   : > { %v1677_v8 = vpack.c.bf16 %v5641_v56, %v5640_v57 }
 0x6d5   : > { %v5609_v49 = vpop.permute.xlu0 %5608  ;;  %v7032_v50 = vpop.permute.xlu2 %5658 }
 0x6d6   : > { %v7034_v51 = vpop.permute.xlu1 %5603  ;;  %v5611_v2 = vunpack.i.h.bf16 %v5609_v49  ;;  %v5610_v18 = vunpack.i.l.bf16 %v5609_v49 }
 0x6d7   : > { %v5606_v54 = vunpack.i.h.bf16 %v7034_v51 }
 0x6d8   : > { %v1617_v38 = vsel %vm834_vm0, %v5610_v18, %v5611_v2  ;;  %v7135_v18 = vld [vmem:[#allocation6 + $0x38] sm:$0xff] }
 0x6d9   : > { %v1671_v55 = vpack.c.bf16 %v5621_v52, %v5606_v54 }
 0x6db   : > { %1742 = vrot.lane.b32.xlu1 %v1671_v55, %s6365_s6 }
 0x6dd   : > { %v5629_v58 = vpop.permute.xlu0 %5628  ;;  %v7043_v59 = vpop.permute.xlu2 %5673 }
 0x6de   : > { %v5631_v14 = vunpack.i.h.bf16 %v5629_v58  ;;  %v5624_v63 = vpop.permute.xlu1 %5623  ;;  %v5630_v17 = vunpack.i.l.bf16 %v5629_v58  ;;  %v9634_v58 = vunpack.i.l.bf16 %v7032_v50 }
 0x6df   : > { %v5626_v5 = vunpack.i.h.bf16 %v5624_v63  ;;  %v5625_v20 = vunpack.i.l.bf16 %v5624_v63 }
 0x6e0   : > { %v1675_v6 = vpack.c.bf16 %v5631_v14, %v5616_v62  ;;  %v1633_v55 = vsel %vm1631_vm12, %v5630_v17, %v5631_v14  ;;  %v5176_v17 = vld [vmem:[%s9758_s20 + $0x8] sm:$0xf0] }
 0x6e1   : > { %v1673_v7 = vpack.c.bf16 %v5626_v5, %v5611_v2  ;;  %v1618_v24 = vsel %vm834_vm0, %v5625_v20, %v5626_v5  ;;  %v1632_v5 = vsel %vm1631_vm12, %v5615_v48, %v5616_v62  ;;  %v5620_v62 = vunpack.i.l.bf16 %v7028_v46 }
 0x6e2   : > { %1750 = vrot.lane.b32.xlu2 %v1675_v6, %s6365_s6  ;;  %v1672_v40 = vpack.c.bf16 %v1618_v24, %v1617_v38  ;;  %v1674_v6 = vpack.c.bf16 %v1633_v55, %v1632_v5  ;;  %v7152_v24 = vld [vmem:[#allocation6 + $0x18] sm:$0xff]  ;;  %v5439_v55 = vld [vmem:[%s9575_s23 + $0x7c] sm:$0xf]  ;;  %vm9695_vm12 = vcmask 130048  }
 0x6e3   : > { %1746 = vrot.lane.b32.xlu0 %v1673_v7, %s6365_s6  ;;  %1754 = vrot.lane.b32.xlu1 %v1677_v8, %s6365_s6  ;;  %v5605_v7 = vunpack.i.l.bf16 %v7034_v51 }
 0x6e5   : > { %v5644_v9 = vpop.permute.xlu0 %5643  ;;  %v7049_v10 = vpop.permute.xlu2 %5688 }
 0x6e6   : > { %v5646_v11 = vunpack.i.h.bf16 %v5644_v9  ;;  %v5645_v12 = vunpack.i.l.bf16 %v5644_v9  ;;  %v5634_v13 = vpop.permute.xlu1 %5633  ;;  %v9629_v56 = vunpack.i.l.bf16 %v7049_v10  ;;  %v1603_v9 = vsel %vm818_vm7, %v5605_v7, %v5606_v54 }
 0x6e7   : > { %v5636_v15 = vunpack.i.h.bf16 %v5634_v13  ;;  %v5635_v16 = vunpack.i.l.bf16 %v5634_v13  ;;  %v1604_v13 = vsel %vm818_vm7, %v5620_v62, %v5621_v52  ;;  %v9631_v52 = vunpack.i.l.bf16 %v7043_v59 }
 0x6e8   : > { %v1678_v19 = vpack.c.bf16 %v5646_v11, %v5645_v12 }
 0x6e9   : > { %v1676_v3 = vpack.c.bf16 %v5636_v15, %v5635_v16  ;;  %v1670_v16 = vpack.c.bf16 %v1604_v13, %v1603_v9  ;;  %v5436_v9 = vld [vmem:[%s9575_s23 + $0x64] sm:$0xf]  ;;  %v5242_v13 = vld [vmem:[%s9575_s23 + $0x6c] sm:$0xf0] }
 0x6ea   : > { %1756 = vrot.lane.b32.xlu2 %v1678_v19, %s6365_s6  ;;  %v5732_v19 = vpack.i.bf16 %v6932_v61, %v6357_v60 }
 0x6eb   : > { %1752 = vrot.lane.b32.xlu0 %v1676_v3, %s6365_s6  ;;  %v5737_v3 = vpack.i.bf16 %v6914_v53, %v6357_v60  ;;  %v2432_v60 = vpack.c.bf16 %v6932_v61, %v6914_v53 }
 0x6ed   : > { %v7053_v22 = vpop.permute.xlu0 %5663  ;;  %v5694_v23 = vpop.permute.xlu2 %5693 }
 0x6ee   : > { %v5649_v32 = vpop.permute.xlu1 %5648  ;;  %v5696_v34 = vunpack.i.h.bf16 %v5694_v23  ;;  %v5695_v35 = vunpack.i.l.bf16 %v5694_v23  ;;  %v9630_v11 = vunpack.i.h.bf16 %v7053_v22  ;;  %v7137_v23 = vld [vmem:[#allocation2 + $0x8] sm:$0xff] }
 0x6ef   : > { %v5651_v36 = vunpack.i.h.bf16 %v5649_v32  ;;  %v5650_v37 = vunpack.i.l.bf16 %v5649_v32  ;;  %9756 = vst [vmem:[#allocation13_spill] sm:$0xff] %v7137_v23  ;;  %v2434_v32 = vpack.c.bf16 %v7135_v18, %v7152_v24 }
 0x6f0   : > { %v1680_v39 = vpack.c.bf16 %v5696_v34, %v5695_v35 }
 0x6f1   : > { %v1679_v21 = vpack.c.bf16 %v5651_v36, %v5650_v37  ;;  %v1915_v36 = vunpack.c.h.b16 %v6807_v44  ;;  %v5254_v44 = vld [vmem:[%s9575_s23 + $0x84] sm:$0xf0] }
 0x6f2   : > { %1760 = vrot.lane.b32.xlu1 %v1680_v39, %s6365_s6  ;;  %1744 = vrot.lane.b32.xlu2 %v1672_v40, %s6365_s6  ;;  %v5420_v40 = vld [vmem:[%s9758_s20 + $0x4] sm:$0xf]  ;;  %v5257_v62 = vor.u32 %v5439_v55, %v5254_v44 }
 0x6f3   : > { %1758 = vrot.lane.b32.xlu0 %v1679_v21, %s6365_s6  ;;  %v1936_v39 = vpack.c.b16 %v1915_v36, %v1915_v36  ;;  %v5218_v36 = vld [vmem:[%s9575_s23 + $0x3c] sm:$0xf0] }
 0x6f5   : > { %v7061_v49 = vpop.permute.xlu0 %5678  ;;  %v1963_v48 = vsel %vm1315_vm13, %v1936_v39, 0  ;;  %v5422_v39 = vld [vmem:[%s9758_s20 + $0x14] sm:$0xf] }
 0x6f6   : > { %v9628_v57 = vunpack.i.l.bf16 %v7061_v49  ;;  %v7065_v63 = vpop.permute.xlu1 %5653 }
 0x6f7   : > { %v9633_v2 = vunpack.i.h.bf16 %v7065_v63 }
 0x6f8   : > { %v7073_v45 = vpack.c.bf16 %v9629_v56, %v9628_v57 }
 0x6f9   : > { %v7080_v14 = vsel %vm834_vm0, %v9633_v2, %v9634_v58 }
 0x6fa   : > { %1748 = vrot.lane.b32.xlu1 %v1674_v6, %s6365_s6  ;;  %5708 = vrot.lane.b32.xlu2 %v6687_v0, %s9753_s5  ;;  %v5179_v6 = vor.u32 %v5420_v40, %v5176_v17  ;;  %v5184_v40 = vld [vmem:[%s9758_s20 + $0x18] sm:$0xf0] }
 0x6fb   : > { %5698 = vrot.lane.b32.xlu0 %v6687_v0, %s9754_s7  ;;  %v5427_v17 = vld [vmem:[%s9575_s23 + $0x1c] sm:$0xf]  ;;  %v5187_v44 = vor.u32 %v5422_v39, %v5184_v40 }
 0x6fe   : > { %v7089_v8 = vpop.permute.xlu1 %5668 }
 0x6ff   : > { %v9635_v12 = vunpack.i.l.bf16 %v7089_v8 }
 0x701   : > { %v7104_v15 = vsel %vm850_vm1, %v9630_v11, %v9635_v12 }
 0x702   : > { %5703 = vrot.lane.b32.xlu1 %v7005_v41, %s9754_s7  ;;  %5723 = vrot.lane.b32.xlu2 %v7005_v41, %s9755_s26 }
 0x703   : > { %1740 = vrot.lane.b32.xlu0 %v1670_v16, %s6365_s6  ;;  %s9757_s6 = smov 19   ;;  %v5245_v16 = vor.u32 %v5436_v9, %v5242_v13 }
 0x706   : > { %v7113_v46 = vpop.permute.xlu1 %5683 }
 0x707   : > { %v9632_v54 = vunpack.i.l.bf16 %v7113_v46 }
 0x709   : > { %v7123_v20 = vpack.c.bf16 %v9632_v54, %v9631_v52 }
 0x70a   : > { %5718 = vrot.lane.b32.xlu1 %v6687_v0, %s9755_s26  ;;  %5733 = vrot.lane.b32.xlu2 %v5732_v19, %s9747_s8  ;;  %v5757_v0 = vpack.i.bf16 %v7137_v23, %v7135_v18 }
 0x70b   : > { %5713 = vrot.lane.b32.xlu0 %v7005_v41, %s9753_s5  ;;  %v5762_v41 = vpack.i.bf16 %v6865_v30, %v7135_v18  ;;  %v7163_v30 = vpop.permute.xlu2 %1738 }
 0x712   : > { %5738 = vrot.lane.b32.xlu1 %v5737_v3, %s9748_s27  ;;  %5748 = vrot.lane.b32.xlu2 %v5737_v3, %s9750_s1 }
 0x713   : > { %5728 = vrot.lane.b32.xlu0 %v5737_v3, %s9747_s8  ;;  %v5230_v3 = vld [vmem:[%s9575_s23 + $0x54] sm:$0xf0] }
 0x71a   : > { %5753 = vrot.lane.b32.xlu1 %v5732_v19, %s9750_s1  ;;  %5758 = vrot.lane.b32.xlu2 %v5757_v0, %s9751_s3 }
 0x71b   : > { %5743 = vrot.lane.b32.xlu0 %v5732_v19, %s9748_s27  ;;  %v5433_v19 = vld [vmem:[%s9575_s23 + $0x4c] sm:$0xf] }
 0x722   : > { %2511 = vrot.lane.b32.xlu1 %v2432_v60, %s9757_s6  ;;  %5763 = vrot.lane.b32.xlu2 %v5762_v41, %s9752_s9 }
 0x723   : > { %2509 = vrot.lane.b32.xlu0 %v6364_v4, %s9757_s6 }
 0x72a   : > { %2369 = vrot.lane.b32.xlu2 %v7135_v18, %s9754_s7 }
 0x72b   : > { %2515 = vrot.lane.b32.xlu0 %v2434_v32, %s9757_s6  ;;  %v5233_v32 = vor.u32 %v5433_v19, %v5230_v3 }
 0x732   : > { %2393 = vrot.lane.b32.xlu2 %v7135_v18, %s9753_s5 }
 0x73a   : > { %2417 = vrot.lane.b32.xlu2 %v7135_v18, %s9755_s26 }
 0x73c   : > { %v1751_v53 = vpop.permute.xlu2 %1750 }
 0x744   : > { %v1757_v35 = vpop.permute.xlu2 %1756 }
 0x74c   : > { %v1745_v21 = vpop.permute.xlu2 %1744 }
 0x74d   : > { %v7165_v4 = vpop.permute.xlu1 %1742 }
 0x754   : > { %v7194_v60 = vpop.permute.xlu2 %5708 }
 0x755   : > { %v1747_v34 = vpop.permute.xlu0 %1746  ;;  %v1755_v37 = vpop.permute.xlu1 %1754  ;;  %v9620_v40 = vunpack.i.h.bf16 %v7194_v60 }
 0x756   : > { %v1765_v19 = vsel %vm1762_vm10, %v1745_v21, %v1747_v34  ;;  %v5174_v34 = vld [vmem:[%s9758_s20] sm:$0xf]  ;;  %v5421_v21 = vld [vmem:[%s9758_s20 + $0x4] sm:$0xf0] }
 0x75c   : > { %v7221_v9 = vpop.permute.xlu2 %5723 }
 0x75d   : > { %v1753_v38 = vpop.permute.xlu0 %1752 }
 0x764   : > { %v1761_v5 = vpop.permute.xlu1 %1760 }
 0x765   : > { %v1759_v7 = vpop.permute.xlu0 %1758  ;;  %1809 = vmatpush.bf16.msra.mxu2 %v1761_v5 }
 0x766   : > { %1783 = vmatpush.bf16.msra.mxu1 %v1759_v7 }
 0x768   : > { %5188 = vmatmul.msk.bf16.vlgmr.msra.gmra.mxu2 %vm9695_vm12, %v5179_v6 }
 0x769   : > { %1983 = vmatpush.bf16.msrb.mxu2 %v1963_v48  ;;  %v5206_v48 = vld [vmem:[%s9575_s23 + $0x24] sm:$0xf0] }
 0x76a   : > { %1784 = vmatpush.bf16.msra.mxu1 %v1757_v35  ;;  %v5430_v35 = vld [vmem:[%s9575_s23 + $0x34] sm:$0xf] }
 0x76c   : > { %v1749_v0 = vpop.permute.xlu1 %1748 }
 0x76d   : > { %1984 = vmatpush.bf16.msrb.mxu2 %v5257_v62  ;;  %v7196_v41 = vpop.permute.xlu0 %5698  ;;  %v5209_v62 = vor.u32 %v5427_v17, %v5206_v48  ;;  %v7269_v48 = vpop.permute.xlu2 %5733 }
 0x76e   : > { %1785 = vmatpush.bf16.msra.mxu1 %v1755_v37  ;;  %v5221_v37 = vor.u32 %v5430_v35, %v5218_v36  ;;  %v9622_v5 = vunpack.i.h.bf16 %v7196_v41  ;;  %9759 = vst [vmem:[#allocation14_spill] sm:$0xff] %v7269_v48 }
 0x771   : > { %1985 = vmatpush.bf16.msrb.mxu2 %v5245_v16  ;;  %v5424_v16 = vld [vmem:[%s9575_s23 + $0x4] sm:$0xf] }
 0x772   : > { %1786 = vmatpush.bf16.msra.mxu1 %v1753_v38  ;;  %v1766_v38 = vsel %vm1762_vm10, %v1749_v0, %v1751_v53  ;;  %v5194_v53 = vld [vmem:[%s9575_s23 + $0xc] sm:$0xf0] }
 0x773   : > { %v5197_v3 = vor.u32 %v5424_v16, %v5194_v53  ;;  %v5735_v16 = vunpack.i.l.bf16 %v7269_v48 }
 0x774   : > { %v7216_v55 = vpop.permute.xlu1 %5703 }
 0x775   : > { %1986 = vmatpush.bf16.msrb.mxu2 %v5233_v32  ;;  %v9624_v6 = vunpack.i.l.bf16 %v7216_v55  ;;  %v1741_v7 = vpop.permute.xlu0 %1740 }
 0x776   : > { %1787 = vmatpush.bf16.msra.mxu1 %v1766_v38  ;;  %v1764_v39 = vsel %vm1762_vm10, %v1741_v7, %v7165_v4  ;;  %v5175_v7 = vor.u32 %v5421_v21, %v5174_v34  ;;  %v5182_v34 = vld [vmem:[%s9758_s20 + $0x10] sm:$0xf]  ;;  %v5423_v21 = vld [vmem:[%s9758_s20 + $0x14] sm:$0xf0] }
 0x777   : > { %v7228_v13 = vsel %vm890_vm3, %v9622_v5, %v9624_v6 }
 0x778   : > { %5189 = vmatmul.msk.bf16.gmra.mxu2 %vm9695_vm12, %v5187_v44  ;;  %v1763_v44 = vsel %vm1762_vm10, %v7030_v47, %v7163_v30  ;;  %vm9877_vm10 = vcmask 588800  }
 0x779   : > { %1987 = vmatpush.bf16.msrb.mxu2 %v5221_v37 }
 0x77a   : > { %1788 = vmatpush.bf16.msra.mxu1 %v1765_v19 }
 0x77c   : > { %v7238_v0 = vpop.permute.xlu1 %5718 }
 0x77d   : > { %1988 = vmatpush.bf16.msrb.mxu2 %v5209_v62  ;;  %v9621_v32 = vunpack.i.h.bf16 %v7238_v0  ;;  %v7242_v35 = vunpack.i.l.bf16 %v7238_v0  ;;  %v7244_v36 = vpop.permute.xlu0 %5713  ;;  %v9619_v62 = vunpack.i.h.bf16 %v7269_v48 }
 0x77e   : > { %v9623_v37 = vunpack.i.l.bf16 %v7244_v36  ;;  %1789 = vmatpush.bf16.msra.mxu1 %v1764_v39 }
 0x77f   : > { %v7260_v17 = vsel %vm916_vm2, %v7242_v35, %v9621_v32  ;;  %v2240_v30 = vsel %vm818_vm7, %v5735_v16, %v9619_v62 }
 0x780   : > { %v7267_v4 = vsel %vm903_vm4, %v9620_v40, %v9623_v37 }
 0x781   : > { %1989 = vmatpush.bf16.msrb.mxu2 %v5197_v3 }
 0x782   : > { %1790 = vmatpush.bf16.msra.mxu1 %v1763_v44  ;;  %v2022_v44 = vld [vmem:[%s9576_s24 + $0x10] sm:$0x3] }
 0x785   : > { %v7278_v53 = vpop.permute.xlu0 %5728  ;;  %1791 = vmatmul.bf16.vlgmr.msra.gmra.mxu1 %v5175_v7  ;;  %v2032_v7 = vunpack.c.l.b16 %v2022_v44 }
 0x786   : > { %9760 = vst [vmem:[#allocation15_spill] sm:$0xff] %v7278_v53  ;;  %v9618_v19 = vunpack.i.h.bf16 %v7278_v53  ;;  %v5730_v3 = vunpack.i.l.bf16 %v7278_v53 }
 0x788   : > { %5263 = vmatmul.msk.bf16.vlgmr.msrb.gmra.mxu2 %vm1358_vm15, %v6860_v29  ;;  %v2237_v47 = vsel %vm818_vm7, %v5730_v3, %v9618_v19  ;;  %v5183_v29 = vor.u32 %v5423_v21, %v5182_v34  ;;  %v2035_v3 = vpack.c.b16 %v2032_v7, %v2032_v7 }
 0x789   : > { %v2435_v39 = vpack.c.bf16 %v2240_v30, %v2237_v47  ;;  %v5443_v47 = vld [vmem:[%s9576_s24 + $0x8] sm:$0xff] }
 0x78a   : > { %v2045_v16 = vsel %vm1315_vm13, %v2035_v3, 0 }
 0x78b   : > { %2517 = vrot.lane.b32.xlu1 %v2435_v39, %s9757_s6  ;;  %2052 = vmatpush.bf16.msrb.mxu0 %v2045_v16  ;;  %v5442_v39 = vld [vmem:[%s9576_s24] sm:$0xff] }
 0x78d   : > { %v7308_v7 = vpop.permute.xlu0 %5743 }
 0x78e   : > { %v5745_v40 = vunpack.i.l.bf16 %v7308_v7 }
 0x78f   : > { %2053 = vmatpush.bf16.msrb.mxu0 %v5443_v47  ;;  %v7313_v47 = vpop.permute.xlu1 %5738 }
 0x793   : > { %2054 = vmatpush.bf16.msrb.mxu0 %v5442_v39  ;;  %v9639_v39 = vunpack.i.h.bf16 %v7308_v7 }
 0x795   : > { %1796 = vmatmul.bf16.gmra.mxu1 %v5183_v29 }
 0x7eb   : > { %v1811_v30 = vpop.f32.mrf.mxu2 }
 0x7f3   : > { %v1813_v34 = vpop.f32.mrf.mxu2 }
 0x7fb   : > { %v1816_v21 = vpop.f32.mrf.mxu2 }
 0x802   : > { %v1792_v29 = vpop.f32.mrf.mxu1 }
 0x803   : > { %v1818_v19 = vpop.f32.mrf.mxu2  ;;  %v1793_v44 = vadd.f32 %v1792_v29, %v6969_v1  ;;  %v9640_v1 = vunpack.i.h.bf16 %v7313_v47 }
 0x805   : > { %v1812_v16 = vadd.f32 %v1811_v30, %v1793_v44 }
 0x807   : > { %v1821_v30 = vmax.f32 %v1812_v16, 0.0 }
 0x80a   : > { %v1794_v3 = vpop.f32.mrf.mxu1 }
 0x80b   : > { %v1795_v62 = vadd.f32 %v1794_v3, %v7026_v33  ;;  %v7311_v38 = vpop.f32.mrf.mxu2  ;;  %v5740_v33 = vunpack.i.l.bf16 %v7313_v47 }
 0x80c   : > { %v5777_v51 = vpack.i.bf16 %v7152_v24, %v7311_v38  ;;  %v2270_v24 = vsel %vm834_vm0, %v5745_v40, %v9639_v39 }
 0x80d   : > { %v1814_v32 = vadd.f32 %v1813_v34, %v1795_v62  ;;  %v2267_v34 = vsel %vm834_vm0, %v5740_v33, %v9640_v1 }
 0x80e   : > { %5778 = vrot.lane.b32.xlu0 %v5777_v51, %s9750_s1  ;;  %5773 = vrot.lane.b32.xlu2 %v5777_v51, %s9748_s27  ;;  %v2439_v5 = vpack.c.bf16 %v2270_v24, %v2267_v34  ;;  %v7363_v24 = vpop.permute.xlu0 %2509 }
 0x80f   : > { %v1822_v29 = vmax.f32 %v1814_v32, 0.0  ;;  %5768 = vrot.lane.b32.xlu1 %v5777_v51, %s9747_s8  ;;  %9761 = vst [vmem:[#allocation16_spill] sm:$0xff] %v7363_v24 }
 0x811   : > { %v2016_v44 = vpack.c.bf16 %v1822_v29, %v1821_v30 }
 0x812   : > { %v1797_v3 = vpop.f32.mrf.mxu1 }
 0x813   : > { %5273 = vmatmul.msk.bf16.vlgmr.msrb.gmra.mxu0 %vm1580_vm14, %v2016_v44  ;;  %v7328_v62 = vpop.f32.mrf.mxu2  ;;  %v1798_v32 = vadd.f32 %v1797_v3, %v7020_v42  ;;  %v7344_v42 = vpop.permute.xlu2 %5748 }
 0x815   : > { %v1817_v30 = vadd.f32 %v1816_v21, %v1798_v32  ;;  %v5750_v21 = vunpack.i.l.bf16 %v7344_v42 }
 0x816   : > { %5783 = vrot.lane.b32.xlu0 %v5777_v51, %s9751_s3  ;;  %2525 = vrot.lane.b32.xlu2 %v2439_v5, %s9757_s6  ;;  %v7342_v5 = vpop.permute.xlu1 %5753  ;;  %v7365_v3 = vpop.permute.xlu0 %2515 }
 0x817   : > { %v1823_v44 = vmax.f32 %v1817_v30, 0.0  ;;  %9762 = vst [vmem:[#allocation17_spill] sm:$0xff] %v7365_v3 }
 0x81a   : > { %v1799_v16 = vpop.f32.mrf.mxu1 }
 0x81b   : > { %v1800_v40 = vadd.f32 %v1799_v16, %v6971_v25  ;;  %v7348_v25 = vpack.i.bf16 %v7135_v18, %v7328_v62 }
 0x81d   : > { %v1819_v29 = vadd.f32 %v1818_v19, %v1800_v40  ;;  %v9626_v19 = vunpack.i.h.bf16 %v7342_v5 }
 0x81e   : > { %5788 = vrot.lane.b32.xlu0 %v5777_v51, %s9752_s9 }
 0x81f   : > { %v1824_v37 = vmax.f32 %v1819_v29, 0.0 }
 0x821   : > { %v2017_v6 = vpack.c.bf16 %v1824_v37, %v1823_v44  ;;  %v5755_v37 = vunpack.i.l.bf16 %v7342_v5 }
 0x823   : > { %5274 = vmatmul.msk.bf16.gmra.mxu0 %vm1580_vm14, %v2017_v6  ;;  %v9625_v6 = vunpack.i.h.bf16 %v7344_v42  ;;  %vm9878_vm14 = vmmov %vm9877_vm10 }
 0x825   : > { %v2297_v18 = vsel %vm850_vm1, %v5750_v21, %v9625_v6 }
 0x826   : > { %5793 = vrot.lane.b32.xlu0 %v5777_v51, %s9754_s7 }
 0x82e   : > { %5798 = vrot.lane.b32.xlu0 %v5777_v51, %s9753_s5 }
 0x836   : > { %5803 = vrot.lane.b32.xlu0 %v5777_v51, %s9755_s26  ;;  %v2300_v51 = vsel %vm850_vm1, %v5755_v37, %v9626_v19 }
 0x837   : > { %v2443_v33 = vpack.c.bf16 %v2300_v51, %v2297_v18  ;;  %v7386_v51 = vpop.permute.xlu1 %2511 }
 0x838   : > { %9765 = vst [vmem:[#allocation20_spill] sm:$0xff] %v7386_v51 }
 0x83e   : > { %5808 = vrot.lane.b32.xlu0 %v7348_v25, %s9747_s8 }
 0x846   : > { %2533 = vrot.lane.b32.xlu0 %v2443_v33, %s9757_s6 }
 0x880   : > { %v7367_v34 = vpop.permute.xlu0 %5778 }
 0x888   : > { %v7369_v32 = vpop.permute.xlu0 %5783 }
 0x889   : > { %9763 = vst [vmem:[#allocation18_spill] sm:$0xff] %v7369_v32 }
 0x890   : > { %v2056_v16 = vpop.f32.mrf.mxu0  ;;  %v7371_v30 = vpop.permute.xlu0 %5788 }
 0x891   : > { %2066 = vst.msk [vmem:[#allocation7 + $0x8] sm:$0xff] %vm1358_vm15, %v2056_v16  ;;  %v9669_v48 = vunpack.i.l.bf16 %v7371_v30 }
 0x898   : > { %v2058_v40 = vpop.f32.mrf.mxu0  ;;  %v7374_v29 = vpop.permute.xlu0 %5793 }
 0x899   : > { %2067 = vst.msk [vmem:[#allocation7 + $0x18] sm:$0xff] %vm1358_vm15, %v2058_v40  ;;  %v9638_v44 = vunpack.i.h.bf16 %v7374_v29  ;;  %v9627_v37 = vunpack.i.l.bf16 %v7374_v29  ;;  %v7393_v40 = vld [vmem:[#allocation7 + $0x8] sm:$0xff] }
 0x89a   : > { %9767 = vst [vmem:[#allocation22_spill] sm:$0xff] %v7393_v40 }
 0x89b   : > { %v7384_v21 = vsel %vm890_vm3, %v9627_v37, %v9638_v44  ;;  %v7401_v37 = vpop.permute.xlu1 %2517 }
 0x89c   : > { %9764 = vst [vmem:[#allocation19_spill] sm:$0xff] %v7384_v21  ;;  %v9792_v21 = vunpack.i.l.bf16 %v7032_v50 }
 0x89d   : > { %9768 = vst [vmem:[#allocation23_spill] sm:$0xff] %v7401_v37 }
 0x8a0   : > { %v2061_v18 = vpop.f32.mrf.mxu0  ;;  %v7388_v33 = vpop.permute.xlu0 %5798  ;;  %v7390_v16 = vld [vmem:[#allocation7 + $0x18] sm:$0xff] }
 0x8a1   : > { %9766 = vst [vmem:[#allocation21_spill] sm:$0xff] %v7390_v16  ;;  %v7397_v6 = vpack.i.bf16 %v7390_v16, %v7393_v40 }
 0x8a2   : > { %2068 = vst.msk [vmem:[#allocation7 + $0x28] sm:$0xff] %vm1358_vm15, %v2061_v18 }
 0x8a3   : > { %v7406_v11 = vpop.permute.xlu1 %5768 }
 0x8a4   : > { %9769 = vst [vmem:[#allocation24_spill] sm:$0xff] %v7406_v11  ;;  %v5771_v18 = vunpack.i.h.bf16 %v7406_v11  ;;  %v9641_v52 = vunpack.i.l.bf16 %v7406_v11 }
 0x8a6   : > { %v7427_v27 = vsel %vm818_vm7, %v9641_v52, %v5771_v18  ;;  %v7447_v52 = vpop.permute.xlu2 %5758 }
 0x8a7   : > { %9774 = vst [vmem:[#allocation29_spill] sm:$0xff] %v7447_v52 }
 0x8a8   : > { %v2063_v57 = vpop.f32.mrf.mxu0  ;;  %v7403_v56 = vpop.permute.xlu0 %5803 }
 0x8a9   : > { %2069 = vst.msk [vmem:[#allocation7 + $0x38] sm:$0xff] %vm1358_vm15, %v2063_v57  ;;  %v7416_v12 = vld [vmem:[#allocation7 + $0x28] sm:$0xff]  ;;  %v7443_v57 = vpack.i.bf16 %v7328_v62, %v6932_v61 }
 0x8aa   : > { %9772 = vst [vmem:[#allocation27_spill] sm:$0xff] %v7416_v12 }
 0x8b0   : > { %v7410_v54 = vpop.permute.xlu0 %5808  ;;  %v7412_v2 = vld [vmem:[#allocation7 + $0x38] sm:$0xff] }
 0x8b1   : > { %9770 = vst [vmem:[#allocation25_spill] sm:$0xff] %v7410_v54  ;;  %v5811_v58 = vunpack.i.h.bf16 %v7410_v54  ;;  %v9642_v19 = vunpack.i.l.bf16 %v7410_v54  ;;  %v7420_v28 = vpack.i.bf16 %v7412_v2, %v7416_v12 }
 0x8b2   : > { %9771 = vst [vmem:[#allocation26_spill] sm:$0xff] %v7412_v2  ;;  %v9777_v2 = vunpack.i.h.bf16 %v7313_v47 }
 0x8b3   : > { %9773 = vst [vmem:[#allocation28_spill] sm:$0xff] %v7420_v28  ;;  %v7432_v44 = vsel %vm818_vm7, %v9642_v19, %v5811_v58  ;;  %v2438_v39 = vpack.c.bf16 %v5811_v58, %v5771_v18  ;;  %v7449_v58 = vpop.permute.xlu2 %5763 }
 0x8b5   : > { %2523 = vrot.lane.b32.xlu1 %v2438_v39, %s9757_s6 }
 0x8bb   : > { %v7451_v18 = vpop.permute.xlu2 %2369 }
 0x8bd   : > { %5813 = vrot.lane.b32.xlu1 %v7348_v25, %s9748_s27 }
 0x8c3   : > { %v7453_v1 = vpop.permute.xlu2 %2393 }
 0x8c4   : > { %9775 = vst [vmem:[#allocation30_spill] sm:$0xff] %v7453_v1 }
 0x8c5   : > { %5823 = vrot.lane.b32.xlu1 %v7443_v57, %s9751_s3 }
 0x8cb   : > { %v7455_v19 = vpop.permute.xlu2 %2417 }
 0x8d3   : > { %v7459_v3 = vpop.permute.xlu2 %5773 }
 0x8d4   : > { %v9652_v61 = vunpack.i.l.bf16 %v7459_v3  ;;  %v9657_v51 = vunpack.i.h.bf16 %v7459_v3 }
 0x8d6   : > { %v7472_v12 = vsel %vm834_vm0, %v9777_v2, %v9652_v61  ;;  %v9653_v2 = vunpack.i.h.bf16 %v7061_v49 }
 0x8d7   : > { %9778 = vst [vmem:[#allocation32_spill] sm:$0xff] %v7472_v12 }
 0x927   : > { %v7457_v39 = vpop.permute.xlu1 %2523 }
 0x928   : > { %9776 = vst [vmem:[#allocation31_spill] sm:$0xff] %v7457_v39  ;;  %v9779_v39 = vunpack.i.h.bf16 %v7308_v7 }
 0x92f   : > { %v7462_v24 = vpop.permute.xlu1 %5813 }
 0x930   : > { %v9659_v37 = vunpack.i.h.bf16 %v7462_v24  ;;  %v9658_v28 = vunpack.i.l.bf16 %v7462_v24 }
 0x932   : > { %v7479_v23 = vsel %vm834_vm0, %v9779_v39, %v9658_v28  ;;  %v2442_v53 = vpack.c.bf16 %v9659_v37, %v9657_v51  ;;  %v9655_v39 = vunpack.i.h.bf16 %v7369_v32 }
 0x934   : > { %2531 = vrot.lane.b32.xlu2 %v2442_v53, %s9757_s6  ;;  %v9656_v53 = vunpack.i.l.bf16 %v7447_v52 }
 0x936   : > { %v2450_v11 = vpack.c.bf16 %v9656_v53, %v9655_v39 }
 0x937   : > { %v7488_v47 = vpop.permute.xlu1 %5823 }
 0x938   : > { %v9654_v61 = vunpack.i.l.bf16 %v7488_v47 }
 0x93a   : > { %v2447_v7 = vpack.c.bf16 %v9654_v61, %v9653_v2  ;;  %v5781_v2 = vunpack.i.h.bf16 %v7367_v34  ;;  %v9664_v61 = vunpack.i.l.bf16 %v7367_v34 }
 0x93c   : > { %2541 = vrot.lane.b32.xlu1 %v2447_v7, %s9757_s6  ;;  %5818 = vrot.lane.b32.xlu2 %v7348_v25, %s9750_s1  ;;  %v7512_v25 = vpop.permute.xlu2 %2525  ;;  %v7525_v51 = vsel %vm850_vm1, %v9664_v61, %v5781_v2  ;;  %v5691_v61 = vunpack.i.h.bf16 %v7049_v10 }
 0x93d   : > { %9780 = vst [vmem:[#allocation33_spill] sm:$0xff] %v7512_v25 }
 0x93e   : > { %9782 = vst [vmem:[#allocation35_spill] sm:$0xff] %v7525_v51  ;;  %v9676_v51 = vunpack.i.h.bf16 %v7216_v55 }
 0x944   : > { %2547 = vrot.lane.b32.xlu1 %v2450_v11, %s9757_s6 }
 0x94c   : > { %5828 = vrot.lane.b32.xlu1 %v7443_v57, %s9752_s9 }
 0x954   : > { %5833 = vrot.lane.b32.xlu1 %v7443_v57, %s9754_s7 }
 0x95c   : > { %5838 = vrot.lane.b32.xlu1 %v7443_v57, %s9753_s5 }
 0x98e   : > { %v7514_v7 = vpop.permute.xlu2 %2531 }
 0x98f   : > { %9781 = vst [vmem:[#allocation34_spill] sm:$0xff] %v7514_v7  ;;  %v5596_v7 = vunpack.i.h.bf16 %v7022_v43 }
 0x996   : > { %v7518_v39 = vpop.permute.xlu2 %5818 }
 0x997   : > { %v5821_v11 = vunpack.i.h.bf16 %v7518_v39  ;;  %v9667_v53 = vunpack.i.l.bf16 %v7518_v39 }
 0x999   : > { %v7530_v28 = vsel %vm850_vm1, %v9667_v53, %v5821_v11  ;;  %v2446_v37 = vpack.c.bf16 %v5821_v11, %v5781_v2  ;;  %v7548_v2 = vsel %vm877_vm6, %v5691_v61, %v9669_v48  ;;  %v9678_v48 = vunpack.i.l.bf16 %v7449_v58 }
 0x99a   : > { %9783 = vst [vmem:[#allocation36_spill] sm:$0xff] %v7530_v28 }
 0x99b   : > { %2539 = vrot.lane.b32.xlu0 %v2446_v37, %s9757_s6  ;;  %9786 = vst [vmem:[#allocation39_spill] sm:$0xff] %v7548_v2 }
 0x9ae   : > { %v7535_v25 = vpop.permute.xlu1 %2541 }
 0x9af   : > { %9784 = vst [vmem:[#allocation37_spill] sm:$0xff] %v7535_v25 }
 0x9b6   : > { %v7537_v52 = vpop.permute.xlu1 %2547 }
 0x9b7   : > { %9785 = vst [vmem:[#allocation38_spill] sm:$0xff] %v7537_v52  ;;  %v9675_v52 = vunpack.i.h.bf16 %v7371_v30 }
 0x9be   : > { %v7540_v54 = vpop.permute.xlu1 %5828 }
 0x9bf   : > { %v9672_v32 = vunpack.i.h.bf16 %v7540_v54  ;;  %v5830_v53 = vunpack.i.l.bf16 %v7540_v54 }
 0x9c1   : > { %v7553_v37 = vsel %vm877_vm6, %v5830_v53, %v9672_v32  ;;  %v2451_v11 = vpack.c.bf16 %v5830_v53, %v5691_v61  ;;  %v2454_v53 = vpack.c.bf16 %v9678_v48, %v9675_v52 }
 0x9c3   : > { %2549 = vrot.lane.b32.xlu2 %v2451_v11, %s9757_s6 }
 0x9c6   : > { %v7559_v25 = vpop.permute.xlu1 %5833 }
 0x9c7   : > { %v9673_v28 = vunpack.i.h.bf16 %v7559_v25  ;;  %v9677_v12 = vunpack.i.l.bf16 %v7559_v25 }
 0x9c9   : > { %v7569_v61 = vsel %vm890_vm3, %v9673_v28, %v7451_v18  ;;  %v2455_v11 = vpack.c.bf16 %v9677_v12, %v9676_v51  ;;  %v9679_v28 = vunpack.i.h.bf16 %v7244_v36  ;;  %v9788_v51 = vunpack.i.h.bf16 %v7374_v29 }
 0x9ca   : > { %9787 = vst [vmem:[#allocation40_spill] sm:$0xff] %v7569_v61 }
 0x9cb   : > { %2555 = vrot.lane.b32.xlu2 %v2454_v53, %s9757_s6  ;;  %2557 = vrot.lane.b32.xlu0 %v2455_v11, %s9757_s6  ;;  %v2458_v12 = vpack.c.bf16 %v7451_v18, %v9788_v51  ;;  %v5595_v53 = vunpack.i.l.bf16 %v7022_v43  ;;  %v9681_v11 = vunpack.i.h.bf16 %v7388_v33  ;;  %v6329_v43 = vld [vmem:[#allocation2 + $0x18] sm:$0xff]  ;;  %v5671_v18 = vunpack.i.h.bf16 %v7089_v8 }
 0x9cd   : > { %v2087_v48 = vsel %vm818_vm7, %v5595_v53, %v5596_v7  ;;  %v5661_v53 = vunpack.i.h.bf16 %v7032_v50 }
 0x9ce   : > { %v7583_v32 = vpop.permute.xlu1 %5838 }
 0x9cf   : > { %v9680_v2 = vunpack.i.l.bf16 %v7583_v32 }
 0x9d1   : > { %v2459_v52 = vpack.c.bf16 %v9680_v2, %v9679_v28  ;;  %v2462_v28 = vpack.c.bf16 %v7453_v1, %v9681_v11  ;;  %v7603_v2 = vld [vmem:[#allocation2] sm:$0xff]  ;;  %v9790_v11 = vunpack.i.l.bf16 %v6975_v26 }
 0x9d2   : > { %v2184_v51 = vpack.c.bf16 %v2087_v48, %v7603_v2 }
 0x9d3   : > { %2565 = vrot.lane.b32.xlu1 %v2459_v52, %s9757_s6  ;;  %2563 = vrot.lane.b32.xlu0 %v2458_v12, %s9757_s6  ;;  %v9789_v52 = vunpack.i.h.bf16 %v6975_v26  ;;  %v2088_v48 = vsel %vm818_vm7, %v5596_v7, %v9790_v11  ;;  %v5676_v26 = vunpack.i.h.bf16 %v7043_v59  ;;  %v9793_v7 = vunpack.i.h.bf16 %v7065_v63 }
 0x9d5   : > { %v2187_v12 = vpack.c.bf16 %v9789_v52, %v6329_v43  ;;  %v2104_v43 = vsel %vm834_vm0, %v9792_v21, %v5661_v53  ;;  %v6330_v52 = vld [vmem:[#allocation2 + $0x8] sm:$0xff]  ;;  %v9794_v21 = vunpack.i.l.bf16 %v7113_v46 }
 0x9d6   : > { %v2185_v61 = vpack.c.bf16 %v2088_v48, %v6330_v52  ;;  %v9795_v48 = vunpack.i.l.bf16 %v7043_v59  ;;  %v2191_v52 = vpack.c.bf16 %v5671_v18, %v5661_v53  ;;  %v9797_v59 = vunpack.i.l.bf16 %v7049_v10 }
 0x9d7   : > { %v9801_v10 = vunpack.i.h.bf16 %v7196_v41 }
 0x9db   : > { %2571 = vrot.lane.b32.xlu1 %v2462_v28, %s9757_s6  ;;  %2736 = vrot.lane.b32.xlu0 %v2184_v51, %s9757_s6  ;;  %v9791_v28 = vunpack.i.l.bf16 %v7089_v8  ;;  %v5665_v8 = vunpack.i.l.bf16 %v7053_v22 }
 0x9dd   : > { %v2119_v51 = vsel %vm850_vm1, %v9791_v28, %v5671_v18  ;;  %v2130_v28 = vsel %vm864_vm5, %v9795_v48, %v5676_v26  ;;  %v5725_v18 = vunpack.i.l.bf16 %v7221_v9 }
 0x9de   : > { %v2190_v1 = vpack.c.bf16 %v2119_v51, %v2104_v43 }
 0x9e3   : > { %5843 = vrot.lane.b32.xlu1 %v7443_v57, %s9755_s26  ;;  %2742 = vrot.lane.b32.xlu0 %v2187_v12, %s9757_s6  ;;  %v5655_v57 = vunpack.i.l.bf16 %v7065_v63  ;;  %v5686_v12 = vunpack.i.h.bf16 %v7113_v46  ;;  %v5700_v63 = vunpack.i.l.bf16 %v7196_v41  ;;  %v5710_v46 = vunpack.i.l.bf16 %v7194_v60  ;;  %v6331_v41 = vld [vmem:[#allocation4 + $0x8] sm:$0xff] }
 0x9e5   : > { %v2102_v50 = vsel %vm834_vm0, %v5655_v57, %v9793_v7  ;;  %v2142_v11 = vsel %vm877_vm6, %v9794_v21, %v5686_v12  ;;  %v2196_v57 = vpack.c.bf16 %v5710_v46, %v5700_v63  ;;  %v9800_v21 = vunpack.i.l.bf16 %v7244_v36 }
 0x9e6   : > { %v2193_v43 = vpack.c.bf16 %v2142_v11, %v2130_v28  ;;  %v2154_v53 = vsel %vm890_vm3, %v5700_v63, %v9801_v10  ;;  %v9803_v28 = vunpack.i.h.bf16 %v7194_v60  ;;  %v7675_v63 = vpack.i.bf16 %v6331_v41, %v7603_v2  ;;  %v7680_v60 = vld [vmem:[#allocation4 + $0x18] sm:$0xff] }
 0x9eb   : > { %2738 = vrot.lane.b32.xlu1 %v2185_v61, %s9757_s6  ;;  %2748 = vrot.lane.b32.xlu0 %v2190_v1, %s9757_s6  ;;  %v9796_v61 = vunpack.i.h.bf16 %v7053_v22  ;;  %v2143_v22 = vsel %vm877_vm6, %v5686_v12, %v9797_v59  ;;  %v9802_v12 = vunpack.i.h.bf16 %v7238_v0  ;;  %v2203_v0 = vpack.c.bf16 %v5725_v18, %v5725_v18 }
 0x9ed   : > { %v2117_v1 = vsel %vm850_vm1, %v5665_v8, %v9796_v61  ;;  %v9798_v8 = vunpack.i.l.bf16 %v7061_v49  ;;  %v2166_v61 = vsel %vm903_vm4, %v5710_v46, %v9803_v28  ;;  %v7684_v46 = vpack.i.bf16 %v7680_v60, %v7603_v2 }
 0x9ee   : > { %v2188_v51 = vpack.c.bf16 %v2117_v1, %v2102_v50  ;;  %v9799_v50 = vunpack.i.l.bf16 %v7216_v55  ;;  %v9814_v28 = vunpack.i.h.bf16 %v7344_v42 }
 0x9ef   : > { %v2131_v7 = vsel %vm864_vm5, %v5676_v26, %v9798_v8  ;;  %v2179_v26 = vsel %vm916_vm2, %v9802_v12, %v5725_v18  ;;  %v9808_v8 = vunpack.i.l.bf16 %v7462_v24  ;;  %v9812_v12 = vunpack.i.h.bf16 %v7342_v5 }
 0x9f0   : > { %v2199_v11 = vpack.c.bf16 %v9800_v21, %v9799_v50  ;;  %v2194_v48 = vpack.c.bf16 %v2143_v22, %v2131_v7  ;;  %v2202_v1 = vpack.c.bf16 %v2179_v26, %v2179_v26  ;;  %v9807_v22 = vunpack.i.h.bf16 %v7462_v24 }
 0x9f1   : > { %v9809_v50 = vunpack.i.h.bf16 %v7459_v3  ;;  %v9810_v21 = vunpack.i.l.bf16 %v7459_v3  ;;  %v9813_v26 = vunpack.i.l.bf16 %v7367_v34  ;;  %v9818_v34 = vunpack.i.l.bf16 %v7371_v30 }
 0x9f2   : > { %v2272_v7 = vsel %vm834_vm0, %v9808_v8, %v9807_v22 }
 0x9f3   : > { %2744 = vrot.lane.b32.xlu1 %v2188_v51, %s9757_s6  ;;  %2754 = vrot.lane.b32.xlu0 %v2193_v43, %s9757_s6  ;;  %v2197_v51 = vpack.c.bf16 %v2166_v61, %v2154_v53  ;;  %v2200_v43 = vpack.c.bf16 %v7242_v35, %v7242_v35  ;;  %v5877_v35 = vpack.i.bf16 %v7680_v60, %v6331_v41  ;;  %v9811_v53 = vunpack.i.l.bf16 %v7518_v39 }
 0x9f4   : > { %v2298_v3 = vsel %vm850_vm1, %v9814_v28, %v9813_v26  ;;  %v9816_v39 = vunpack.i.h.bf16 %v7540_v54  ;;  %v9817_v41 = vunpack.i.h.bf16 %v7371_v30  ;;  %v9819_v54 = vunpack.i.h.bf16 %v7559_v25 }
 0x9f5   : > { %v2301_v24 = vsel %vm850_vm1, %v9812_v12, %v9811_v53  ;;  %v9822_v53 = vunpack.i.h.bf16 %v7216_v55 }
 0x9f6   : > { %v2444_v61 = vpack.c.bf16 %v2301_v24, %v2298_v3  ;;  %v2348_v42 = vsel %vm877_vm6, %v9818_v34, %v9817_v41  ;;  %v6332_v41 = vld [vmem:[#allocation2 + $0x10] sm:$0xff] }
 0x9f7   : > { %v2186_v34 = vpack.c.bf16 %v6984_v31, %v6332_v41  ;;  %v9834_v41 = vld [vmem:[#allocation14_spill] sm:$0xff] }
 0x9fb   : > { %2750 = vrot.lane.b32.xlu1 %v2191_v52, %s9757_s6  ;;  %2760 = vrot.lane.b32.xlu0 %v2196_v57, %s9757_s6  ;;  %v7696_v52 = vpop.permute.xlu0 %2533 }
 0xa03   : > { %2756 = vrot.lane.b32.xlu1 %v2194_v48, %s9757_s6  ;;  %2766 = vrot.lane.b32.xlu0 %v2199_v11, %s9757_s6  ;;  %v2269_v11 = vsel %vm834_vm0, %v9810_v21, %v9809_v50  ;;  %v9820_v50 = vunpack.i.l.bf16 %v7559_v25 }
 0xa04   : > { %v2441_v48 = vpack.c.bf16 %v2272_v7, %v2269_v11  ;;  %v5726_v7 = vunpack.i.h.bf16 %v7221_v9 }
 0xa05   : > { %v2373_v21 = vsel %vm890_vm3, %v9820_v50, %v9819_v54  ;;  %v2201_v54 = vpack.c.bf16 %v7260_v17, %v7260_v17 }
 0xa0b   : > { %2772 = vrot.lane.b32.xlu0 %v2202_v1, %s9757_s6  ;;  %2762 = vrot.lane.b32.xlu1 %v2197_v51, %s9757_s6 }
 0xa0d   : > { %v7699_v57 = vpop.permute.xlu0 %2539 }
 0xa13   : > { %5848 = vrot.lane.b32.xlu0 %v7675_v63, %s9747_s8  ;;  %2768 = vrot.lane.b32.xlu1 %v2200_v43, %s9757_s6  ;;  %v9815_v43 = vunpack.i.l.bf16 %v7449_v58 }
 0xa15   : > { %v2350_v5 = vsel %vm877_vm6, %v9816_v39, %v9815_v43 }
 0xa1b   : > { %5863 = vrot.lane.b32.xlu0 %v7684_v46, %s9748_s27  ;;  %2774 = vrot.lane.b32.xlu1 %v2203_v0, %s9757_s6  ;;  %v2453_v0 = vpack.c.bf16 %v2350_v5, %v2348_v42  ;;  %v7792_v42 = vpack.i.bf16 %v7390_v16, %v7603_v2 }
 0xa23   : > { %5878 = vrot.lane.b32.xlu0 %v5877_v35, %s9804_s21  ;;  %5853 = vrot.lane.b32.xlu1 %v7684_v46, %s9747_s8 }
 0xa2b   : > { %5888 = vrot.lane.b32.xlu0 %v5877_v35, %s9805_s22  ;;  %5868 = vrot.lane.b32.xlu1 %v7675_v63, %s9746_s30 }
 0xa33   : > { %5883 = vrot.lane.b32.xlu1 %v5877_v35, %s9749_s0 }
 0xa3b   : > { %5893 = vrot.lane.b32.xlu1 %v5877_v35, %s9806_s15  ;;  %v5805_v35 = vunpack.i.l.bf16 %v7403_v56 }
 0xa3d   : > { %v7702_v59 = vpop.permute.xlu0 %2557  ;;  %v7760_v24 = vsel %vm916_vm2, %v5726_v7, %v5805_v35 }
 0xa43   : > { %2529 = vrot.lane.b32.xlu1 %v2441_v48, %s9757_s6  ;;  %v9821_v48 = vunpack.i.l.bf16 %v7374_v29  ;;  %v5806_v29 = vunpack.i.h.bf16 %v7403_v56  ;;  %v7783_v56 = vpack.i.bf16 %v7393_v40, %v7603_v2 }
 0xa45   : > { %v7715_v18 = vpop.permute.xlu1 %2565  ;;  %v7717_v10 = vpop.permute.xlu0 %2563  ;;  %v2371_v12 = vsel %vm890_vm3, %v9822_v53, %v9821_v48  ;;  %v2466_v43 = vpack.c.bf16 %v7455_v19, %v5806_v29 }
 0xa46   : > { %v2456_v28 = vpack.c.bf16 %v2373_v21, %v2371_v12  ;;  %v7834_v53 = vpop.permute.xlu2 %2549  ;;  %v9828_v12 = vpack.c.bf16 %v7432_v44, %v7427_v27  ;;  %v9832_v44 = vld [vmem:[#allocation25_spill] sm:$0xff] }
 0xa4b   : > { %2535 = vrot.lane.b32.xlu1 %v2444_v61, %s9757_s6  ;;  %v2420_v61 = vsel %vm916_vm2, %v5805_v35, %v5806_v29  ;;  %v2433_v29 = vpack.c.bf16 %v7328_v62, %v7311_v38  ;;  %v9836_v38 = vld [vmem:[#allocation29_spill] sm:$0xff] }
 0xa4c   : > { %v9837_v62 = vunpack.i.l.bf16 %v9836_v38 }
 0xa4d   : > { %v7730_v1 = vpop.permute.xlu1 %2571  ;;  %v7732_v51 = vpop.permute.xlu0 %2736 }
 0xa53   : > { %2553 = vrot.lane.b32.xlu1 %v2453_v0, %s9757_s6  ;;  %v9823_v0 = vpack.c.bf16 %v7104_v15, %v7080_v14 }
 0xa55   : > { %v5844_v22 = vpop.permute.xlu1 %5843  ;;  %v7746_v8 = vpop.permute.xlu0 %2742 }
 0xa56   : > { %v5846_v11 = vunpack.i.h.bf16 %v5844_v22  ;;  %v5845_v30 = vunpack.i.l.bf16 %v5844_v22 }
 0xa58   : > { %v7763_v26 = vsel %vm916_vm2, %v5845_v30, %v5846_v11  ;;  %v2463_v9 = vpack.c.bf16 %v5845_v30, %v5726_v7  ;;  %v2422_v3 = vsel %vm916_vm2, %v5846_v11, %v7455_v19  ;;  %v9825_v7 = vpack.c.bf16 %v7267_v4, %v7228_v13 }
 0xa59   : > { %v2464_v25 = vpack.c.bf16 %v7763_v26, %v7760_v24  ;;  %v2465_v39 = vpack.c.bf16 %v2422_v3, %v2420_v61  ;;  %v9829_v3 = vld [vmem:[#allocation32_spill] sm:$0xff]  ;;  %v9831_v61 = vld [vmem:[#allocation18_spill] sm:$0xff] }
 0xa5a   : > { %2573 = vrot.lane.b32.xlu2 %v2463_v9, %s9757_s6  ;;  %v7847_v9 = vpop.permute.xlu2 %2555 }
 0xa5b   : > { %2559 = vrot.lane.b32.xlu1 %v2456_v28, %s9757_s6 }
 0xa5d   : > { %v7770_v55 = vpop.permute.xlu0 %2748  ;;  %v7806_v35 = vpop.permute.xlu1 %2738 }
 0xa62   : > { %2579 = vrot.lane.b32.xlu2 %v2466_v43, %s9757_s6  ;;  %v5785_v43 = vunpack.i.l.bf16 %v9831_v61 }
 0xa63   : > { %2577 = vrot.lane.b32.xlu1 %v2465_v39, %s9757_s6  ;;  %v9833_v39 = vunpack.i.l.bf16 %v9832_v44  ;;  %v5841_v44 = vunpack.i.h.bf16 %v7583_v32 }
 0xa65   : > { %v7778_v5 = vpop.permute.xlu0 %2754  ;;  %v7814_v15 = vpop.permute.xlu1 %2744 }
 0xa6a   : > { %2740 = vrot.lane.b32.xlu2 %v2186_v34, %s9757_s6  ;;  %v9835_v34 = vunpack.i.h.bf16 %v9834_v41  ;;  %v9844_v41 = vld [vmem:[#allocation35_spill] sm:$0xff] }
 0xa6b   : > { %5908 = vrot.lane.b32.xlu1 %v7783_v56, %s9746_s30 }
 0xa6d   : > { %v7788_v19 = vpop.permute.xlu0 %2760  ;;  %v7824_v50 = vpop.permute.xlu1 %2750 }
 0xa72   : > { %2746 = vrot.lane.b32.xlu2 %v9823_v0, %s9757_s6  ;;  %v2241_v0 = vsel %vm818_vm7, %v9835_v34, %v9833_v39  ;;  %v9843_v39 = vld [vmem:[#allocation36_spill] sm:$0xff] }
 0xa73   : > { %5918 = vrot.lane.b32.xlu1 %v7792_v42, %s9748_s27  ;;  %v9845_v34 = vpack.c.bf16 %v9843_v39, %v9844_v41  ;;  %v9853_v41 = vld [vmem:[#allocation40_spill] sm:$0xff] }
 0xa75   : > { %v7800_v31 = vpop.permute.xlu0 %2766  ;;  %v7832_v11 = vpop.permute.xlu1 %2756 }
 0xa7a   : > { %2752 = vrot.lane.b32.xlu2 %v7123_v20, %s9757_s6 }
 0xa7b   : > { %5938 = vrot.lane.b32.xlu1 %v7397_v6, %s9806_s15 }
 0xa7d   : > { %v7808_v22 = vpop.permute.xlu0 %2772  ;;  %v7839_v17 = vpop.permute.xlu1 %2762 }
 0xa82   : > { %2758 = vrot.lane.b32.xlu2 %v7073_v45, %s9757_s6  ;;  %v2854_v45 = vld [vmem:[%s9826_s28] sm:$0xff] }
 0xa85   : > { %v7812_v14 = vpop.permute.xlu0 %5848  ;;  %v7849_v28 = vpop.permute.xlu1 %2768 }
 0xa86   : > { %9824 = vst [vmem:[#allocation41_spill] sm:$0xff] %v7812_v14 }
 0xa8a   : > { %2764 = vrot.lane.b32.xlu2 %v9825_v7, %s9757_s6 }
 0xa8d   : > { %v7820_v20 = vpop.permute.xlu0 %5863 }
 0xa92   : > { %2770 = vrot.lane.b32.xlu2 %v2201_v54, %s9757_s6  ;;  %v9838_v54 = vld [vmem:[#allocation24_spill] sm:$0xff] }
 0xa95   : > { %v7827_v21 = vpop.permute.xlu0 %5878 }
 0xa9a   : > { %2857 = vperm.xlu2 %5591, %v2854_v45   ;;  %v9839_v45 = vunpack.i.l.bf16 %v9838_v54 }
 0xa9d   : > { %v5889_v13 = vpop.permute.xlu0 %5888 }
 0xa9e   : > { %v5891_v4 = vunpack.i.h.bf16 %v5889_v13  ;;  %v5890_v30 = vunpack.i.l.bf16 %v5889_v13  ;;  %v9840_v13 = vld [vmem:[#allocation15_spill] sm:$0xff] }
 0xaa0   : > { %v2973_v48 = vpack.c.bf16 %v5891_v4, %v5890_v30  ;;  %v9841_v4 = vunpack.i.h.bf16 %v9840_v13  ;;  %v9842_v30 = vunpack.i.h.bf16 %v9831_v61  ;;  %v9846_v61 = vld [vmem:[#allocation39_spill] sm:$0xff] }
 0xaa2   : > { %5858 = vrot.lane.b32.xlu2 %v7675_v63, %s9748_s27  ;;  %3374 = vrot.lane.b32.xlu0 %v2973_v48, %s9827_s17  ;;  %v5826_v63 = vunpack.i.h.bf16 %v7488_v47  ;;  %v2324_v48 = vsel %vm864_vm5, %v5785_v43, %v9842_v30  ;;  %v9851_v30 = vunpack.i.h.bf16 %v7061_v49 }
 0xaa4   : > { %v2326_v7 = vsel %vm864_vm5, %v5826_v63, %v9837_v62  ;;  %v5800_v62 = vunpack.i.l.bf16 %v7388_v33 }
 0xaaa   : > { %5873 = vrot.lane.b32.xlu2 %v7684_v46, %s9746_s30  ;;  %2521 = vrot.lane.b32.xlu0 %v9828_v12, %s9757_s6  ;;  %v9830_v46 = vpack.c.bf16 %v7479_v23, %v9829_v3  ;;  %v2238_v23 = vsel %vm818_vm7, %v9841_v4, %v9839_v45  ;;  %v7878_v3 = vpop.permute.xlu1 %2774  ;;  %v9849_v45 = vunpack.i.l.bf16 %v7488_v47  ;;  %v9850_v4 = vld [vmem:[#allocation30_spill] sm:$0xff] }
 0xaab   : > { %v2436_v12 = vpack.c.bf16 %v2241_v0, %v2238_v23  ;;  %v9847_v0 = vpack.c.bf16 %v7553_v37, %v9846_v61  ;;  %v2398_v23 = vsel %vm903_vm4, %v5841_v44, %v9850_v4  ;;  %v9852_v37 = vunpack.i.h.bf16 %v7388_v33 }
 0xaac   : > { %v2325_v13 = vsel %vm864_vm5, %v9849_v45, %v5826_v63 }
 0xab2   : > { %2513 = vrot.lane.b32.xlu2 %v2433_v29, %s9757_s6  ;;  %2527 = vrot.lane.b32.xlu0 %v9830_v46, %s9757_s6  ;;  %v2449_v29 = vpack.c.bf16 %v2326_v7, %v2324_v48  ;;  %v7894_v7 = vpop.permute.xlu1 %5853  ;;  %v2323_v48 = vsel %vm864_vm5, %v9851_v30, %v5785_v43  ;;  %v9856_v43 = vunpack.i.l.bf16 %v7583_v32 }
 0xab3   : > { %9848 = vst [vmem:[#allocation32_spill] sm:$0xff] %v7894_v7 }
 0xab4   : > { %v7860_v27 = vpop.permute.xlu2 %2573  ;;  %v2397_v61 = vsel %vm903_vm4, %v9856_v43, %v5841_v44  ;;  %v5865_v43 = vunpack.i.l.bf16 %v7820_v20 }
 0xaba   : > { %2519 = vrot.lane.b32.xlu2 %v2436_v12, %s9757_s6  ;;  %2545 = vrot.lane.b32.xlu0 %v2449_v29, %s9757_s6  ;;  %v2396_v12 = vsel %vm903_vm4, %v5800_v62, %v9852_v37  ;;  %v2448_v29 = vpack.c.bf16 %v2325_v13, %v2323_v48  ;;  %v7913_v63 = vpop.permute.xlu1 %5868 }
 0xabb   : > { %v2461_v39 = vpack.c.bf16 %v2398_v23, %v2396_v12 }
 0xabc   : > { %v7882_v46 = vpop.permute.xlu2 %2579 }
 0xac2   : > { %2537 = vrot.lane.b32.xlu2 %v9845_v34, %s9757_s6  ;;  %2551 = vrot.lane.b32.xlu0 %v9847_v0, %s9757_s6  ;;  %v9854_v34 = vld [vmem:[#allocation19_spill] sm:$0xff]  ;;  %v9857_v0 = vunpack.i.h.bf16 %v7244_v36  ;;  %v5884_v13 = vpop.permute.xlu1 %5883 }
 0xac3   : > { %v9855_v49 = vpack.c.bf16 %v9853_v41, %v9854_v34  ;;  %v5886_v48 = vunpack.i.h.bf16 %v5884_v13  ;;  %v5885_v37 = vunpack.i.l.bf16 %v5884_v13 }
 0xac4   : > { %v7896_v54 = vpop.permute.xlu2 %2740  ;;  %v2395_v45 = vsel %vm903_vm4, %v9857_v0, %v5800_v62 }
 0xac5   : > { %v2460_v4 = vpack.c.bf16 %v2397_v61, %v2395_v45  ;;  %v5870_v61 = vunpack.i.l.bf16 %v7913_v63 }
 0xaca   : > { %2543 = vrot.lane.b32.xlu2 %v2448_v29, %s9757_s6  ;;  %2569 = vrot.lane.b32.xlu0 %v2461_v39, %s9757_s6  ;;  %v7936_v24 = vpop.permute.xlu1 %5893  ;;  %v2971_v39 = vpack.c.bf16 %v5886_v48, %v5885_v37 }
 0xacb   : > { %9858 = vst [vmem:[#allocation18_spill] sm:$0xff] %v7936_v24 }
 0xacc   : > { %v7911_v47 = vpop.permute.xlu2 %2746 }
 0xad2   : > { %2561 = vrot.lane.b32.xlu2 %v9855_v49, %s9757_s6  ;;  %2575 = vrot.lane.b32.xlu0 %v2464_v25, %s9757_s6  ;;  %v7948_v32 = vpop.permute.xlu1 %2529  ;;  %v9859_v25 = vld [vmem:[#allocation13_spill] sm:$0xff]  ;;  %v5866_v49 = vunpack.i.h.bf16 %v7820_v20 }
 0xad3   : > { %v5932_v44 = vpack.i.bf16 %v9859_v25, %v7390_v16 }
 0xad4   : > { %v7923_v33 = vpop.permute.xlu2 %2752 }
 0xada   : > { %2567 = vrot.lane.b32.xlu2 %v2460_v4, %s9757_s6  ;;  %5903 = vrot.lane.b32.xlu0 %v7783_v56, %s9748_s27  ;;  %v7959_v62 = vpop.permute.xlu1 %2535  ;;  %v2913_v4 = vsel %vm834_vm0, %v5865_v43, %v5866_v49 }
 0xadc   : > { %v7934_v23 = vpop.permute.xlu2 %2758 }
 0xae2   : > { %5898 = vrot.lane.b32.xlu2 %v7783_v56, %s9747_s8  ;;  %5913 = vrot.lane.b32.xlu0 %v7792_v42, %s9747_s8  ;;  %v7966_v29 = vpop.permute.xlu1 %2553 }
 0xae4   : > { %v7942_v36 = vpop.permute.xlu2 %2764 }
 0xaea   : > { %5923 = vrot.lane.b32.xlu2 %v7792_v42, %s9746_s30  ;;  %5928 = vrot.lane.b32.xlu0 %v7397_v6, %s9805_s22  ;;  %v9861_v42 = vld [vmem:[#allocation27_spill] sm:$0xff]  ;;  %v2560_v48 = vpop.permute.xlu1 %2559 }
 0xaeb   : > { %v5952_v30 = vpack.i.bf16 %v9861_v42, %v7680_v60  ;;  %v9686_v60 = vunpack.i.h.bf16 %v7913_v63  ;;  %v2599_v14 = vsel %vm1009_vm9, %v7702_v59, %v2560_v48  ;;  %v2204_v59 = vld [vmem:[%s9864_s25] sm:$0xff] }
 0xaec   : > { %v7950_v26 = vpop.permute.xlu2 %2770 }
 0xaed   : > { %v2926_v25 = vsel %vm1384_vm11, %v5870_v61, %v9686_v60 }
 0xaf2   : > { %5948 = vrot.lane.b32.xlu2 %v7397_v6, %s9804_s21  ;;  %5933 = vrot.lane.b32.xlu0 %v5932_v44, %s9752_s9 }
 0xaf4   : > { %v7957_v56 = vpop.permute.xlu2 %2857 }
 0xaf5   : > { %9860 = vst [vmem:[#allocation25_spill] sm:$0xff] %v7957_v56 }
 0xafa   : > { %5953 = vrot.lane.b32.xlu2 %v5952_v30, %s9752_s9  ;;  %5943 = vrot.lane.b32.xlu0 %v7397_v6, %s9749_s0 }
 0xafc   : > { %v5859_v12 = vpop.permute.xlu2 %5858 }
 0xafd   : > { %v5861_v41 = vunpack.i.h.bf16 %v5859_v12  ;;  %v5860_v34 = vunpack.i.l.bf16 %v5859_v12 }
 0xaff   : > { %v2912_v6 = vsel %vm834_vm0, %v5860_v34, %v5861_v41  ;;  %v2967_v12 = vpack.c.bf16 %v5866_v49, %v5861_v41  ;;  %v7996_v34 = vpop.permute.xlu1 %2577 }
 0xb00   : > { %v2966_v44 = vpack.c.bf16 %v2913_v4, %v2912_v6  ;;  %v9862_v6 = vld [vmem:[#allocation26_spill] sm:$0xff] }
 0xb02   : > { %3370 = vrot.lane.b32.xlu2 %v2971_v39, %s9827_s17  ;;  %v7991_v39 = vpack.i.bf16 %v9861_v42, %v7603_v2 }
 0xb04   : > { %v7973_v0 = vpop.permute.xlu2 %5873 }
 0xb05   : > { %v9685_v45 = vunpack.i.h.bf16 %v7973_v0  ;;  %v5875_v13 = vunpack.i.l.bf16 %v7973_v0 }
 0xb07   : > { %v2927_v20 = vsel %vm1384_vm11, %v5875_v13, %v9685_v45  ;;  %v5977_v13 = vpack.i.bf16 %v9862_v6, %v7603_v2  ;;  %v8011_v4 = vpop.permute.xlu1 %5908  ;;  %v9863_v2 = vld [vmem:[#allocation28_spill] sm:$0xff] }
 0xb08   : > { %v2968_v30 = vpack.c.bf16 %v2927_v20, %v2926_v25 }
 0xb0a   : > { %3360 = vrot.lane.b32.xlu2 %v2966_v44, %s9827_s17  ;;  %3364 = vrot.lane.b32.xlu0 %v2968_v30, %s9827_s17 }
 0xb0c   : > { %v7987_v37 = vpop.permute.xlu2 %2513 }
 0xb0f   : > { %v8017_v44 = vpop.permute.xlu1 %5918 }
 0xb12   : > { %5963 = vrot.lane.b32.xlu2 %v7991_v39, %s9748_s27  ;;  %3362 = vrot.lane.b32.xlu0 %v2967_v12, %s9827_s17 }
 0xb14   : > { %v7998_v43 = vpop.permute.xlu2 %2519  ;;  %v8000_v61 = vpop.permute.xlu0 %3374 }
 0xb17   : > { %v5939_v45 = vpop.permute.xlu1 %5938 }
 0xb18   : > { %v5941_v60 = vunpack.i.h.bf16 %v5939_v45  ;;  %v5940_v38 = vunpack.i.l.bf16 %v5939_v45 }
 0xb1a   : > { %5968 = vrot.lane.b32.xlu2 %v7991_v39, %s9746_s30  ;;  %5978 = vrot.lane.b32.xlu0 %v5977_v13, %s9748_s27  ;;  %v3163_v24 = vpack.c.bf16 %v5941_v60, %v5940_v38 }
 0xb1c   : > { %v8007_v41 = vpop.permute.xlu2 %2537  ;;  %v8009_v49 = vpop.permute.xlu0 %2521 }
 0xb22   : > { %5973 = vrot.lane.b32.xlu2 %v5977_v13, %s9747_s8  ;;  %5983 = vrot.lane.b32.xlu0 %v5977_v13, %s9746_s30 }
 0xb24   : > { %v2544_v25 = vpop.permute.xlu2 %2543  ;;  %v8015_v20 = vpop.permute.xlu0 %2527 }
 0xb2a   : > { %5998 = vrot.lane.b32.xlu2 %v9863_v2, %s9806_s15  ;;  %s9874_s15 = sld [smem:[#allocation49_spill]] }
 0xb2c   : > { %v2562_v30 = vpop.permute.xlu2 %2561  ;;  %v2546_v12 = vpop.permute.xlu0 %2545 }
 0xb2d   : > { %v2600_v38 = vsel %vm1009_vm9, %v2560_v48, %v2562_v30 }
 0xb32   : > { %6003 = vrot.lane.b32.xlu2 %v9863_v2, %s9749_s0 }
 0xb34   : > { %v2568_v42 = vpop.permute.xlu2 %2567  ;;  %v2552_v16 = vpop.permute.xlu0 %2551 }
 0xb35   : > { %v2602_v13 = vsel %vm1009_vm9, %v7715_v18, %v2568_v42  ;;  %v2596_v6 = vsel %vm1009_vm9, %v7834_v53, %v2552_v16  ;;  %v9865_v18 = vld [vmem:[#allocation37_spill] sm:$0xff]  ;;  %v2601_v53 = vsel %vm1009_vm9, %v2562_v30, %v7717_v10  ;;  %v2789_v10 = vsel %vm1009_vm9, %v7950_v26, %v7808_v22 }
 0xb36   : > { %2638 = vmatpush.bf16.msrb.mxu1 %v2602_v13  ;;  %v2597_v30 = vsel %vm1009_vm9, %v2552_v16, %v7966_v29  ;;  %v2607_v13 = vsel %vm1009_vm9, %v7996_v34, %v7882_v46  ;;  %v9866_v16 = vld [vmem:[#allocation33_spill] sm:$0xff] }
 0xb3a   : > { %2639 = vmatpush.bf16.msrb.mxu1 %v2599_v14  ;;  %3254 = vrot.lane.b32.xlu2 %v3163_v24, %s9827_s17  ;;  %v2593_v14 = vsel %vm1009_vm9, %v9865_v18, %v2544_v25  ;;  %v2469_v24 = vunpack.c.h.b16 %v2204_v59  ;;  %v9867_v18 = vld [vmem:[#allocation38_spill] sm:$0xff] }
 0xb3c   : > { %v8028_v7 = vpop.permute.xlu2 %5898  ;;  %v2570_v56 = vpop.permute.xlu0 %2569 }
 0xb3d   : > { %v2603_v45 = vsel %vm1009_vm9, %v2568_v42, %v2570_v56  ;;  %v2604_v40 = vsel %vm1009_vm9, %v2570_v56, %v7730_v1  ;;  %v2590_v42 = vsel %vm1009_vm9, %v7696_v52, %v7959_v62  ;;  %v2598_v52 = vsel %vm1009_vm9, %v7966_v29, %v7847_v9 }
 0xb3e   : > { %2640 = vmatpush.bf16.msrb.mxu1 %v2596_v6  ;;  %2664 = vmatpush.bf16.msrb.mxu3 %v2603_v45  ;;  %v8052_v6 = vpack.c.b16 %v2469_v24, %v2469_v24  ;;  %v2587_v9 = vsel %vm1009_vm9, %v9866_v16, %v8015_v20  ;;  %v2810_v29 = vsel %vm9696_vm8, %v2789_v10, 0  ;;  %v2594_v45 = vsel %vm1009_vm9, %v2544_v25, %v2546_v12  ;;  %v9868_v25 = vld [vmem:[#allocation23_spill] sm:$0xff]  ;;  %v9871_v16 = vld [vmem:[#allocation34_spill] sm:$0xff] }
 0xb3f   : > { %2690 = vmatpush.bf16.msra.mxu0 %v2604_v40  ;;  %v5911_v40 = vunpack.i.h.bf16 %v8011_v4  ;;  %v2786_v24 = vsel %vm1009_vm9, %v7839_v17, %v7942_v36  ;;  %v2591_v10 = vsel %vm1009_vm9, %v7959_v62, %v8007_v41  ;;  %v2589_v62 = vsel %vm1009_vm9, %v7948_v32, %v9871_v16  ;;  %v9873_v16 = vld [vmem:[#allocation17_spill] sm:$0xff] }
 0xb42   : > { %2641 = vmatpush.bf16.msrb.mxu1 %v2593_v14  ;;  %2665 = vmatpush.bf16.msrb.mxu3 %v2600_v38  ;;  %v2595_v14 = vsel %vm1009_vm9, %v2546_v12, %v9867_v18  ;;  %v2468_v12 = vunpack.c.l.b16 %v2204_v59  ;;  %v9869_v59 = vld [vmem:[#allocation20_spill] sm:$0xff]  ;;  %v2588_v18 = vsel %vm1009_vm9, %v8015_v20, %v7948_v32  ;;  %v2780_v32 = vsel %vm1009_vm9, %v7911_v47, %v7770_v55 }
 0xb43   : > { %2691 = vmatpush.bf16.msra.mxu0 %v2601_v53  ;;  %v5921_v53 = vunpack.i.h.bf16 %v8017_v44 }
 0xb44   : > { %v8043_v1 = vpop.permute.xlu2 %5923  ;;  %v2576_v56 = vpop.permute.xlu0 %2575 }
 0xb45   : > { %v5926_v60 = vunpack.i.h.bf16 %v8043_v1  ;;  %v2605_v48 = vsel %vm1009_vm9, %v7860_v27, %v2576_v56 }
 0xb46   : > { %2642 = vmatpush.bf16.msrb.mxu1 %v2590_v42  ;;  %2658 = vmatpush.bf16.msra.mxu2 %v2605_v48  ;;  %v2584_v48 = vsel %vm1009_vm9, %v9868_v25, %v7998_v43 }
 0xb47   : > { %v3152_v27 = vpack.c.bf16 %v5926_v60, %v5911_v40  ;;  %2666 = vmatpush.bf16.msrb.mxu3 %v2597_v30  ;;  %2692 = vmatpush.bf16.msra.mxu0 %v2598_v52  ;;  %v2592_v30 = vsel %vm1009_vm9, %v8007_v41, %v7699_v57  ;;  %v2783_v57 = vsel %vm1009_vm9, %v7778_v5, %v7832_v11 }
 0xb48   : > { %v2470_v41 = vpack.c.b16 %v2468_v12, %v2468_v12 }
 0xb49   : > { %5275 = vmatmul.msk.bf16.vlgmr.msra.gmra.mxu2 %vm9695_vm12, %v8052_v6  ;;  %3232 = vrot.lane.b32.xlu0 %v3152_v27, %s9827_s17  ;;  %v9870_v27 = vld [vmem:[#allocation16_spill] sm:$0xff] }
 0xb4a   : > { %2710 = vmatpush.bf16.msrb.mxu2 %v2607_v13  ;;  %2643 = vmatpush.bf16.msrb.mxu1 %v2587_v9  ;;  %v2581_v13 = vsel %vm1009_vm9, %v9870_v27, %v9869_v59  ;;  %v2788_v9 = vsel %vm1009_vm9, %v7849_v28, %v7950_v26  ;;  %v2790_v28 = vsel %vm1009_vm9, %v7808_v22, %v7878_v3  ;;  %v9872_v3 = vld [vmem:[#allocation31_spill] sm:$0xff]  ;;  %v5925_v27 = vunpack.i.l.bf16 %v8043_v1 }
 0xb4b   : > { %2667 = vmatpush.bf16.msrb.mxu3 %v2594_v45  ;;  %2693 = vmatpush.bf16.msra.mxu0 %v2595_v14  ;;  %v5900_v45 = vunpack.i.l.bf16 %v8028_v7  ;;  %v2606_v14 = vsel %vm1009_vm9, %v2576_v56, %v7996_v34  ;;  %v2807_v34 = vsel %vm9696_vm8, %v2788_v9, 0  ;;  %v2585_v22 = vsel %vm1009_vm9, %v7998_v43, %v8009_v49 }
 0xb4c   : > { %v8079_v46 = vpop.permute.xlu2 %5948  ;;  %v8081_v38 = vpop.permute.xlu0 %5903  ;;  %v2586_v56 = vsel %vm1009_vm9, %v8009_v49, %v9872_v3  ;;  %v2785_v43 = vsel %vm1009_vm9, %v7788_v19, %v7839_v17  ;;  %v2813_v49 = vsel %vm9696_vm8, %v2790_v28, 0  ;;  %v5880_v9 = vunpack.i.l.bf16 %v7827_v21 }
 0xb4d   : > { %v5906_v42 = vunpack.i.h.bf16 %v8081_v38  ;;  %v2777_v19 = vsel %vm1009_vm9, %v7806_v35, %v7896_v54 }
 0xb4e   : > { %2831 = vmatpush.bf16.msra.mxu2 %v2810_v29  ;;  %2644 = vmatpush.bf16.msrb.mxu1 %v2584_v48  ;;  %v5901_v29 = vunpack.i.h.bf16 %v8028_v7 }
 0xb4f   : > { %v3148_v52 = vpack.c.bf16 %v5921_v53, %v5906_v42  ;;  %2668 = vmatpush.bf16.msrb.mxu3 %v2591_v10  ;;  %2694 = vmatpush.bf16.msra.mxu0 %v2592_v30 }
 0xb51   : > { %3224 = vrot.lane.b32.xlu0 %v3148_v52, %s9827_s17 }
 0xb52   : > { %2832 = vmatpush.bf16.msra.mxu2 %v2786_v24  ;;  %2645 = vmatpush.bf16.msrb.mxu1 %v2581_v13  ;;  %v5766_v24 = vunpack.i.h.bf16 %v7449_v58  ;;  %v8133_v58 = vsel %vm818_vm7, %v5900_v45, %v5901_v29  ;;  %v2582_v13 = vsel %vm1009_vm9, %v9869_v59, %v7987_v37  ;;  %v2782_v59 = vsel %vm1009_vm9, %v7923_v33, %v7778_v5 }
 0xb53   : > { %2669 = vmatpush.bf16.msrb.mxu3 %v2588_v18  ;;  %2695 = vmatpush.bf16.msra.mxu0 %v2589_v62  ;;  %v2583_v62 = vsel %vm1009_vm9, %v7987_v37, %v9873_v16  ;;  %v3068_v37 = vsel %vm1384_vm11, %v5925_v27, %v5926_v60  ;;  %v2787_v18 = vsel %vm1009_vm9, %v7942_v36, %v7800_v31  ;;  %v5905_v60 = vunpack.i.l.bf16 %v8081_v38 }
 0xb54   : > { %v8125_v26 = vpop.permute.xlu2 %5953  ;;  %v5914_v7 = vpop.permute.xlu0 %5913  ;;  %v2779_v5 = vsel %vm1009_vm9, %v7814_v15, %v7911_v47  ;;  %v5920_v33 = vunpack.i.l.bf16 %v8017_v44  ;;  %v2784_v31 = vsel %vm1009_vm9, %v7832_v11, %v7934_v23  ;;  %v2776_v15 = vsel %vm1009_vm9, %v7732_v51, %v7806_v35  ;;  %v2070_v47 = vld [vmem:[%s9874_s15] sm:$0xf] }
 0xb55   : > { %v5955_v20 = vunpack.i.l.bf16 %v8125_v26  ;;  %v5916_v25 = vunpack.i.h.bf16 %v5914_v7  ;;  %v5915_v48 = vunpack.i.l.bf16 %v5914_v7  ;;  %2646 = vmatmul.bf16.vlgmr.msrb.gmra.mxu1 %v2470_v41  ;;  %v9875_v23 = vunpack.i.h.bf16 %v7913_v63 }
 0xb56   : > { %2833 = vmatpush.bf16.msra.mxu2 %v2783_v57  ;;  %2684 = vmatpush.bf16.msra.mxu1 %v2606_v14  ;;  %v5881_v57 = vunpack.i.h.bf16 %v7827_v21  ;;  %v3040_v11 = vsel %vm834_vm0, %v5920_v33, %v5921_v53  ;;  %v2778_v35 = vsel %vm1009_vm9, %v7896_v54, %v7746_v8  ;;  %v9879_v54 = vld [vmem:[#allocation22_spill] sm:$0xff] }
 0xb57   : > { %v2972_v12 = vpack.c.bf16 %v5955_v20, %v5766_v24  ;;  %v3144_v10 = vpack.c.bf16 %v5916_v25, %v5901_v29  ;;  %v8142_v30 = vsel %vm818_vm7, %v5915_v48, %v5916_v25  ;;  %2670 = vmatpush.bf16.msrb.mxu3 %v2585_v22  ;;  %2696 = vmatpush.bf16.msra.mxu0 %v2586_v56  ;;  %v5910_v29 = vunpack.i.l.bf16 %v8011_v4 }
 0xb58   : > { %v3143_v52 = vpack.c.bf16 %v8142_v30, %v8133_v58  ;;  %v2970_v21 = vpack.c.bf16 %v5881_v57, %v5880_v9  ;;  %v3039_v4 = vsel %vm834_vm0, %v5905_v60, %v5906_v42  ;;  %v9880_v42 = vld [vmem:[#allocation26_spill] sm:$0xff] }
 0xb59   : > { %3372 = vrot.lane.b32.xlu1 %v2972_v12, %s9827_s17  ;;  %5277 = vmatmul.msk.bf16.vlgmr.msrb.gmra.mxu2 %vm9695_vm12, %v8052_v6  ;;  %v3067_v45 = vsel %vm1384_vm11, %v5910_v29, %v5911_v40  ;;  %v9876_v40 = vunpack.i.h.bf16 %v7973_v0  ;;  %v3147_v51 = vpack.c.bf16 %v3040_v11, %v3039_v4 }
 0xb5a   : > { %2818 = vmatpush.bf16.msrb.mxu1 %v2807_v34  ;;  %2834 = vmatpush.bf16.msra.mxu2 %v2780_v32  ;;  %v3151_v1 = vpack.c.bf16 %v3068_v37, %v3067_v45 }
 0xb5b   : > { %3216 = vrot.lane.b32.xlu2 %v3144_v10, %s9827_s17  ;;  %2671 = vmatpush.bf16.msrb.mxu3 %v2582_v13  ;;  %v2969_v38 = vpack.c.bf16 %v9876_v40, %v9875_v23 }
 0xb5c   : > { %2697 = vmatpush.bf16.msra.mxu0 %v2583_v62  ;;  %v5929_v17 = vpop.permute.xlu0 %5928 }
 0xb5d   : > { %v5930_v24 = vunpack.i.l.bf16 %v5929_v17 }
 0xb5e   : > { %2819 = vmatpush.bf16.msrb.mxu1 %v2785_v43  ;;  %2835 = vmatpush.bf16.msra.mxu2 %v2777_v19 }
 0xb5f   : > { %2844 = vmatpush.bf16.msra.mxu3 %v2813_v49  ;;  %2698 = vmatmul.bf16.vlgmr.msra.gmra.mxu0 %v2470_v41 }
 0xb60   : > { %2672 = vmatmul.bf16.vlgmr.msrb.gmra.mxu3 %v2470_v41 }
 0xb61   : > { %3368 = vrot.lane.b32.xlu1 %v2970_v21, %s9827_s17 }
 0xb62   : > { %2820 = vmatpush.bf16.msrb.mxu1 %v2782_v59 }
 0xb63   : > { %2845 = vmatpush.bf16.msra.mxu3 %v2787_v18  ;;  %3230 = vrot.lane.b32.xlu2 %v3151_v1, %s9827_s17 }
 0xb64   : > { %v8189_v36 = vpop.permute.xlu0 %5933 }
 0xb65   : > { %5276 = vmatmul.msk.bf16.vlgmr.msra.gmra.mxu1 %vm9695_vm12, %v8052_v6  ;;  %v2781_v6 = vsel %vm1009_vm9, %v7770_v55, %v7824_v50  ;;  %v3371_v55 = vpop.permute.xlu2 %3370 }
 0xb66   : > { %2821 = vmatpush.bf16.msrb.mxu1 %v2779_v5 }
 0xb67   : > { %2846 = vmatpush.bf16.msra.mxu3 %v2784_v31 }
 0xb69   : > { %5279 = vmatmul.msk.bf16.vlgmr.msra.gmra.mxu2 %vm9877_vm10, %v2070_v47  ;;  %3366 = vrot.lane.b32.xlu1 %v2969_v38, %s9827_s17 }
 0xb6a   : > { %2822 = vmatpush.bf16.msrb.mxu1 %v2776_v15 }
 0xb6b   : > { %2847 = vmatpush.bf16.msra.mxu3 %v2781_v6  ;;  %3222 = vrot.lane.b32.xlu2 %v3147_v51, %s9827_s17  ;;  %v9884_v6 = vld [vmem:[#allocation25_spill] sm:$0xff] }
 0xb6c   : > { %v5944_v63 = vpop.permute.xlu0 %5943 }
 0xb6d   : > { %v5946_v0 = vunpack.i.h.bf16 %v5944_v63  ;;  %v5945_v44 = vunpack.i.l.bf16 %v5944_v63  ;;  %v3361_v8 = vpop.permute.xlu2 %3360 }
 0xb6f   : > { %2848 = vmatpush.bf16.msra.mxu3 %v2778_v35  ;;  %v3157_v53 = vpack.c.bf16 %v5946_v0, %v5945_v44 }
 0xb71   : > { %5958 = vrot.lane.b32.xlu1 %v7991_v39, %s9747_s8  ;;  %3242 = vrot.lane.b32.xlu0 %v3157_v53, %s9827_s17  ;;  %v5931_v39 = vunpack.i.h.bf16 %v5929_v17 }
 0xb72   : > { %5280 = vmatmul.msk.bf16.vlgmr.msra.gmra.mxu3 %vm9878_vm14, %v2070_v47  ;;  %vm9882_vm14 = vcmask 89088  }
 0xb73   : > { %3394 = vmatpush.bf16.msrb.mxu3 %v8000_v61  ;;  %v9881_v61 = vpack.i.bf16 %v9879_v54, %v9880_v42  ;;  %v3161_v7 = vpack.c.bf16 %v5931_v39, %v5930_v24  ;;  %v5956_v24 = vunpack.i.h.bf16 %v8125_v26 }
 0xb75   : > { %5278 = vmatmul.msk.bf16.vlgmr.msrb.gmra.mxu1 %vm9877_vm10, %v2070_v47  ;;  %v8230_v14 = vpop.permute.xlu2 %5963  ;;  %v2866_v47 = vld [vmem:[%s9571_s19] sm:$0x7]  ;;  %vm9886_vm10 = vcmask 556032  }
 0xb76   : > { %v2869_v35 = vperm.slane %v2866_v47, 1 }
 0xb79   : > { %5988 = vrot.lane.b32.xlu1 %v9863_v2, %s9805_s22 }
 0xb7c   : > { %v3365_v50 = vpop.permute.xlu0 %3364 }
 0xb7d   : > { %v5969_v32 = vpop.permute.xlu2 %5968 }
 0xb7e   : > { %v5971_v20 = vunpack.i.h.bf16 %v5969_v32  ;;  %v5970_v25 = vunpack.i.l.bf16 %v5969_v32 }
 0xb80   : > { %v8238_v3 = vsel %vm1384_vm11, %v5970_v25, %v5971_v20 }
 0xb81   : > { %5993 = vrot.lane.b32.xlu1 %v9881_v61, %s9752_s9 }
 0xb84   : > { %v3363_v41 = vpop.permute.xlu0 %3362 }
 0xb85   : > { %v8250_v18 = vpop.permute.xlu2 %5973 }
 0xb86   : > { %v5975_v30 = vunpack.i.l.bf16 %v8250_v18 }
 0xb89   : > { %6008 = vrot.lane.b32.xlu1 %v9863_v2, %s9804_s21 }
 0xb8c   : > { %v8234_v28 = vpop.permute.xlu0 %5978 }
 0xb8d   : > { %v5999_v40 = vpop.permute.xlu2 %5998 }
 0xb8e   : > { %v6001_v44 = vunpack.i.h.bf16 %v5999_v40  ;;  %v6000_v53 = vunpack.i.l.bf16 %v5999_v40 }
 0xb91   : > { %3250 = vrot.lane.b32.xlu1 %v3161_v7, %s9827_s17  ;;  %v5935_v7 = vunpack.i.l.bf16 %v8189_v36 }
 0xb94   : > { %v5984_v48 = vpop.permute.xlu0 %5983 }
 0xb95   : > { %v5986_v34 = vunpack.i.h.bf16 %v5984_v48  ;;  %v5985_v22 = vunpack.i.l.bf16 %v5984_v48 }
 0xb97   : > { %v3154_v56 = vpack.c.bf16 %v5986_v34, %v5971_v20  ;;  %v8241_v12 = vsel %vm1384_vm11, %v5985_v22, %v5986_v34  ;;  %vm9883_vm11 = vmmov %vm9882_vm14  ;;  %v2870_v34 = vperm.slane %v2866_v47, 2 }
 0xb98   : > { %v3153_v2 = vpack.c.bf16 %v8241_v12, %v8238_v3  ;;  %v3380_v19 = vsel %vm9883_vm11, %v3361_v8, %v3363_v41  ;;  %v3422_v12 = vld [vmem:[%s9564_s12] sm:$0xff] }
 0xb99   : > { %3236 = vrot.lane.b32.xlu2 %v3154_v56, %s9827_s17  ;;  %v2868_v56 = vperm.slane %v2866_v47, 0 }
 0xbcb   : > { %v3373_v10 = vpop.permute.xlu1 %3372 }
 0xbcc   : > { %v2660_v27 = vpop.f32.mrf.mxu2  ;;  %3395 = vmatpush.bf16.msrb.mxu3 %v3373_v10  ;;  %v3164_v10 = vpack.c.bf16 %v6001_v44, %v6000_v53 }
 0xbd0   : > { %3396 = vmatpush.bf16.msrb.mxu3 %v3371_v55 }
 0xbd2   : > { %v2647_v43 = vpop.f32.mrf.mxu1 }
 0xbd3   : > { %v3369_v49 = vpop.permute.xlu1 %3368  ;;  %v2661_v38 = vadd.f32 %v2660_v27, %v2647_v43 }
 0xbd4   : > { %v2662_v13 = vpop.f32.mrf.mxu2  ;;  %3397 = vmatpush.bf16.msrb.mxu3 %v3369_v49 }
 0xbda   : > { %v2649_v16 = vpop.f32.mrf.mxu1 }
 0xbdb   : > { %v3367_v62 = vpop.permute.xlu1 %3366 }
 0xbdc   : > { %v2712_v57 = vpop.f32.mrf.mxu2  ;;  %v3381_v9 = vsel %vm9882_vm14, %v3365_v50, %v3367_v62  ;;  %v2699_v29 = vpop.f32.mrf.mxu0  ;;  %vm3284_vm14 = vcmask 261120  }
 0xbdd   : > { %3398 = vmatpush.bf16.msrb.mxu3 %v3381_v9  ;;  %v2713_v63 = vadd.f32 %v2712_v57, %v2699_v29  ;;  %v9885_v29 = vld [vmem:[#allocation32_spill] sm:$0xff] }
 0xbe1   : > { %3399 = vmatpush.bf16.msrb.mxu3 %v3380_v19  ;;  %v5856_v19 = vunpack.i.h.bf16 %v9885_v29 }
 0xbe2   : > { %v2686_v37 = vpop.f32.mrf.mxu1 }
 0xbe3   : > { %v2673_v17 = vpop.f32.mrf.mxu3  ;;  %v8248_v59 = vpop.permute.xlu1 %5958 }
 0xbe4   : > { %v2714_v21 = vpop.f32.mrf.mxu2  ;;  %v2701_v45 = vpop.f32.mrf.mxu0  ;;  %v2687_v1 = vadd.f32 %v2686_v37, %v2673_v17  ;;  %v5961_v62 = vunpack.i.h.bf16 %v8248_v59  ;;  %v5976_v17 = vunpack.i.h.bf16 %v8250_v18  ;;  %v9887_v37 = vld [vmem:[#allocation41_spill] sm:$0xff]  ;;  %v5960_v58 = vunpack.i.l.bf16 %v8248_v59 }
 0xbe5   : > { %v5851_v21 = vunpack.i.h.bf16 %v9887_v37  ;;  %v5855_v18 = vunpack.i.l.bf16 %v9885_v29  ;;  %v5850_v53 = vunpack.i.l.bf16 %v9887_v37 }
 0xbe6   : > { %v3146_v45 = vpack.c.bf16 %v5976_v17, %v5961_v62 }
 0xbea   : > { %v2688_v5 = vpop.f32.mrf.mxu1 }
 0xbeb   : > { %v2675_v60 = vpop.f32.mrf.mxu3  ;;  %v5989_v33 = vpop.permute.xlu1 %5988  ;;  %v5980_v5 = vunpack.i.l.bf16 %v8234_v28 }
 0xbec   : > { %v5991_v31 = vunpack.i.h.bf16 %v5989_v33  ;;  %v5990_v4 = vunpack.i.l.bf16 %v5989_v33  ;;  %v2837_v15 = vpop.f32.mrf.mxu2  ;;  %v5981_v60 = vunpack.i.h.bf16 %v8234_v28 }
 0xbed   : > { %v2838_v11 = vadd.f32 %v2837_v15, %v2687_v1  ;;  %v2965_v1 = vpack.c.bf16 %v5856_v19, %v5851_v21 }
 0xbee   : > { %v3162_v23 = vpack.c.bf16 %v5991_v31, %v5990_v4  ;;  %v5966_v31 = vunpack.i.h.bf16 %v8230_v14  ;;  %v5965_v4 = vunpack.i.l.bf16 %v8230_v14  ;;  %v3042_v15 = vsel %vm834_vm0, %v5980_v5, %v5981_v60 }
 0xbef   : > { %v2861_v51 = vadd.f32 %v9884_v6, %v2838_v11 }
 0xbf0   : > { %3252 = vrot.lane.b32.xlu0 %v3162_v23, %s9827_s17  ;;  %v3041_v28 = vsel %vm834_vm0, %v5965_v4, %v5966_v31  ;;  %v3150_v23 = vpack.c.bf16 %v5981_v60, %v5966_v31 }
 0xbf1   : > { %v2864_v0 = vmax.f32 %v2861_v51, 0.0  ;;  %v3149_v40 = vpack.c.bf16 %v3042_v15, %v3041_v28  ;;  %v3013_v51 = vsel %vm818_vm7, %v5960_v58, %v5961_v62  ;;  %v5291_v58 = vld [vmem:[%s9563_s11 + $0x8] sm:$0xf] }
 0xbf2   : > { %v2824_v8 = vpop.f32.mrf.mxu1 }
 0xbf3   : > { %v8257_v50 = vmul.f32 %v2869_v35, %v2864_v0  ;;  %v2825_v41 = vadd.f32 %v2824_v8, %v2661_v38  ;;  %v5994_v39 = vpop.permute.xlu1 %5993  ;;  %v6004_v38 = vpop.permute.xlu2 %6003  ;;  %v8291_v35 = vld [vmem:[#allocation2] sm:$0xff]  ;;  %v3014_v0 = vsel %vm818_vm7, %v5975_v30, %v5976_v17  ;;  %v9888_v8 = vld [vmem:[#allocation18_spill] sm:$0xff]  ;;  %v5448_v30 = vld [vmem:[%s9563_s11 + $0x10] sm:$0xf0] }
 0xbf4   : > { %v5996_v32 = vunpack.i.h.bf16 %v5994_v39  ;;  %v5995_v20 = vunpack.i.l.bf16 %v5994_v39  ;;  %v2839_v25 = vpop.f32.mrf.mxu2  ;;  %v6005_v14 = vunpack.i.l.bf16 %v6004_v38  ;;  %v3145_v44 = vpack.c.bf16 %v3014_v0, %v3013_v51  ;;  %v8362_v17 = vpop.permute.xlu0 %3232 }
 0xbf5   : > { %v2850_v55 = vpop.f32.mrf.mxu3  ;;  %v2860_v22 = vadd.f32 %v9884_v6, %v2825_v41  ;;  %v5895_v41 = vunpack.i.l.bf16 %v9888_v8  ;;  %v2898_v39 = vsel %vm818_vm7, %v5850_v53, %v5851_v21  ;;  %v5298_v53 = vld [vmem:[%s9562_s10 + $0x8] sm:$0xf0] }
 0xbf6   : > { %v2851_v61 = vadd.f32 %v2850_v55, %v2713_v63  ;;  %v3159_v27 = vpack.c.bf16 %v5935_v7, %v5996_v32  ;;  %v3160_v43 = vpack.c.bf16 %v5995_v20, %v5956_v24  ;;  %v3141_v63 = vpack.c.bf16 %v8291_v35, %v8291_v35  ;;  %v9889_v32 = vld [vmem:[#allocation21_spill] sm:$0xff]  ;;  %v8322_v20 = vld [vmem:[#allocation2 + $0x8] sm:$0xff] }
 0xbf7   : > { %v2863_v13 = vmax.f32 %v2860_v22, 0.0  ;;  %v2899_v55 = vsel %vm818_vm7, %v5855_v18, %v5856_v19  ;;  %v9890_v3 = vpack.c.bf16 %v9889_v32, %v9879_v54  ;;  %v6012_v25 = vpack.i.bf16 %v8322_v20, %v8291_v35  ;;  %v9891_v54 = vld [vmem:[#allocation27_spill] sm:$0xff]  ;;  %v8333_v22 = vld [vmem:[#allocation2 + $0x18] sm:$0xff] }
 0xbf8   : > { %v2862_v48 = vadd.f32 %v9884_v6, %v2851_v61  ;;  %3246 = vrot.lane.b32.xlu1 %v3159_v27, %s9827_s17  ;;  %3256 = vrot.lane.b32.xlu0 %v3164_v10, %s9827_s17  ;;  %v5896_v61 = vunpack.i.h.bf16 %v9888_v8  ;;  %v2964_v24 = vpack.c.bf16 %v2899_v55, %v2898_v39  ;;  %v6335_v10 = vld [vmem:[#allocation4 + $0x8] sm:$0xff]  ;;  %v6336_v27 = vld [vmem:[#allocation4 + $0x18] sm:$0xff]  ;;  %v5444_v18 = vld [vmem:[%s9562_s10 + $0x4] sm:$0xf] }
 0xbf9   : > { %v8265_v16 = vmul.f32 %v2868_v56, %v2863_v13  ;;  %3248 = vrot.lane.b32.xlu2 %v3160_v43, %s9827_s17  ;;  %v2963_v43 = vpack.c.bf16 %v6336_v27, %v6335_v10  ;;  %v5950_v13 = vunpack.i.l.bf16 %v8079_v46  ;;  %v5301_v55 = vor.u32 %v5444_v18, %v5298_v53 }
 0xbfa   : > { %v2865_v49 = vmax.f32 %v2862_v48, 0.0  ;;  %v2826_v9 = vpop.f32.mrf.mxu1  ;;  %v2974_v7 = vpack.c.bf16 %v5896_v61, %v5895_v41  ;;  %v9892_v48 = vpack.c.bf16 %v9880_v42, %v9891_v54  ;;  %v5951_v42 = vunpack.i.h.bf16 %v8079_v46 }
 0xbfb   : > { %v6009_v33 = vpop.permute.xlu1 %6008 }
 0xbfc   : > { %v2876_v26 = vmul.f32 %v2870_v34, %v2865_v49  ;;  %v6011_v47 = vunpack.i.h.bf16 %v6009_v33  ;;  %v6010_v11 = vunpack.i.l.bf16 %v6009_v33  ;;  %v8331_v34 = vld [vmem:[#allocation2 + $0x10] sm:$0xff]  ;;  %v8370_v21 = vpop.permute.xlu0 %3224  ;;  %v6122_v33 = vpack.i.bf16 %v8265_v16, %v8291_v35 }
 0xbfd   : > { %v2852_v57 = vpop.f32.mrf.mxu3  ;;  %v6017_v56 = vpack.i.bf16 %v8333_v22, %v8331_v34  ;;  %v6062_v9 = vpack.i.bf16 %v8331_v34, %v8322_v20 }
 0xbfe   : > { %2879 = vst.msk [vmem:[#allocation8 + $0x18] sm:$0xff] %vm9886_vm10, %v2876_v26  ;;  %v3156_v6 = vpack.c.bf16 %v6011_v47, %v6010_v11  ;;  %v3155_v26 = vpack.c.bf16 %v5951_v42, %v5950_v13  ;;  %v3423_v57 = vld [vmem:[%s9564_s12 + $0x8] sm:$0xff]  ;;  %vm9893_vm10 = vmmov %vm9883_vm11 }
 0xbff   : > { %vm9897_vm8 = vmmov %vm9893_vm10  ;;  %v5445_v42 = vld [vmem:[%s9562_s10 + $0x4] sm:$0xf0] }
 0xc00   : > { %3214 = vrot.lane.b32.xlu1 %v3143_v52, %s9827_s17  ;;  %3220 = vrot.lane.b32.xlu0 %v3146_v45, %s9827_s17  ;;  %v6006_v52 = vunpack.i.h.bf16 %v6004_v38 }
 0xc01   : > { %3358 = vrot.lane.b32.xlu2 %v2965_v1, %s9827_s17  ;;  %v6097_v1 = vpack.i.bf16 %v8265_v16, %v8333_v22 }
 0xc02   : > { %v3158_v59 = vpack.c.bf16 %v6006_v52, %v6005_v14  ;;  %v5292_v52 = vor.u32 %v5448_v30, %v5291_v58 }
 0xc03   : > { %v3251_v31 = vpop.permute.xlu1 %3250 }
 0xc04   : > { %v3243_v60 = vpop.permute.xlu0 %3242 }
 0xc05   : > { %v8358_v29 = vld [vmem:[#allocation8 + $0x18] sm:$0xff] }
 0xc06   : > { %v6067_v19 = vpack.i.bf16 %v8358_v29, %v8257_v50 }
 0xc08   : > { %3228 = vrot.lane.b32.xlu1 %v3150_v23, %s9827_s17  ;;  %3226 = vrot.lane.b32.xlu0 %v3149_v40, %s9827_s17  ;;  %v6132_v23 = vpack.i.bf16 %v8257_v50, %v8265_v16 }
 0xc09   : > { %3240 = vrot.lane.b32.xlu2 %v3156_v6, %s9827_s17 }
 0xc10   : > { %3244 = vrot.lane.b32.xlu1 %v3158_v59, %s9827_s17  ;;  %3210 = vrot.lane.b32.xlu0 %v3141_v63, %s9827_s17 }
 0xc11   : > { %3218 = vrot.lane.b32.xlu2 %v3145_v44, %s9827_s17 }
 0xc18   : > { %3234 = vrot.lane.b32.xlu1 %v3153_v2, %s9827_s17  ;;  %3352 = vrot.lane.b32.xlu0 %v3141_v63, %s9827_s17  ;;  %v8320_v2 = vpop.permute.xlu2 %3254 }
 0xc19   : > { %3206 = vrot.lane.b32.xlu2 %v3141_v63, %s9827_s17 }
 0xc20   : > { %3208 = vrot.lane.b32.xlu0 %v9890_v3, %s9827_s17  ;;  %3356 = vrot.lane.b32.xlu1 %v2964_v24, %s9827_s17  ;;  %v8337_v49 = vpop.permute.xlu2 %3216 }
 0xc21   : > { %3376 = vrot.lane.b32.xlu2 %v2974_v7, %s9827_s17 }
 0xc28   : > { %3426 = vperm.xlu0 %5554, %v3422_v12   ;;  %3212 = vrot.lane.b32.xlu1 %v9892_v48, %s9827_s17  ;;  %v8346_v62 = vpop.permute.xlu2 %3230 }
 0xc29   : > { %6013 = vrot.lane.b32.xlu2 %v6012_v25, %s9747_s8  ;;  %v3264_v24 = vsel %vm9893_vm10, %v8346_v62, %v8362_v17  ;;  %v5283_v17 = vld [vmem:[%s9563_s11] sm:$0xf] }
 0xc30   : > { %6018 = vrot.lane.b32.xlu0 %v6017_v56, %s9747_s8  ;;  %3354 = vrot.lane.b32.xlu1 %v2963_v43, %s9827_s17  ;;  %v8356_v46 = vpop.permute.xlu2 %3222  ;;  %v5296_v43 = vld [vmem:[%s9562_s10] sm:$0xf] }
 0xc31   : > { %6028 = vrot.lane.b32.xlu2 %v6017_v56, %s9748_s27 }
 0xc38   : > { %6033 = vrot.lane.b32.xlu0 %v6012_v25, %s9750_s1  ;;  %3238 = vrot.lane.b32.xlu1 %v3155_v26, %s9827_s17  ;;  %v3237_v37 = vpop.permute.xlu2 %3236  ;;  %s9954_s17 = sld [smem:[#allocation58_spill]] }
 0xc39   : > { %6043 = vrot.lane.b32.xlu2 %v6017_v56, %s9751_s3 }
 0xc40   : > { %6048 = vrot.lane.b32.xlu0 %v6017_v56, %s9752_s9  ;;  %3431 = vperm.xlu1 %5580, %v3423_v57  }
 0xc41   : > { %6063 = vrot.lane.b32.xlu2 %v6062_v9, %s9755_s26 }
 0xc48   : > { %6058 = vrot.lane.b32.xlu0 %v6062_v9, %s9753_s5  ;;  %6023 = vrot.lane.b32.xlu1 %v6012_v25, %s9748_s27 }
 0xc49   : > { %6068 = vrot.lane.b32.xlu2 %v6067_v19, %s9747_s8 }
 0xc50   : > { %6078 = vrot.lane.b32.xlu0 %v6067_v19, %s9750_s1  ;;  %6038 = vrot.lane.b32.xlu1 %v6017_v56, %s9750_s1 }
 0xc51   : > { %6083 = vrot.lane.b32.xlu2 %v6067_v19, %s9754_s7 }
 0xc53   : > { %v3249_v45 = vpop.permute.xlu2 %3248 }
 0xc58   : > { %6088 = vrot.lane.b32.xlu0 %v6067_v19, %s9753_s5  ;;  %6053 = vrot.lane.b32.xlu1 %v6062_v9, %s9754_s7 }
 0xc59   : > { %6098 = vrot.lane.b32.xlu2 %v6097_v1, %s9754_s7 }
 0xc5b   : > { %v3359_v5 = vpop.permute.xlu2 %3358 }
 0xc60   : > { %6108 = vrot.lane.b32.xlu0 %v6097_v1, %s9755_s26  ;;  %6073 = vrot.lane.b32.xlu1 %v6067_v19, %s9748_s27 }
 0xc61   : > { %6123 = vrot.lane.b32.xlu2 %v6122_v33, %s9750_s1 }
 0xc62   : > { %v3253_v4 = vpop.permute.xlu0 %3252 }
 0xc63   : > { %v3241_v15 = vpop.permute.xlu2 %3240  ;;  %3302 = vmatpush.bf16.msra.mxu1 %v3253_v4 }
 0xc67   : > { %3303 = vmatpush.bf16.msra.mxu1 %v3251_v31  ;;  %v5285_v31 = vld [vmem:[%s9563_s11 + $0xc] sm:$0xf0] }
 0xc68   : > { %6118 = vrot.lane.b32.xlu0 %v6122_v33, %s9748_s27  ;;  %6093 = vrot.lane.b32.xlu1 %v6067_v19, %s9755_s26 }
 0xc6a   : > { %v3247_v47 = vpop.permute.xlu1 %3246  ;;  %v3257_v11 = vpop.permute.xlu0 %3256 }
 0xc6b   : > { %v3219_v28 = vpop.permute.xlu2 %3218  ;;  %3304 = vmatpush.bf16.msra.mxu1 %v3249_v45  ;;  %3322 = vmatpush.bf16.msrb.mxu2 %v3257_v11 }
 0xc6f   : > { %3305 = vmatpush.bf16.msra.mxu1 %v3247_v47  ;;  %3323 = vmatpush.bf16.msrb.mxu2 %v8320_v2 }
 0xc70   : > { %6133 = vrot.lane.b32.xlu0 %v6132_v23, %s9752_s9  ;;  %6103 = vrot.lane.b32.xlu1 %v6097_v1, %s9753_s5 }
 0xc72   : > { %v3215_v40 = vpop.permute.xlu1 %3214  ;;  %v3221_v38 = vpop.permute.xlu0 %3220  ;;  %5293 = vmatmul.msk.bf16.vlgmr.msrb.gmra.mxu2 %vm3284_vm14, %v5292_v52  ;;  %vm9894_vm14 = vmmov %vm9893_vm10 }
 0xc73   : > { %v8389_v6 = vpop.permute.xlu2 %3206  ;;  %v3261_v10 = vsel %vm9893_vm10, %v3219_v28, %v3221_v38  ;;  %v3260_v27 = vsel %vm9897_vm8, %v3215_v40, %v8337_v49 }
 0xc78   : > { %6113 = vrot.lane.b32.xlu1 %v6122_v33, %s9747_s8  ;;  %v5446_v33 = vld [vmem:[%s9563_s11 + $0x4] sm:$0xf] }
 0xc7a   : > { %v3229_v14 = vpop.permute.xlu1 %3228  ;;  %v3227_v51 = vpop.permute.xlu0 %3226 }
 0xc7b   : > { %v3377_v63 = vpop.permute.xlu2 %3376  ;;  %v3263_v12 = vsel %vm9894_vm14, %v3227_v51, %v3229_v14  ;;  %vm9899_vm14 = vmmov %vm9897_vm8 }
 0xc7c   : > { %3415 = vmatpush.bf16.msra.mxu2 %v3377_v63 }
 0xc80   : > { %6128 = vrot.lane.b32.xlu1 %v6132_v23, %s9751_s3 }
 0xc82   : > { %v3245_v0 = vpop.permute.xlu1 %3244  ;;  %v3211_v59 = vpop.permute.xlu0 %3210  ;;  %5302 = vmatmul.msk.bf16.vlgmr.msra.gmra.mxu2 %vm9695_vm12, %v5301_v55  ;;  %vm9895_vm12 = vmmov %vm9893_vm10 }
 0xc83   : > { %v8399_v44 = vpop.permute.xlu2 %6013  ;;  %3306 = vmatpush.bf16.msra.mxu1 %v3245_v0 }
 0xc87   : > { %3307 = vmatpush.bf16.msra.mxu1 %v3243_v60 }
 0xc8a   : > { %v3235_v8 = vpop.permute.xlu1 %3234  ;;  %v3353_v61 = vpop.permute.xlu0 %3352 }
 0xc8b   : > { %v3265_v41 = vsel %vm9883_vm11, %v3235_v8, %v3237_v37  ;;  %v8409_v39 = vpop.permute.xlu2 %6028  ;;  %3308 = vmatpush.bf16.msra.mxu1 %v3241_v15  ;;  %vm9896_vm11 = vmmov %vm9893_vm10  ;;  %v5447_v37 = vld [vmem:[%s9563_s11 + $0x8] sm:$0xf0]  ;;  %v5288_v15 = vor.u32 %v5446_v33, %v5285_v31 }
 0xc8c   : > { %3288 = vmatpush.bf16.msrb.mxu0 %v3265_v41  ;;  %v3262_v25 = vsel %vm9896_vm11, %v8356_v46, %v8370_v21  ;;  %v5297_v46 = vor.u32 %v5445_v42, %v5296_v43  ;;  %v9706_v63 = vunpack.i.h.bf16 %v8409_v39  ;;  %v9705_v18 = vunpack.i.l.bf16 %v8409_v39 }
 0xc8d   : > { %vm9928_vm11 = vcmask 1043456  }
 0xc8e   : > { %vm9929_vm10 = vmmov %vm9928_vm11 }
 0xc90   : > { %3289 = vmatpush.bf16.msrb.mxu0 %v3264_v24 }
 0xc92   : > { %v3209_v7 = vpop.permute.xlu0 %3208  ;;  %v3357_v32 = vpop.permute.xlu1 %3356 }
 0xc93   : > { %v8414_v3 = vpop.permute.xlu2 %6043  ;;  %v3379_v2 = vsel %vm9895_vm12, %v3357_v32, %v3359_v5  ;;  %vm9898_vm12 = vmmov %vm9897_vm8  ;;  %v3258_v60 = vsel %vm9897_vm8, %v8389_v6, %v3209_v7  ;;  %v5284_v5 = vor.u32 %v5447_v37, %v5283_v17 }
 0xc94   : > { %3290 = vmatpush.bf16.msrb.mxu0 %v3263_v12  ;;  %3400 = vmatpush.bf16.msrb.mxu3 %v3379_v2  ;;  %v9704_v47 = vunpack.i.h.bf16 %v8414_v3  ;;  %v9711_v11 = vunpack.i.l.bf16 %v8414_v3  ;;  %vm9932_vm8 = vmmov %vm9929_vm10 }
 0xc96   : > { %v8478_v6 = vsel %vm864_vm5, %v9711_v11, %v9704_v47 }
 0xc98   : > { %3291 = vmatpush.bf16.msrb.mxu0 %v3262_v25 }
 0xc9a   : > { %v8421_v54 = vpop.permute.xlu0 %3426  ;;  %v3213_v48 = vpop.permute.xlu1 %3212 }
 0xc9b   : > { %v8423_v56 = vpop.permute.xlu2 %6063  ;;  %v3259_v57 = vsel %vm9898_vm12, %v3211_v59, %v3213_v48  ;;  %vm9930_vm12 = vmmov %vm9929_vm10 }
 0xc9c   : > { %3292 = vmatpush.bf16.msrb.mxu0 %v3261_v10 }
 0xca0   : > { %3293 = vmatpush.bf16.msrb.mxu0 %v3260_v27 }
 0xca2   : > { %v8434_v13 = vpop.permute.xlu0 %6018  ;;  %v3355_v26 = vpop.permute.xlu1 %3354 }
 0xca3   : > { %v8436_v62 = vpop.permute.xlu2 %6068  ;;  %v3378_v9 = vsel %vm9899_vm14, %v3353_v61, %v3355_v26  ;;  %vm9931_vm14 = vmmov %vm9929_vm10 }
 0xca4   : > { %v6071_v49 = vunpack.i.h.bf16 %v8436_v62  ;;  %v6070_v19 = vunpack.i.l.bf16 %v8436_v62  ;;  %3294 = vmatpush.bf16.msrb.mxu0 %v3259_v57  ;;  %3401 = vmatpush.bf16.msrb.mxu3 %v3378_v9 }
 0xca6   : > { %v3880_v21 = vpack.c.bf16 %v6071_v49, %v8358_v29  ;;  %v3782_v45 = vsel %vm818_vm7, %v6070_v19, %v6071_v49 }
 0xca7   : > { %v3879_v1 = vpack.c.bf16 %v3782_v45, %v8257_v50  ;;  %3402 = vmatmul.bf16.vlgmr.msrb.gmra.mxu3 %v5297_v46 }
 0xca8   : > { %3923 = vrot.lane.b32.xlu2 %v3880_v21, %s9757_s6  ;;  %3295 = vmatpush.bf16.msrb.mxu0 %v3258_v60 }
 0xca9   : > { %3921 = vrot.lane.b32.xlu1 %v3879_v1, %s9757_s6 }
 0xcaa   : > { %v8463_v4 = vpop.permute.xlu0 %6033  ;;  %v3239_v50 = vpop.permute.xlu1 %3238 }
 0xcab   : > { %3309 = vmatpush.bf16.msra.mxu1 %v3239_v50  ;;  %3296 = vmatmul.bf16.vlgmr.msrb.gmra.mxu0 %v5284_v5  ;;  %v9697_v53 = vunpack.i.h.bf16 %v8463_v4  ;;  %v8523_v7 = vpop.permute.xlu2 %6083 }
 0xcac   : > { %v9700_v12 = vunpack.i.h.bf16 %v8523_v7  ;;  %v6085_v2 = vunpack.i.l.bf16 %v8523_v7 }
 0xcae   : > { %3310 = vmatmul.bf16.vlgmr.msra.gmra.mxu1 %v5288_v15  ;;  %v8544_v9 = vsel %vm890_vm3, %v6085_v2, %v9700_v12 }
 0xcb2   : > { %v8467_v28 = vpop.permute.xlu0 %6048  ;;  %v8469_v23 = vpop.permute.xlu1 %3431 }
 0xcb3   : > { %v9703_v40 = vunpack.i.h.bf16 %v8467_v28  ;;  %v9712_v38 = vunpack.i.l.bf16 %v8467_v28 }
 0xcb5   : > { %v8485_v58 = vsel %vm877_vm6, %v9712_v38, %v9703_v40 }
 0xcba   : > { %v8489_v52 = vpop.permute.xlu0 %6058  ;;  %v8491_v14 = vpop.permute.xlu1 %6023 }
 0xcbb   : > { %v9698_v51 = vunpack.i.h.bf16 %v8491_v14  ;;  %v6061_v25 = vunpack.i.h.bf16 %v8489_v52  ;;  %v9701_v48 = vunpack.i.l.bf16 %v8489_v52 }
 0xcbd   : > { %v8508_v61 = vsel %vm834_vm0, %v9698_v51, %v9705_v18  ;;  %v8551_v46 = vsel %vm903_vm4, %v9701_v48, %v6061_v25 }
 0xcc2   : > { %v8495_v0 = vpop.permute.xlu0 %6078  ;;  %v8497_v59 = vpop.permute.xlu1 %6038 }
 0xcc3   : > { %v9710_v55 = vunpack.i.h.bf16 %v8497_v59  ;;  %v9709_v8 = vunpack.i.l.bf16 %v8497_v59  ;;  %v6081_v45 = vunpack.i.h.bf16 %v8495_v0  ;;  %v6080_v1 = vunpack.i.l.bf16 %v8495_v0 }
 0xcc5   : > { %v8514_v41 = vpack.c.bf16 %v9710_v55, %v9706_v63  ;;  %v8521_v24 = vsel %vm850_vm1, %v9697_v53, %v9709_v8  ;;  %v3812_v31 = vsel %vm850_vm1, %v6080_v1, %v6081_v45 }
 0xcca   : > { %v8531_v10 = vpop.permute.xlu0 %6088  ;;  %v8533_v27 = vpop.permute.xlu1 %6053 }
 0xccb   : > { %v9699_v43 = vunpack.i.h.bf16 %v8531_v10  ;;  %v6090_v42 = vunpack.i.l.bf16 %v8531_v10  ;;  %v9713_v26 = vunpack.i.h.bf16 %v8533_v27  ;;  %v9702_v57 = vunpack.i.l.bf16 %v8533_v27 }
 0xccd   : > { %v8558_v49 = vsel %vm903_vm4, %v6090_v42, %v9699_v43  ;;  %v8565_v17 = vsel %vm890_vm3, %v9702_v57, %v9713_v26  ;;  %v8581_v43 = vpop.permute.xlu2 %6098 }
 0xcce   : > { %v9714_v12 = vunpack.i.l.bf16 %v8581_v43 }
 0xcd2   : > { %v6074_v60 = vpop.permute.xlu1 %6073  ;;  %v8577_v51 = vpop.permute.xlu0 %6108 }
 0xcd3   : > { %v6076_v5 = vunpack.i.h.bf16 %v6074_v60  ;;  %v6075_v33 = vunpack.i.l.bf16 %v6074_v60 }
 0xcd5   : > { %v3884_v50 = vpack.c.bf16 %v6081_v45, %v6076_v5  ;;  %v3797_v15 = vsel %vm834_vm0, %v6075_v33, %v6076_v5  ;;  %v6124_v48 = vpop.permute.xlu2 %6123 }
 0xcd6   : > { %v3883_v53 = vpack.c.bf16 %v3812_v31, %v3797_v15  ;;  %v6125_v18 = vunpack.i.l.bf16 %v6124_v48 }
 0xcd7   : > { %3931 = vrot.lane.b32.xlu0 %v3884_v50, %s9757_s6 }
 0xcd8   : > { %3929 = vrot.lane.b32.xlu2 %v3883_v53, %s9757_s6 }
 0xcda   : > { %v8579_v30 = vpop.permute.xlu1 %6093  ;;  %v6119_v45 = vpop.permute.xlu0 %6118 }
 0xcdb   : > { %v6121_v21 = vunpack.i.h.bf16 %v6119_v45  ;;  %v6120_v37 = vunpack.i.l.bf16 %v6119_v45 }
 0xce2   : > { %v8583_v0 = vpop.permute.xlu1 %6103  ;;  %v8597_v57 = vpop.permute.xlu0 %6133 }
 0xce3   : > { %v6105_v60 = vunpack.i.l.bf16 %v8583_v0  ;;  %v9707_v62 = vunpack.i.h.bf16 %v8597_v57 }
 0xce5   : > { %v8591_v5 = vpack.c.bf16 %v6105_v60, %v9714_v12 }
 0xcea   : > { %v6114_v53 = vpop.permute.xlu1 %6113 }
 0xceb   : > { %v6116_v31 = vunpack.i.h.bf16 %v6114_v53  ;;  %v6115_v50 = vunpack.i.l.bf16 %v6114_v53  ;;  %v6126_v53 = vunpack.i.h.bf16 %v6124_v48 }
 0xced   : > { %v3781_v15 = vsel %vm818_vm7, %v6116_v31, %v6070_v19  ;;  %v3780_v32 = vsel %vm818_vm7, %v6115_v50, %v6116_v31  ;;  %v6135_v19 = vunpack.i.l.bf16 %v8597_v57  ;;  %v3795_v50 = vsel %vm834_vm0, %v6120_v37, %v6121_v21 }
 0xcee   : > { %v3878_v40 = vpack.c.bf16 %v3781_v15, %v8265_v16  ;;  %v3877_v47 = vpack.c.bf16 %v3780_v32, %v8291_v35  ;;  %v3810_v45 = vsel %vm850_vm1, %v6125_v18, %v6126_v53  ;;  %v3796_v37 = vsel %vm834_vm0, %v6121_v21, %v6075_v33  ;;  %v3463_v18 = vld [vmem:[%s9575_s23 + $0x90] sm:$0x33] }
 0xcef   : > { %v3881_v15 = vpack.c.bf16 %v3810_v45, %v3795_v50  ;;  %v3527_v50 = vunpack.c.l.b16 %v3463_v18 }
 0xcf0   : > { %3919 = vrot.lane.b32.xlu0 %v3878_v40, %s9757_s6  ;;  %3917 = vrot.lane.b32.xlu2 %v3877_v47, %s9757_s6  ;;  %v3835_v47 = vsel %vm877_vm6, %v6135_v19, %v9707_v62  ;;  %v3464_v62 = vld [vmem:[%s9575_s23 + $0x98] sm:$0x3] }
 0xcf1   : > { %v3529_v45 = vunpack.c.l.b16 %v3464_v62  ;;  %v5464_v62 = vld [vmem:[%s9575_s23 + $0x7c] sm:$0xf] }
 0xcf2   : > { %v8605_v31 = vpop.permute.xlu1 %6128 }
 0xcf3   : > { %v9708_v16 = vunpack.i.h.bf16 %v8605_v31  ;;  %v6130_v32 = vunpack.i.l.bf16 %v8605_v31 }
 0xcf5   : > { %v3823_v40 = vsel %vm864_vm5, %v6130_v32, %v9708_v16  ;;  %v3885_v48 = vpack.c.bf16 %v6135_v19, %v6130_v32  ;;  %v3811_v19 = vsel %vm850_vm1, %v6126_v53, %v6080_v1  ;;  %v3528_v32 = vunpack.c.h.b16 %v3463_v18  ;;  %v5365_v1 = vld [vmem:[%s9575_s23 + $0x78] sm:$0xf]  ;;  %v5465_v53 = vld [vmem:[%s9575_s23 + $0x80] sm:$0xf0]  ;;  %v5367_v18 = vld [vmem:[%s9575_s23 + $0x84] sm:$0xf0] }
 0xcf6   : > { %v3886_v63 = vpack.c.bf16 %v3835_v47, %v3823_v40  ;;  %v3882_v47 = vpack.c.bf16 %v3811_v19, %v3796_v37  ;;  %v3548_v40 = vpack.c.b16 %v3527_v50, %v3527_v50  ;;  %v5366_v37 = vor.u32 %v5465_v53, %v5365_v1  ;;  %v5373_v19 = vld [vmem:[%s9575_s23 + $0x80] sm:$0xf]  ;;  %v5466_v50 = vld [vmem:[%s9575_s23 + $0x88] sm:$0xf0] }
 0xcf7   : > { %3933 = vrot.lane.b32.xlu1 %v3885_v48, %s9757_s6  ;;  %v3549_v48 = vpack.c.b16 %v3528_v32, %v3528_v32  ;;  %v5370_v32 = vor.u32 %v5464_v62, %v5367_v18  ;;  %v5341_v62 = vld [vmem:[%s9575_s23 + $0x48] sm:$0xf]  ;;  %v5458_v18 = vld [vmem:[%s9575_s23 + $0x4c] sm:$0xf] }
 0xcf8   : > { %3925 = vrot.lane.b32.xlu0 %v3881_v15, %s9757_s6  ;;  %3935 = vrot.lane.b32.xlu2 %v3886_v63, %s9757_s6  ;;  %v3550_v15 = vpack.c.b16 %v3529_v45, %v3529_v45  ;;  %v3573_v63 = vsel %vm1315_vm13, %v3548_v40, 0  ;;  %v5374_v45 = vor.u32 %v5466_v50, %v5373_v19  ;;  %v5462_v40 = vld [vmem:[%s9575_s23 + $0x68] sm:$0xf0]  ;;  %v5343_v50 = vld [vmem:[%s9575_s23 + $0x54] sm:$0xf0] }
 0xcf9   : > { %v3576_v21 = vsel %vm1315_vm13, %v3549_v48, 0  ;;  %3582 = vmatpush.bf16.msra.mxu0 %v3573_v63  ;;  %v5461_v48 = vld [vmem:[%s9575_s23 + $0x64] sm:$0xf]  ;;  %v5355_v63 = vld [vmem:[%s9575_s23 + $0x6c] sm:$0xf0] }
 0xcfa   : > { %v3579_v33 = vsel %vm1315_vm13, %v3550_v15, 0  ;;  %3596 = vmatpush.bf16.msrb.mxu1 %v3576_v21  ;;  %v5361_v21 = vld [vmem:[%s9575_s23 + $0x68] sm:$0xf]  ;;  %v5358_v1 = vor.u32 %v5461_v48, %v5355_v63  ;;  %v5329_v48 = vld [vmem:[%s9575_s23 + $0x30] sm:$0xf]  ;;  %vm9900_vm13 = vcmask 556032  }
 0xcfb   : > { %3610 = vmatpush.bf16.msrb.mxu2 %v3579_v33  ;;  %v5463_v33 = vld [vmem:[%s9575_s23 + $0x70] sm:$0xf0] }
 0xcfc   : > { %v5362_v53 = vor.u32 %v5463_v33, %v5361_v21  ;;  %v5455_v63 = vld [vmem:[%s9575_s23 + $0x34] sm:$0xf]  ;;  %v5331_v33 = vld [vmem:[%s9575_s23 + $0x3c] sm:$0xf0] }
 0xcfd   : > { %3583 = vmatpush.bf16.msra.mxu0 %v5366_v37  ;;  %v5459_v37 = vld [vmem:[%s9575_s23 + $0x50] sm:$0xf0] }
 0xcfe   : > { %3597 = vmatpush.bf16.msrb.mxu1 %v5370_v32  ;;  %v5342_v19 = vor.u32 %v5459_v37, %v5341_v62  ;;  %v5349_v32 = vld [vmem:[%s9575_s23 + $0x50] sm:$0xf]  ;;  %v5334_v62 = vor.u32 %v5455_v63, %v5331_v33  ;;  %v5450_v33 = vld [vmem:[%s9575_s23 + $0x8] sm:$0xf0] }
 0xcff   : > { %3927 = vrot.lane.b32.xlu1 %v3882_v47, %s9757_s6  ;;  %3611 = vmatpush.bf16.msrb.mxu2 %v5374_v45  ;;  %v5353_v47 = vld [vmem:[%s9575_s23 + $0x60] sm:$0xf]  ;;  %v5460_v45 = vld [vmem:[%s9575_s23 + $0x58] sm:$0xf0] }
 0xd00   : > { %v5354_v15 = vor.u32 %v5462_v40, %v5353_v47  ;;  %v5346_v47 = vor.u32 %v5458_v18, %v5343_v50  ;;  %v5350_v40 = vor.u32 %v5460_v45, %v5349_v32  ;;  %v3325_v18 = vpop.f32.mrf.mxu2  ;;  %v5453_v50 = vld [vmem:[%s9575_s23 + $0x20] sm:$0xf0]  ;;  %v5452_v32 = vld [vmem:[%s9575_s23 + $0x1c] sm:$0xf] }
 0xd02   : > { %3584 = vmatpush.bf16.msra.mxu0 %v5354_v15  ;;  %3598 = vmatpush.bf16.msrb.mxu1 %v5358_v1  ;;  %v5456_v15 = vld [vmem:[%s9575_s23 + $0x38] sm:$0xf0]  ;;  %v5337_v1 = vld [vmem:[%s9575_s23 + $0x38] sm:$0xf] }
 0xd03   : > { %3612 = vmatpush.bf16.msrb.mxu2 %v5362_v53  ;;  %v5330_v21 = vor.u32 %v5456_v15, %v5329_v48  ;;  %v5457_v53 = vld [vmem:[%s9575_s23 + $0x40] sm:$0xf0]  ;;  %v5454_v48 = vld [vmem:[%s9575_s23 + $0x28] sm:$0xf0] }
 0xd04   : > { %v5338_v37 = vor.u32 %v5457_v53, %v5337_v1  ;;  %v5449_v1 = vld [vmem:[%s9575_s23 + $0x4] sm:$0xf] }
 0xd06   : > { %3585 = vmatpush.bf16.msra.mxu0 %v5342_v19  ;;  %3599 = vmatpush.bf16.msrb.mxu1 %v5346_v47  ;;  %v5317_v19 = vld [vmem:[%s9575_s23 + $0x18] sm:$0xf]  ;;  %v5319_v47 = vld [vmem:[%s9575_s23 + $0x24] sm:$0xf0] }
 0xd07   : > { %3613 = vmatpush.bf16.msrb.mxu2 %v5350_v40  ;;  %v5318_v45 = vor.u32 %v5453_v50, %v5317_v19  ;;  %v5325_v40 = vld [vmem:[%s9575_s23 + $0x20] sm:$0xf]  ;;  %v5322_v15 = vor.u32 %v5452_v32, %v5319_v47  ;;  %v5451_v19 = vld [vmem:[%s9575_s23 + $0x10] sm:$0xf0] }
 0xd08   : > { %v5326_v63 = vor.u32 %v5454_v48, %v5325_v40 }
 0xd0a   : > { %3586 = vmatpush.bf16.msra.mxu0 %v5330_v21  ;;  %3600 = vmatpush.bf16.msrb.mxu1 %v5334_v62  ;;  %v5305_v21 = vld [vmem:[%s9575_s23] sm:$0xf]  ;;  %v5307_v62 = vld [vmem:[%s9575_s23 + $0xc] sm:$0xf0] }
 0xd0b   : > { %3614 = vmatpush.bf16.msrb.mxu2 %v5338_v37  ;;  %v5306_v53 = vor.u32 %v5450_v33, %v5305_v21  ;;  %v5313_v37 = vld [vmem:[%s9575_s23 + $0x8] sm:$0xf]  ;;  %v5310_v50 = vor.u32 %v5449_v1, %v5307_v62 }
 0xd0c   : > { %v5314_v32 = vor.u32 %v5451_v19, %v5313_v37 }
 0xd0e   : > { %3587 = vmatpush.bf16.msra.mxu0 %v5318_v45  ;;  %3601 = vmatpush.bf16.msrb.mxu1 %v5322_v15  ;;  %v3327_v45 = vpop.f32.mrf.mxu2 }
 0xd0f   : > { %3615 = vmatpush.bf16.msrb.mxu2 %v5326_v63 }
 0xd12   : > { %3588 = vmatpush.bf16.msra.mxu0 %v5306_v53  ;;  %3602 = vmatpush.bf16.msrb.mxu1 %v5310_v50 }
 0xd13   : > { %3616 = vmatpush.bf16.msrb.mxu2 %v5314_v32 }
 0xd16   : > { %v3417_v21 = vpop.f32.mrf.mxu2 }
 0xd1e   : > { %v3419_v1 = vpop.f32.mrf.mxu2 }
 0xd28   : > { %v3297_v47 = vpop.f32.mrf.mxu0 }
 0xd2a   : > { %v3403_v15 = vpop.f32.mrf.mxu3 }
 0xd2b   : > { %v3311_v40 = vpop.f32.mrf.mxu1 }
 0xd2c   : > { %v3312_v48 = vadd.f32 %v3311_v40, %v3297_v47  ;;  %v8742_v47 = vpop.permute.xlu2 %3923 }
 0xd2e   : > { %v3326_v63 = vadd.f32 %v3325_v18, %v3312_v48 }
 0xd30   : > { %v3404_v33 = vadd.f32 %v3403_v15, %v3326_v63  ;;  %v3299_v16 = vpop.f32.mrf.mxu0 }
 0xd32   : > { %v3418_v11 = vadd.f32 %v3417_v21, %v3404_v33  ;;  %v3405_v26 = vpop.f32.mrf.mxu3  ;;  %v8782_v33 = vunpack.i.l.bf16 %v8423_v56 }
 0xd33   : > { %v3313_v8 = vpop.f32.mrf.mxu1 }
 0xd34   : > { %v3314_v55 = vadd.f32 %v3313_v8, %v3299_v16  ;;  %v3434_v53 = vadd.f32 %v8421_v54, %v3418_v11  ;;  %v6101_v16 = vunpack.i.h.bf16 %v8581_v43 }
 0xd36   : > { %v3328_v38 = vadd.f32 %v3327_v45, %v3314_v55  ;;  %v3436_v19 = vmax.f32 %v3434_v53, 0.0  ;;  %v8747_v55 = vpop.permute.xlu2 %3929  ;;  %v3847_v63 = vsel %vm890_vm3, %v6101_v16, %v6085_v2  ;;  %v3726_v2 = vsel %vm903_vm4, %v6061_v25, %v6105_v60 }
 0xd37   : > { %v9906_v25 = vunpack.i.l.bf16 %v8414_v3 }
 0xd38   : > { %v3406_v12 = vadd.f32 %v3405_v26, %v3328_v38  ;;  %v6106_v26 = vunpack.i.h.bf16 %v8583_v0 }
 0xd3a   : > { %v3420_v62 = vadd.f32 %v3419_v1, %v3406_v12  ;;  %v3859_v48 = vsel %vm903_vm4, %v6106_v26, %v6090_v42  ;;  %v3759_v1 = vpack.c.bf16 %v8782_v33, %v8782_v33  ;;  %v8788_v42 = vunpack.i.l.bf16 %v8577_v51 }
 0xd3b   : > { %v3890_v21 = vpack.c.bf16 %v3859_v48, %v3847_v63  ;;  %v9908_v48 = vunpack.i.l.bf16 %v8497_v59  ;;  %v9909_v63 = vunpack.i.h.bf16 %v8409_v39 }
 0xd3c   : > { %v3435_v37 = vadd.f32 %v8469_v23, %v3420_v62  ;;  %v3762_v53 = vpack.c.bf16 %v8788_v42, %v8788_v42  ;;  %v9902_v62 = vunpack.i.l.bf16 %v8581_v43 }
 0xd3e   : > { %v3437_v50 = vmax.f32 %v3435_v37, 0.0  ;;  %v9903_v37 = vunpack.i.h.bf16 %v8533_v27 }
 0xd40   : > { %v3438_v32 = vpack.c.bf16 %v3437_v50, %v3436_v19  ;;  %v3714_v19 = vsel %vm890_vm3, %v9903_v37, %v9902_v62  ;;  %v6015_v62 = vunpack.i.l.bf16 %v8399_v44 }
 0xd41   : > { %v3757_v50 = vpack.c.bf16 %v3726_v2, %v3714_v19  ;;  %v9715_v2 = vunpack.i.h.bf16 %v8399_v44 }
 0xd42   : > { %5375 = vmatmul.msk.bf16.vlgmr.msra.gmra.mxu0 %vm1358_vm15, %v3438_v32  ;;  %5376 = vmatmul.msk.bf16.vlgmr.msrb.gmra.mxu1 %vm1358_vm15, %v3438_v32 }
 0xd43   : > { %5377 = vmatmul.msk.bf16.vlgmr.msrb.gmra.mxu2 %vm1358_vm15, %v3438_v32  ;;  %vm9901_vm15 = vmmov %vm9900_vm13  ;;  %v9717_v32 = vunpack.i.h.bf16 %v8189_v36  ;;  %v3646_v37 = vsel %vm818_vm7, %v6015_v62, %v9715_v2  ;;  %v6095_v2 = vunpack.i.l.bf16 %v8579_v30 }
 0xd49   : > { %v3932_v38 = vpop.permute.xlu0 %3931 }
 0xd4a   : > { %v8751_v54 = vsel %vm1009_vm9, %v8747_v55, %v3932_v38  ;;  %v9904_v38 = vld [vmem:[#allocation29_spill] sm:$0xff]  ;;  %v8836_v19 = vpop.permute.xlu2 %3917 }
 0xdbf   : > { %v8753_v11 = vpop.f32.mrf.mxu0  ;;  %v8755_v23 = vpop.f32.mrf.mxu1 }
 0xdc0   : > { %v6137_v8 = vpack.i.bf16 %v8753_v11, %v8358_v29  ;;  %v8761_v12 = vpack.i.bf16 %v8755_v23, %v8753_v11  ;;  %v3889_v29 = vpack.c.bf16 %v6106_v26, %v6101_v16  ;;  %v9905_v26 = vunpack.i.l.bf16 %v8467_v28 }
 0xdc1   : > { %v6096_v16 = vunpack.i.h.bf16 %v8579_v30 }
 0xdc2   : > { %6138 = vrot.lane.b32.xlu2 %v6137_v8, %s9751_s3  ;;  %6143 = vrot.lane.b32.xlu1 %v6137_v8, %s9752_s9  ;;  %v5761_v8 = vunpack.i.h.bf16 %v9904_v38  ;;  %v3701_v0 = vsel %vm877_vm6, %v9717_v32, %v9905_v26  ;;  %v8844_v26 = vpop.permute.xlu2 %3935  ;;  %v6111_v32 = vunpack.i.h.bf16 %v8577_v51  ;;  %v9918_v38 = vunpack.i.l.bf16 %v8533_v27 }
 0xdc4   : > { %v3689_v43 = vsel %vm864_vm5, %v5761_v8, %v9906_v25 }
 0xdc5   : > { %v3752_v60 = vpack.c.bf16 %v3701_v0, %v3689_v43  ;;  %v8846_v0 = vpop.permute.xlu1 %3921  ;;  %v8854_v43 = vpack.i.bf16 %v8753_v11, %v8291_v35 }
 0xdc6   : > { %v3618_v18 = vpop.f32.mrf.mxu2 }
 0xdc7   : > { %3625 = vst.msk [vmem:[#allocation9 + $0x18] sm:$0xff] %vm9900_vm13, %v3618_v18  ;;  %v8768_v45 = vpop.f32.mrf.mxu0  ;;  %v8770_v40 = vpop.f32.mrf.mxu1  ;;  %v3896_v18 = vpack.c.bf16 %v6096_v16, %v6096_v16  ;;  %vm9933_vm13 = vmmov %vm9932_vm8 }
 0xdca   : > { %3941 = vrot.lane.b32.xlu2 %v3889_v29, %s9757_s6  ;;  %v9907_v29 = vunpack.i.h.bf16 %v8497_v59  ;;  %v3743_v59 = vpack.c.bf16 %v3646_v37, %v8291_v35  ;;  %v9912_v37 = vunpack.i.h.bf16 %v8597_v57  ;;  %v3871_v57 = vsel %vm916_vm2, %v6111_v32, %v6095_v2 }
 0xdcb   : > { %v3894_v30 = vpack.c.bf16 %v3871_v57, %v3871_v57  ;;  %v9917_v57 = vunpack.i.h.bf16 %v8467_v28  ;;  %v9921_v28 = vunpack.i.h.bf16 %v8523_v7 }
 0xdce   : > { %v3620_v15 = vpop.f32.mrf.mxu2 }
 0xdcf   : > { %3628 = vst.msk [vmem:[#allocation9 + $0x38] sm:$0xff] %vm9901_vm15, %v3620_v15  ;;  %v3678_v15 = vsel %vm850_vm1, %v9908_v48, %v9907_v29  ;;  %vm9934_vm15 = vcmask 588800  }
 0xdd2   : > { %3943 = vrot.lane.b32.xlu2 %v3890_v21, %s9757_s6  ;;  %v9910_v21 = vunpack.i.l.bf16 %v8409_v39  ;;  %v9716_v39 = vunpack.i.h.bf16 %v8434_v13 }
 0xdda   : > { %4087 = vrot.lane.b32.xlu2 %v3759_v1, %s9757_s6  ;;  %v3663_v1 = vsel %vm834_vm0, %v9910_v21, %v9909_v63 }
 0xde2   : > { %4093 = vrot.lane.b32.xlu2 %v3762_v53, %s9757_s6  ;;  %v3749_v53 = vpack.c.bf16 %v3678_v15, %v3663_v1 }
 0xdea   : > { %4083 = vrot.lane.b32.xlu2 %v3757_v50, %s9757_s6  ;;  %v3746_v50 = vpack.c.bf16 %v9716_v39, %v8333_v22 }
 0xdf2   : > { %4073 = vrot.lane.b32.xlu2 %v3752_v60, %s9757_s6  ;;  %v8856_v60 = vpop.permute.xlu1 %3933 }
 0xdfa   : > { %3955 = vrot.lane.b32.xlu2 %v3896_v18, %s9757_s6  ;;  %v8862_v18 = vld [vmem:[#allocation9 + $0x18] sm:$0xff]  ;;  %v8870_v48 = vpop.permute.xlu1 %3927 }
 0xdfb   : > { %v8866_v29 = vpack.i.bf16 %v8862_v18, %v8755_v23 }
 0xe02   : > { %4067 = vrot.lane.b32.xlu2 %v3749_v53, %s9757_s6  ;;  %v9911_v53 = vunpack.i.h.bf16 %v8605_v31 }
 0xe0a   : > { %4055 = vrot.lane.b32.xlu2 %v3743_v59, %s9757_s6 }
 0xe12   : > { %4061 = vrot.lane.b32.xlu2 %v3746_v50, %s9757_s6 }
 0xe1a   : > { %6163 = vrot.lane.b32.xlu2 %v8761_v12, %s9755_s26 }
 0xe1c   : > { %v8850_v25 = vpop.permute.xlu2 %6138 }
 0xe1d   : > { %v6140_v15 = vunpack.i.l.bf16 %v8850_v25 }
 0xe1f   : > { %v3824_v62 = vsel %vm864_vm5, %v9911_v53, %v6140_v15  ;;  %v3872_v53 = vsel %vm916_vm2, %v6095_v2, %v6096_v16 }
 0xe22   : > { %6168 = vrot.lane.b32.xlu2 %v8854_v43, %s9748_s27 }
 0xe24   : > { %v8860_v22 = vpop.permute.xlu2 %3941 }
 0xe2a   : > { %6183 = vrot.lane.b32.xlu2 %v8866_v29, %s9751_s3 }
 0xe2c   : > { %v8872_v35 = vpop.permute.xlu2 %3943 }
 0xe32   : > { %6188 = vrot.lane.b32.xlu2 %v8866_v29, %s9750_s1 }
 0xe34   : > { %v8877_v63 = vpop.permute.xlu2 %4087  ;;  %v8879_v21 = vpop.permute.xlu1 %6143 }
 0xe35   : > { %v6145_v1 = vunpack.i.l.bf16 %v8879_v21 }
 0xe37   : > { %v3836_v59 = vsel %vm877_vm6, %v9912_v37, %v6145_v1  ;;  %v3888_v50 = vpack.c.bf16 %v6145_v1, %v6140_v15  ;;  %v8898_v37 = vld [vmem:[#allocation9 + $0x38] sm:$0xff]  ;;  %v3895_v15 = vpack.c.bf16 %v3872_v53, %v3872_v53 }
 0xe38   : > { %v3887_v39 = vpack.c.bf16 %v3836_v59, %v3824_v62  ;;  %v8902_v1 = vpack.i.bf16 %v8898_v37, %v8770_v40  ;;  %v9913_v62 = vpack.c.bf16 %v8558_v49, %v8544_v9  ;;  %v3893_v59 = vpack.c.bf16 %v6111_v32, %v6111_v32 }
 0xe39   : > { %3939 = vrot.lane.b32.xlu1 %v3888_v50, %s9757_s6  ;;  %v9914_v50 = vpack.c.bf16 %v8551_v46, %v8565_v17  ;;  %v9915_v49 = vunpack.i.h.bf16 %v8189_v36  ;;  %v9916_v17 = vunpack.i.h.bf16 %v8414_v3  ;;  %v9919_v36 = vunpack.i.l.bf16 %v8489_v52 }
 0xe3a   : > { %3937 = vrot.lane.b32.xlu0 %v3887_v39, %s9757_s6  ;;  %6198 = vrot.lane.b32.xlu2 %v8866_v29, %s9747_s8  ;;  %v6066_v39 = vunpack.i.h.bf16 %v8423_v56  ;;  %v9922_v52 = vunpack.i.h.bf16 %v8531_v10  ;;  %v9925_v10 = vunpack.i.h.bf16 %v8491_v14 }
 0xe3b   : > { %v3751_v32 = vpack.c.bf16 %v9915_v49, %v5761_v8  ;;  %v3755_v8 = vpack.c.bf16 %v9919_v36, %v9918_v38 }
 0xe3c   : > { %v8894_v31 = vpop.permute.xlu2 %4093  ;;  %v3738_v16 = vsel %vm916_vm2, %v6066_v39, %v8788_v42  ;;  %v3737_v9 = vsel %vm916_vm2, %v8782_v33, %v6066_v39  ;;  %v3754_v33 = vpack.c.bf16 %v9917_v57, %v9916_v17  ;;  %v3892_v27 = vpack.c.bf16 %v9922_v52, %v9921_v28  ;;  %v9028_v17 = vld [vmem:[#allocation2] sm:$0xff] }
 0xe3d   : > { %v3761_v2 = vpack.c.bf16 %v3738_v16, %v3738_v16  ;;  %v3760_v53 = vpack.c.bf16 %v3737_v9, %v3737_v9  ;;  %v6020_v39 = vunpack.i.l.bf16 %v8434_v13  ;;  %v6025_v16 = vunpack.i.l.bf16 %v8491_v14 }
 0xe3e   : > { %v6232_v57 = vpack.i.bf16 %v8768_v45, %v9028_v17 }
 0xe41   : > { %3953 = vrot.lane.b32.xlu1 %v3895_v15, %s9757_s6 }
 0xe42   : > { %3951 = vrot.lane.b32.xlu0 %v3894_v30, %s9757_s6  ;;  %6243 = vrot.lane.b32.xlu2 %v8902_v1, %s9753_s5  ;;  %v9920_v30 = vpack.c.bf16 %v8521_v24, %v8508_v61  ;;  %v9923_v61 = vpack.c.bf16 %v8485_v58, %v8478_v6  ;;  %v6035_v24 = vunpack.i.l.bf16 %v8463_v4 }
 0xe44   : > { %v8909_v51 = vpop.permute.xlu2 %4083 }
 0xe49   : > { %4091 = vrot.lane.b32.xlu1 %v3761_v2, %s9757_s6 }
 0xe4a   : > { %3945 = vrot.lane.b32.xlu0 %v9913_v62, %s9757_s6  ;;  %6248 = vrot.lane.b32.xlu2 %v8902_v1, %s9754_s7  ;;  %v3661_v62 = vsel %vm834_vm0, %v6025_v16, %v9925_v10 }
 0xe4c   : > { %v8920_v56 = vpop.permute.xlu2 %4073 }
 0xe51   : > { %4081 = vrot.lane.b32.xlu1 %v9914_v50, %s9757_s6 }
 0xe52   : > { %3949 = vrot.lane.b32.xlu0 %v3893_v59, %s9757_s6  ;;  %4314 = vrot.lane.b32.xlu2 %v8898_v37, %s9752_s9  ;;  %v9926_v59 = vunpack.i.h.bf16 %v8463_v4  ;;  %v9927_v4 = vunpack.i.h.bf16 %v8399_v44  ;;  %v6202_v44 = vpack.i.bf16 %v8768_v45, %v8862_v18 }
 0xe54   : > { %v8929_v42 = vpop.permute.xlu2 %3955  ;;  %v3676_v50 = vsel %vm850_vm1, %v6035_v24, %v9926_v59  ;;  %v3647_v14 = vsel %vm818_vm7, %v9927_v4, %v6020_v39  ;;  %v3961_v24 = vsel %vm1009_vm9, %v8870_v48, %v8747_v55  ;;  %v3966_v55 = vsel %vm1009_vm9, %v8860_v22, %v8872_v35 }
 0xe55   : > { %v3747_v6 = vpack.c.bf16 %v3676_v50, %v3661_v62  ;;  %v3963_v4 = vsel %vm1009_vm9, %v8856_v60, %v8844_v26 }
 0xe59   : > { %4071 = vrot.lane.b32.xlu1 %v3751_v32, %s9757_s6 }
 0xe5a   : > { %4089 = vrot.lane.b32.xlu0 %v3760_v53, %s9757_s6  ;;  %6263 = vrot.lane.b32.xlu2 %v8902_v1, %s9748_s27  ;;  %v3744_v53 = vpack.c.bf16 %v3647_v14, %v8322_v20  ;;  %v6212_v20 = vpack.i.bf16 %v8770_v40, %v8768_v45 }
 0xe5c   : > { %v8941_v46 = vpop.permute.xlu2 %4067 }
 0xe61   : > { %4077 = vrot.lane.b32.xlu1 %v3754_v33, %s9757_s6 }
 0xe62   : > { %4079 = vrot.lane.b32.xlu0 %v3755_v8, %s9757_s6 }
 0xe64   : > { %v8953_v15 = vpop.permute.xlu2 %4055 }
 0xe69   : > { %4065 = vrot.lane.b32.xlu1 %v9920_v30, %s9757_s6 }
 0xe6a   : > { %4085 = vrot.lane.b32.xlu0 %v8591_v5, %s9757_s6  ;;  %v9924_v5 = vunpack.i.h.bf16 %v8434_v13 }
 0xe6c   : > { %v8961_v3 = vpop.permute.xlu2 %4061  ;;  %v3648_v7 = vsel %vm818_vm7, %v6020_v39, %v9924_v5 }
 0xe6d   : > { %v3745_v9 = vpack.c.bf16 %v3648_v7, %v8331_v34 }
 0xe71   : > { %3947 = vrot.lane.b32.xlu1 %v3892_v27, %s9757_s6 }
 0xe72   : > { %4075 = vrot.lane.b32.xlu0 %v9923_v61, %s9757_s6 }
 0xe74   : > { %v8978_v2 = vpop.permute.xlu2 %6163 }
 0xe79   : > { %4059 = vrot.lane.b32.xlu1 %v3745_v9, %s9757_s6 }
 0xe7a   : > { %4063 = vrot.lane.b32.xlu0 %v3747_v6, %s9757_s6 }
 0xe7c   : > { %v8989_v13 = vpop.permute.xlu2 %6168 }
 0xe81   : > { %6158 = vrot.lane.b32.xlu1 %v8854_v43, %s9750_s1 }
 0xe82   : > { %4069 = vrot.lane.b32.xlu0 %v8514_v41, %s9757_s6  ;;  %v9019_v41 = vpop.permute.xlu0 %3919 }
 0xe83   : > { %v3958_v10 = vsel %vm1009_vm9, %v9019_v41, %v8846_v0 }
 0xe84   : > { %v8995_v58 = vpop.permute.xlu2 %6183 }
 0xe85   : > { %v6186_v34 = vunpack.i.h.bf16 %v8995_v58  ;;  %v6185_v49 = vunpack.i.l.bf16 %v8995_v58 }
 0xe87   : > { %v9007_v32 = vsel %vm864_vm5, %v6185_v49, %v6186_v34 }
 0xe89   : > { %6173 = vrot.lane.b32.xlu1 %v8854_v43, %s9747_s8 }
 0xe8a   : > { %4057 = vrot.lane.b32.xlu0 %v3744_v53, %s9757_s6  ;;  %v3926_v43 = vpop.permute.xlu0 %3925 }
 0xe8b   : > { %v3960_v22 = vsel %vm1009_vm9, %v3926_v43, %v8870_v48 }
 0xe91   : > { %6203 = vrot.lane.b32.xlu1 %v6202_v44, %s9753_s5 }
 0xe92   : > { %6148 = vrot.lane.b32.xlu0 %v8761_v12, %s9753_s5 }
 0xe99   : > { %6208 = vrot.lane.b32.xlu1 %v6202_v44, %s9754_s7 }
 0xe9a   : > { %6153 = vrot.lane.b32.xlu0 %v8761_v12, %s9754_s7 }
 0xea1   : > { %6213 = vrot.lane.b32.xlu1 %v6212_v20, %s9752_s9 }
 0xea2   : > { %6178 = vrot.lane.b32.xlu0 %v8866_v29, %s9752_s9 }
 0xea9   : > { %6233 = vrot.lane.b32.xlu1 %v6232_v57, %s9748_s27 }
 0xeaa   : > { %6193 = vrot.lane.b32.xlu0 %v8866_v29, %s9748_s27 }
 0xeab   : > { %v9035_v12 = vpop.permute.xlu1 %3939 }
 0xeac   : > { %v9037_v33 = vpop.permute.xlu0 %3937 }
 0xead   : > { %v3964_v27 = vsel %vm1009_vm9, %v8844_v26, %v9037_v33  ;;  %v3957_v26 = vsel %vm1009_vm9, %v8836_v19, %v9019_v41 }
 0xeb1   : > { %4290 = vrot.lane.b32.xlu1 %v8898_v37, %s9751_s3 }
 0xeb2   : > { %6218 = vrot.lane.b32.xlu0 %v6212_v20, %s9751_s3 }
 0xeb3   : > { %v3954_v38 = vpop.permute.xlu1 %3953 }
 0xeb4   : > { %v3952_v36 = vpop.permute.xlu0 %3951  ;;  %v3971_v14 = vsel %vm1009_vm9, %v3954_v38, %v8929_v42 }
 0xeb5   : > { %v3970_v8 = vsel %vm1009_vm9, %v3952_v36, %v3954_v38  ;;  %v3994_v60 = vsel %vm9933_vm13, %v3971_v14, 0  ;;  %vm9941_vm13 = vcmask 130048  }
 0xeb6   : > { %v3991_v30 = vsel %vm9928_vm11, %v3970_v8, 0  ;;  %v3965_v8 = vsel %vm1009_vm9, %v9037_v33, %v9035_v12  ;;  %vm9935_vm11 = vmmov %vm9934_vm15 }
 0xeb7   : > { %4012 = vmatpush.bf16.msrb.mxu0 %v3991_v30 }
 0xeb9   : > { %6253 = vrot.lane.b32.xlu1 %v8902_v1, %s9750_s1 }
 0xeba   : > { %6223 = vrot.lane.b32.xlu0 %v6232_v57, %s9750_s1 }
 0xebb   : > { %v4092_v29 = vpop.permute.xlu1 %4091 }
 0xebc   : > { %v3946_v28 = vpop.permute.xlu0 %3945  ;;  %v4109_v7 = vsel %vm1009_vm9, %v4092_v29, %v8894_v31 }
 0xebd   : > { %v3967_v52 = vsel %vm1009_vm9, %v8872_v35, %v3946_v28  ;;  %v4132_v62 = vsel %vm9930_vm12, %v4109_v7, 0 }
 0xebe   : > { %4013 = vmatpush.bf16.msrb.mxu0 %v3967_v52 }
 0xec1   : > { %6258 = vrot.lane.b32.xlu1 %v8902_v1, %s9755_s26 }
 0xec2   : > { %4014 = vmatpush.bf16.msrb.mxu0 %v3964_v27  ;;  %6228 = vrot.lane.b32.xlu0 %v6202_v44, %s9755_s26 }
 0xec3   : > { %v4082_v39 = vpop.permute.xlu1 %4081 }
 0xec4   : > { %v3950_v16 = vpop.permute.xlu0 %3949  ;;  %v4105_v35 = vsel %vm1009_vm9, %v4082_v39, %v8909_v51 }
 0xec5   : > { %v3969_v61 = vsel %vm1009_vm9, %v3950_v16, %v3952_v36 }
 0xec6   : > { %v3988_v5 = vsel %vm9929_vm10, %v3969_v61, 0  ;;  %4015 = vmatpush.bf16.msrb.mxu0 %v3961_v24  ;;  %vm9936_vm10 = vmmov %vm9935_vm11 }
 0xec7   : > { %3999 = vmatpush.bf16.msra.mxu3 %v3988_v5  ;;  %vm9937_vm12 = vmmov %vm9936_vm10 }
 0xec9   : > { %6268 = vrot.lane.b32.xlu1 %v8902_v1, %s9747_s8 }
 0xeca   : > { %4016 = vmatpush.bf16.msrb.mxu0 %v3958_v10  ;;  %6238 = vrot.lane.b32.xlu0 %v6232_v57, %s9747_s8 }
 0xecb   : > { %4000 = vmatpush.bf16.msra.mxu3 %v3966_v55  ;;  %v4072_v31 = vpop.permute.xlu1 %4071 }
 0xecc   : > { %v4090_v59 = vpop.permute.xlu0 %4089  ;;  %v4101_v48 = vsel %vm1009_vm9, %v4072_v31, %v8920_v56 }
 0xecd   : > { %v4107_v1 = vsel %vm1009_vm9, %v8877_v63, %v4090_v59  ;;  %v4108_v50 = vsel %vm1009_vm9, %v4090_v59, %v4092_v29 }
 0xece   : > { %4163 = vmatpush.bf16.msra.mxu0 %v4132_v62  ;;  %v4126_v9 = vsel %vm9931_vm14, %v4107_v1, 0  ;;  %v4129_v6 = vsel %vm9932_vm8, %v4108_v50, 0  ;;  %vm9938_vm14 = vmmov %vm9936_vm10 }
 0xecf   : > { %4001 = vmatpush.bf16.msra.mxu3 %v3963_v4  ;;  %4137 = vmatpush.bf16.msra.mxu1 %v4126_v9  ;;  %vm9939_vm8 = vmmov %vm9936_vm10 }
 0xed0   : > { %4150 = vmatpush.bf16.msra.mxu2 %v4129_v6  ;;  %v6146_v6 = vunpack.i.h.bf16 %v8879_v21 }
 0xed3   : > { %4002 = vmatpush.bf16.msra.mxu3 %v3960_v22  ;;  %v4078_v63 = vpop.permute.xlu1 %4077 }
 0xed4   : > { %4151 = vmatpush.bf16.msra.mxu2 %v4105_v35  ;;  %v4080_v53 = vpop.permute.xlu0 %4079 }
 0xed5   : > { %v4104_v44 = vsel %vm1009_vm9, %v4080_v53, %v4082_v39 }
 0xed6   : > { %4138 = vmatpush.bf16.msra.mxu1 %v4104_v44 }
 0xed7   : > { %4003 = vmatpush.bf16.msra.mxu3 %v3957_v26 }
 0xeda   : > { %4139 = vmatpush.bf16.msra.mxu1 %v4101_v48 }
 0xedb   : > { %4025 = vmatpush.bf16.msrb.mxu3 %v3994_v60  ;;  %v4066_v20 = vpop.permute.xlu1 %4065 }
 0xedc   : > { %v4086_v43 = vpop.permute.xlu0 %4085 }
 0xedd   : > { %v4106_v42 = vsel %vm1009_vm9, %v8909_v51, %v4086_v43  ;;  %v4099_v51 = vsel %vm1009_vm9, %v4066_v20, %v8941_v46 }
 0xede   : > { %4164 = vmatpush.bf16.msra.mxu0 %v4106_v42 }
 0xee3   : > { %v3948_v57 = vpop.permute.xlu1 %3947 }
 0xee4   : > { %v4076_v38 = vpop.permute.xlu0 %4075  ;;  %v3968_v36 = vsel %vm1009_vm9, %v3946_v28, %v3948_v57 }
 0xee5   : > { %4026 = vmatpush.bf16.msrb.mxu3 %v3968_v36  ;;  %v4102_v19 = vsel %vm1009_vm9, %v8920_v56, %v4076_v38  ;;  %v4103_v41 = vsel %vm1009_vm9, %v4076_v38, %v4078_v63  ;;  %v3959_v56 = vsel %vm1009_vm9, %v8846_v0, %v8742_v47 }
 0xee6   : > { %4152 = vmatpush.bf16.msra.mxu2 %v4102_v19  ;;  %4165 = vmatpush.bf16.msra.mxu0 %v4103_v41 }
 0xee9   : > { %4027 = vmatpush.bf16.msrb.mxu3 %v3965_v8 }
 0xeea   : > { %4153 = vmatpush.bf16.msra.mxu2 %v4099_v51 }
 0xeeb   : > { %v4060_v30 = vpop.permute.xlu1 %4059 }
 0xeec   : > { %v4064_v29 = vpop.permute.xlu0 %4063  ;;  %v4097_v27 = vsel %vm1009_vm9, %v4060_v30, %v8961_v3 }
 0xeed   : > { %4028 = vmatpush.bf16.msrb.mxu3 %v8751_v54  ;;  %v4098_v28 = vsel %vm1009_vm9, %v4064_v29, %v4066_v20  ;;  %v9115_v54 = vpop.permute.xlu2 %6188  ;;  %v6141_v20 = vunpack.i.h.bf16 %v8850_v25 }
 0xeee   : > { %4140 = vmatpush.bf16.msra.mxu1 %v4098_v28 }
 0xeef   : > { %v4292_v57 = vsel %vm864_vm5, %v6141_v20, %v6185_v49 }
 0xef1   : > { %4029 = vmatpush.bf16.msrb.mxu3 %v3959_v56 }
 0xef3   : > { %v9109_v52 = vpop.permute.xlu1 %6158 }
 0xef4   : > { %v4070_v12 = vpop.permute.xlu0 %4069  ;;  %v6161_v49 = vunpack.i.h.bf16 %v9109_v52 }
 0xef5   : > { %v4100_v33 = vsel %vm1009_vm9, %v8941_v46, %v4070_v12  ;;  %v9127_v3 = vpop.permute.xlu2 %6198 }
 0xef6   : > { %4166 = vmatpush.bf16.msra.mxu0 %v4100_v33 }
 0xefa   : > { %4167 = vmatpush.bf16.msra.mxu0 %v4097_v27 }
 0xefb   : > { %v9117_v39 = vpop.permute.xlu1 %6173 }
 0xefc   : > { %v4058_v16 = vpop.permute.xlu0 %4057 }
 0xefd   : > { %v4095_v47 = vsel %vm1009_vm9, %v8953_v15, %v4058_v16  ;;  %v4096_v0 = vsel %vm1009_vm9, %v4058_v16, %v4060_v30  ;;  %v9137_v31 = vpop.permute.xlu2 %6243  ;;  %v6160_v30 = vunpack.i.l.bf16 %v9109_v52 }
 0xefe   : > { %4141 = vmatpush.bf16.msra.mxu1 %v4095_v47  ;;  %4154 = vmatpush.bf16.msra.mxu2 %v4096_v0  ;;  %v6245_v50 = vunpack.i.l.bf16 %v9137_v31 }
 0xeff   : > { %v4266_v47 = vsel %vm850_vm1, %v6160_v30, %v6161_v49 }
 0xf03   : > { %v9122_v61 = vpop.permute.xlu1 %6203 }
 0xf04   : > { %v6206_v46 = vunpack.i.h.bf16 %v9122_v61  ;;  %v9125_v24 = vpop.permute.xlu0 %6148 }
 0xf05   : > { %v6150_v5 = vunpack.i.l.bf16 %v9125_v24  ;;  %v6151_v1 = vunpack.i.h.bf16 %v9125_v24  ;;  %v9164_v60 = vpop.permute.xlu2 %6248 }
 0xf06   : > { %v4366_v4 = vsel %vm903_vm4, %v6206_v46, %v6245_v50  ;;  %v6250_v30 = vunpack.i.l.bf16 %v9164_v60 }
 0xf07   : > { %v4428_v7 = vpack.c.bf16 %v6206_v46, %v6150_v5  ;;  %v4364_v22 = vsel %vm903_vm4, %v6150_v5, %v6151_v1  ;;  %v6166_v5 = vunpack.i.h.bf16 %v8978_v2 }
 0xf08   : > { %v4429_v53 = vpack.c.bf16 %v4366_v4, %v4364_v22 }
 0xf09   : > { %4534 = vrot.lane.b32.xlu2 %v4428_v7, %s9757_s6  ;;  %v6165_v7 = vunpack.i.l.bf16 %v8978_v2 }
 0xf0b   : > { %v9131_v10 = vpop.permute.xlu1 %6208 }
 0xf0c   : > { %v6211_v15 = vunpack.i.h.bf16 %v9131_v10  ;;  %v9134_v62 = vpop.permute.xlu0 %6153 }
 0xf0d   : > { %v6155_v55 = vunpack.i.l.bf16 %v9134_v62  ;;  %v9190_v16 = vpop.permute.xlu2 %4314 }
 0xf0f   : > { %v4424_v59 = vpack.c.bf16 %v6211_v15, %v6155_v55 }
 0xf11   : > { %4526 = vrot.lane.b32.xlu0 %v4424_v59, %s9757_s6 }
 0xf13   : > { %v9146_v9 = vpop.permute.xlu1 %6213 }
 0xf14   : > { %v6215_v35 = vunpack.i.l.bf16 %v9146_v9  ;;  %v9156_v63 = vpop.permute.xlu0 %6178  ;;  %v6216_v41 = vunpack.i.h.bf16 %v9146_v9 }
 0xf15   : > { %v6180_v8 = vunpack.i.l.bf16 %v9156_v63 }
 0xf16   : > { %v4420_v14 = vpack.c.bf16 %v6215_v35, %v6146_v6  ;;  %v4318_v28 = vsel %vm877_vm6, %v6215_v35, %v6216_v41 }
 0xf17   : > { %v4316_v56 = vsel %vm877_vm6, %v6146_v6, %v6180_v8  ;;  %v6205_v6 = vunpack.i.l.bf16 %v9122_v61 }
 0xf18   : > { %4518 = vrot.lane.b32.xlu1 %v4420_v14, %s9757_s6  ;;  %v4421_v0 = vpack.c.bf16 %v4318_v28, %v4316_v56  ;;  %v6246_v14 = vunpack.i.h.bf16 %v9137_v31  ;;  %v6171_v28 = vunpack.i.h.bf16 %v8989_v13  ;;  %v4400_v31 = vpack.c.bf16 %v9028_v17, %v9028_v17 }
 0xf19   : > { %4536 = vrot.lane.b32.xlu0 %v4429_v53, %s9757_s6  ;;  %v4388_v53 = vsel %vm916_vm2, %v6165_v7, %v6166_v5 }
 0xf1b   : > { %v9160_v44 = vpop.permute.xlu1 %6233 }
 0xf1c   : > { %v9162_v21 = vpop.permute.xlu0 %6193 }
 0xf23   : > { %v4291_v26 = vpop.permute.xlu1 %4290 }
 0xf24   : > { %v6219_v48 = vpop.permute.xlu0 %6218 }
 0xf25   : > { %v6221_v43 = vunpack.i.h.bf16 %v6219_v48  ;;  %v6220_v42 = vunpack.i.l.bf16 %v6219_v48 }
 0xf27   : > { %v9171_v38 = vsel %vm864_vm5, %v6221_v43, %v4291_v26  ;;  %v4294_v36 = vsel %vm864_vm5, %v6220_v42, %v6221_v43  ;;  %v4416_v19 = vpack.c.bf16 %v6220_v42, %v6141_v20  ;;  %v9212_v43 = vpop.permute.xlu2 %6263  ;;  %v4431_v42 = vpack.c.bf16 %v6246_v14, %v6205_v6 }
 0xf28   : > { %v4418_v51 = vpack.c.bf16 %v9171_v38, %v9007_v32  ;;  %v4417_v25 = vpack.c.bf16 %v4294_v36, %v4292_v57  ;;  %v6156_v57 = vunpack.i.h.bf16 %v9134_v62  ;;  %v6265_v56 = vunpack.i.l.bf16 %v9212_v43 }
 0xf29   : > { %4510 = vrot.lane.b32.xlu2 %v4416_v19, %s9757_s6  ;;  %v6236_v19 = vunpack.i.h.bf16 %v9160_v44  ;;  %v6266_v2 = vunpack.i.h.bf16 %v9212_v43  ;;  %v3763_v43 = vld [vmem:[%s9566_s14] sm:$0xf]  ;;  %v4401_v38 = vpack.c.bf16 %v8768_v45, %v8753_v11 }
 0xf2a   : > { %4512 = vrot.lane.b32.xlu0 %v4417_v25, %s9757_s6  ;;  %v6195_v25 = vunpack.i.l.bf16 %v9162_v21  ;;  %5378 = vmatmul.msk.bf16.vlgmr.msra.gmra.mxu3 %vm9934_vm15, %v3763_v43  ;;  %vm9942_vm15 = vmmov %vm9941_vm13 }
 0xf2b   : > { %v9182_v29 = vpop.permute.xlu1 %6253  ;;  %v4241_v61 = vsel %vm834_vm0, %v6265_v56, %v6266_v2  ;;  %5379 = vmatmul.msk.bf16.vlgmr.msrb.gmra.mxu0 %vm9935_vm11, %v3763_v43  ;;  %vm9943_vm11 = vmmov %vm9941_vm13 }
 0xf2c   : > { %v6224_v12 = vpop.permute.xlu0 %6223  ;;  %v6255_v62 = vunpack.i.l.bf16 %v9182_v29 }
 0xf2d   : > { %v6226_v33 = vunpack.i.h.bf16 %v6224_v12  ;;  %v6225_v27 = vunpack.i.l.bf16 %v6224_v12  ;;  %v4342_v12 = vsel %vm890_vm3, %v6211_v15, %v6250_v30  ;;  %v4419_v15 = vpack.c.bf16 %v4291_v26, %v6186_v34 }
 0xf2e   : > { %v6200_v34 = vunpack.i.l.bf16 %v9127_v3 }
 0xf2f   : > { %v4269_v52 = vsel %vm850_vm1, %v6225_v27, %v6226_v33  ;;  %v4340_v27 = vsel %vm890_vm3, %v6155_v55, %v6156_v57  ;;  %v4270_v58 = vsel %vm850_vm1, %v6226_v33, %v6255_v62  ;;  %v6170_v33 = vunpack.i.l.bf16 %v8989_v13 }
 0xf30   : > { %v4412_v46 = vpack.c.bf16 %v4269_v52, %v4266_v47  ;;  %v4240_v47 = vsel %vm834_vm0, %v6236_v19, %v6265_v56 }
 0xf31   : > { %4520 = vrot.lane.b32.xlu2 %v4421_v0, %s9757_s6  ;;  %v4237_v0 = vsel %vm834_vm0, %v6171_v28, %v6195_v25  ;;  %v4236_v13 = vsel %vm834_vm0, %v6170_v33, %v6171_v28 }
 0xf32   : > { %4502 = vrot.lane.b32.xlu0 %v4412_v46, %s9757_s6 }
 0xf33   : > { %v9198_v59 = vpop.permute.xlu1 %6258 }
 0xf34   : > { %v6260_v4 = vunpack.i.l.bf16 %v9198_v59  ;;  %v9202_v22 = vpop.permute.xlu0 %6228 }
 0xf35   : > { %v6231_v35 = vunpack.i.h.bf16 %v9202_v22  ;;  %v6230_v9 = vunpack.i.l.bf16 %v9202_v22 }
 0xf37   : > { %v4390_v48 = vsel %vm916_vm2, %v6231_v35, %v6260_v4  ;;  %v4432_v20 = vpack.c.bf16 %v6231_v35, %v6165_v7  ;;  %v4425_v7 = vpack.c.bf16 %v4342_v12, %v4340_v27  ;;  %v4409_v35 = vpack.c.bf16 %v4240_v47, %v4237_v0 }
 0xf38   : > { %v4433_v36 = vpack.c.bf16 %v4390_v48, %v4388_v53  ;;  %v6176_v48 = vunpack.i.h.bf16 %v9117_v39  ;;  %v6235_v0 = vunpack.i.l.bf16 %v9160_v44 }
 0xf39   : > { %4542 = vrot.lane.b32.xlu1 %v4432_v20, %s9757_s6  ;;  %v6190_v20 = vunpack.i.l.bf16 %v9115_v54 }
 0xf3a   : > { %4544 = vrot.lane.b32.xlu2 %v4433_v36, %s9757_s6  ;;  %4540 = vrot.lane.b32.xlu0 %v4431_v42, %s9757_s6  ;;  %v6181_v42 = vunpack.i.h.bf16 %v9156_v63  ;;  %v4207_v12 = vsel %vm818_vm7, %v6176_v48, %v6200_v34  ;;  %v6251_v63 = vunpack.i.h.bf16 %v9164_v60  ;;  %v6191_v60 = vunpack.i.h.bf16 %v9115_v54 }
 0xf3b   : > { %v9239_v52 = vpop.permute.xlu1 %6268  ;;  %v4267_v36 = vsel %vm850_vm1, %v6161_v49, %v6190_v20  ;;  %v6175_v49 = vunpack.i.l.bf16 %v9117_v39  ;;  %v4367_v54 = vsel %vm903_vm4, %v6245_v50, %v6246_v14  ;;  %5380 = vmatmul.msk.bf16.vlgmr.msrb.gmra.mxu3 %vm9936_vm10, %v3763_v43  ;;  %vm9944_vm10 = vcmask 556032  }
 0xf3c   : > { %v6239_v46 = vpop.permute.xlu0 %6238  ;;  %v6270_v55 = vunpack.i.l.bf16 %v9239_v52  ;;  %v4413_v27 = vpack.c.bf16 %v4270_v58, %v4267_v36  ;;  %v4423_v47 = vpack.c.bf16 %v9190_v16, %v6181_v42  ;;  %v4319_v58 = vsel %vm877_vm6, %v6216_v41, %v9190_v16 }
 0xf3d   : > { %v6241_v53 = vunpack.i.h.bf16 %v6239_v46  ;;  %v4317_v44 = vsel %vm877_vm6, %v6180_v8, %v6181_v42  ;;  %v4343_v16 = vsel %vm890_vm3, %v6250_v30, %v6251_v63  ;;  %v6256_v42 = vunpack.i.h.bf16 %v9182_v29 }
 0xf3e   : > { %v6271_v14 = vunpack.i.h.bf16 %v9239_v52  ;;  %v4402_v30 = vpack.c.bf16 %v8770_v40, %v8755_v23  ;;  %v4688_v23 = vld [vmem:[%s9568_s16] sm:$0xff]  ;;  %v4403_v52 = vpack.c.bf16 %v8898_v37, %v8862_v18 }
 0xf3f   : > { %v4210_v26 = vsel %vm818_vm7, %v6241_v53, %v6270_v55 }
 0xf40   : > { %v4211_v56 = vsel %vm818_vm7, %v6270_v55, %v6271_v14 }
 0xf41   : > { %4528 = vrot.lane.b32.xlu1 %v4425_v7, %s9757_s6  ;;  %v4405_v7 = vpack.c.bf16 %v4210_v26, %v4207_v12  ;;  %v4206_v26 = vsel %vm818_vm7, %v6175_v49, %v6176_v48  ;;  %v4422_v12 = vpack.c.bf16 %v4319_v58, %v4317_v44  ;;  %v6196_v48 = vunpack.i.h.bf16 %v9162_v21  ;;  %v3629_v58 = vld [vmem:[%s9565_s13] sm:$0xf] }
 0xf42   : > { %4496 = vrot.lane.b32.xlu2 %v4409_v35, %s9757_s6  ;;  %4516 = vrot.lane.b32.xlu0 %v4419_v15, %s9757_s6  ;;  %v6240_v35 = vunpack.i.l.bf16 %v6239_v46  ;;  %v4239_v15 = vsel %vm834_vm0, %v6235_v0, %v6236_v19  ;;  %v6210_v19 = vunpack.i.l.bf16 %v9131_v10  ;;  %v4389_v10 = vsel %vm916_vm2, %v6166_v5, %v6230_v9 }
 0xf43   : > { %v4408_v36 = vpack.c.bf16 %v4239_v15, %v4236_v13  ;;  %v4365_v5 = vsel %vm903_vm4, %v6151_v1, %v6205_v6  ;;  %v4238_v29 = vsel %vm834_vm0, %v6195_v25, %v6196_v48  ;;  %v4415_v21 = vpack.c.bf16 %v6256_v42, %v6191_v60  ;;  %5383 = vmatmul.msk.bf16.vlgmr.msra.gmra.mxu0 %vm9937_vm12, %v3629_v58 }
 0xf44   : > { %v4209_v46 = vsel %vm818_vm7, %v6240_v35, %v6241_v53  ;;  %v4341_v41 = vsel %vm890_vm3, %v6156_v57, %v6210_v19  ;;  %v4427_v22 = vpack.c.bf16 %v6251_v63, %v6210_v19  ;;  %v4430_v24 = vpack.c.bf16 %v4367_v54, %v4365_v5  ;;  %5381 = vmatmul.msk.bf16.vlgmr.msra.gmra.mxu1 %vm9938_vm14, %v3629_v58 }
 0xf45   : > { %v4404_v39 = vpack.c.bf16 %v4209_v46, %v4206_v26  ;;  %v4426_v28 = vpack.c.bf16 %v4343_v16, %v4341_v41  ;;  %v4410_v1 = vpack.c.bf16 %v4241_v61, %v4238_v29  ;;  %v4411_v50 = vpack.c.bf16 %v6266_v2, %v6196_v48  ;;  %5382 = vmatmul.msk.bf16.vlgmr.msra.gmra.mxu2 %vm9939_vm8, %v3629_v58  ;;  %v4173_v16 = vld [vmem:[%s9940_s18] sm:$0xff] }
 0xf46   : > { %v6201_v57 = vunpack.i.h.bf16 %v9127_v3 }
 0xf48   : > { %v4407_v25 = vpack.c.bf16 %v6271_v14, %v6201_v57 }
 0xf49   : > { %4504 = vrot.lane.b32.xlu1 %v4413_v27, %s9757_s6  ;;  %v6261_v27 = vunpack.i.h.bf16 %v9198_v59  ;;  %v4271_v59 = vsel %vm850_vm1, %v6255_v62, %v6256_v42  ;;  %v4208_v62 = vsel %vm818_vm7, %v6200_v34, %v6201_v57 }
 0xf4a   : > { %4524 = vrot.lane.b32.xlu2 %v4423_v47, %s9757_s6  ;;  %4488 = vrot.lane.b32.xlu0 %v4405_v7, %s9757_s6 }
 0xf4b   : > { %v4391_v8 = vsel %vm916_vm2, %v6260_v4, %v6261_v27  ;;  %v4268_v4 = vsel %vm850_vm1, %v6190_v20, %v6191_v60  ;;  %v4406_v20 = vpack.c.bf16 %v4211_v56, %v4208_v62  ;;  %v4435_v40 = vpack.c.bf16 %v6261_v27, %v6230_v9 }
 0xf4c   : > { %v4434_v53 = vpack.c.bf16 %v4391_v8, %v4389_v10  ;;  %v4414_v6 = vpack.c.bf16 %v4271_v59, %v4268_v4 }
 0xf51   : > { %4494 = vrot.lane.b32.xlu1 %v4408_v36, %s9757_s6 }
 0xf52   : > { %4486 = vrot.lane.b32.xlu2 %v4404_v39, %s9757_s6  ;;  %4522 = vrot.lane.b32.xlu0 %v4422_v12, %s9757_s6 }
 0xf59   : > { %4532 = vrot.lane.b32.xlu1 %v4427_v22, %s9757_s6  ;;  %v4438_v22 = vunpack.c.h.b16 %v4173_v16 }
 0xf5a   : > { %4530 = vrot.lane.b32.xlu2 %v4426_v28, %s9757_s6  ;;  %4546 = vrot.lane.b32.xlu0 %v4434_v53, %s9757_s6 }
 0xf5b   : > { %v4440_v53 = vpack.c.b16 %v4438_v22, %v4438_v22 }
 0xf61   : > { %4538 = vrot.lane.b32.xlu1 %v4430_v24, %s9757_s6 }
 0xf62   : > { %4506 = vrot.lane.b32.xlu2 %v4414_v6, %s9757_s6  ;;  %4498 = vrot.lane.b32.xlu0 %v4410_v1, %s9757_s6 }
 0xf63   : > { %v4535_v32 = vpop.permute.xlu2 %4534 }
 0xf69   : > { %4508 = vrot.lane.b32.xlu1 %v4415_v21, %s9757_s6 }
 0xf6a   : > { %4500 = vrot.lane.b32.xlu2 %v4411_v50, %s9757_s6  ;;  %4478 = vrot.lane.b32.xlu0 %v4400_v31, %s9757_s6 }
 0xf71   : > { %4514 = vrot.lane.b32.xlu1 %v4418_v51, %s9757_s6 }
 0xf72   : > { %4482 = vrot.lane.b32.xlu2 %v4402_v30, %s9757_s6  ;;  %4492 = vrot.lane.b32.xlu0 %v4407_v25, %s9757_s6 }
 0xf79   : > { %4490 = vrot.lane.b32.xlu1 %v4406_v20, %s9757_s6 }
 0xf7a   : > { %4548 = vrot.lane.b32.xlu2 %v4435_v40, %s9757_s6  ;;  %4691 = vperm.xlu0 %5554, %v4688_v23  }
 0xf81   : > { %4480 = vrot.lane.b32.xlu1 %v4401_v38, %s9757_s6 }
 0xf83   : > { %v4527_v3 = vpop.permute.xlu0 %4526  ;;  %v4511_v51 = vpop.permute.xlu2 %4510 }
 0xf89   : > { %4484 = vrot.lane.b32.xlu1 %v4403_v52, %s9757_s6 }
 0xf8a   : > { %v4519_v11 = vpop.permute.xlu1 %4518 }
 0xf8b   : > { %v9359_v55 = vpop.permute.xlu2 %4520  ;;  %v4537_v34 = vpop.permute.xlu0 %4536 }
 0xf8c   : > { %v4571_v47 = vsel %vm1009_vm9, %v4535_v32, %v4537_v34  ;;  %v4565_v36 = vsel %vm1009_vm9, %v4519_v11, %v9359_v55 }
 0xf8d   : > { %4607 = vmatpush.bf16.msra.mxu3 %v4571_v47 }
 0xf94   : > { %v4545_v0 = vpop.permute.xlu2 %4544 }
 0xf9c   : > { %v9362_v7 = vpop.permute.xlu2 %4496  ;;  %v9364_v35 = vpop.permute.xlu0 %4512 }
 0xf9d   : > { %v4562_v27 = vsel %vm1009_vm9, %v4511_v51, %v9364_v35 }
 0xfa4   : > { %v4525_v45 = vpop.permute.xlu2 %4524  ;;  %v4503_v33 = vpop.permute.xlu0 %4502 }
 0xfa8   : > { %v4018_v56 = vpop.f32.mrf.mxu0 }
 0xfab   : > { %v4543_v49 = vpop.permute.xlu1 %4542 }
 0xfac   : > { %v4574_v15 = vsel %vm1009_vm9, %v4543_v49, %v4545_v0  ;;  %v4487_v18 = vpop.permute.xlu2 %4486  ;;  %v4541_v37 = vpop.permute.xlu0 %4540 }
 0xfad   : > { %4627 = vmatpush.bf16.msrb.mxu1 %v4574_v15  ;;  %v4005_v51 = vpop.f32.mrf.mxu3 }
 0xfb0   : > { %5384 = vmatmul.msk.bf16.vlgmr.msrb.gmra.mxu1 %vm9941_vm13, %v4440_v53  ;;  %v4020_v52 = vpop.f32.mrf.mxu0 }
 0xfb3   : > { %v4529_v44 = vpop.permute.xlu1 %4528 }
 0xfb4   : > { %v4531_v46 = vpop.permute.xlu2 %4530  ;;  %v4517_v13 = vpop.permute.xlu0 %4516  ;;  %v4568_v26 = vsel %vm1009_vm9, %v4527_v3, %v4529_v44  ;;  %v4437_v3 = vunpack.c.l.b16 %v4173_v16 }
 0xfb5   : > { %4608 = vmatpush.bf16.msra.mxu3 %v4568_v26  ;;  %v4569_v61 = vsel %vm1009_vm9, %v4529_v44, %v4531_v46 }
 0xfb9   : > { %4609 = vmatpush.bf16.msra.mxu3 %v4565_v36 }
 0xfbb   : > { %v4505_v12 = vpop.permute.xlu1 %4504 }
 0xfbc   : > { %v4507_v39 = vpop.permute.xlu2 %4506  ;;  %v4489_v19 = vpop.permute.xlu0 %4488  ;;  %v4559_v9 = vsel %vm1009_vm9, %v4503_v33, %v4505_v12 }
 0xfbd   : > { %4610 = vmatpush.bf16.msra.mxu3 %v4562_v27  ;;  %v4553_v28 = vsel %vm1009_vm9, %v4487_v18, %v4489_v19  ;;  %v4560_v25 = vsel %vm1009_vm9, %v4505_v12, %v4507_v39 }
 0xfc0   : > { %v4169_v49 = vpop.f32.mrf.mxu0 }
 0xfc1   : > { %4611 = vmatpush.bf16.msra.mxu3 %v4559_v9  ;;  %v4143_v15 = vpop.f32.mrf.mxu1 }
 0xfc3   : > { %v4495_v63 = vpop.permute.xlu1 %4494 }
 0xfc4   : > { %v4501_v41 = vpop.permute.xlu2 %4500  ;;  %v4523_v8 = vpop.permute.xlu0 %4522  ;;  %v4556_v10 = vsel %vm1009_vm9, %v4495_v63, %v9362_v7 }
 0xfc5   : > { %4612 = vmatpush.bf16.msra.mxu3 %v4556_v10  ;;  %v4566_v31 = vsel %vm1009_vm9, %v9359_v55, %v4523_v8  ;;  %v4567_v21 = vsel %vm1009_vm9, %v4523_v8, %v4525_v45  ;;  %v4700_v10 = vld [vmem:[%s9571_s19] sm:$0x7] }
 0xfc8   : > { %v4156_v58 = vpop.f32.mrf.mxu2 }
 0xfc9   : > { %4613 = vmatpush.bf16.msra.mxu3 %v4553_v28  ;;  %v4157_v44 = vadd.f32 %v4156_v58, %v4018_v56 }
 0xfcb   : > { %v4533_v48 = vpop.permute.xlu1 %4532 }
 0xfcc   : > { %v4483_v42 = vpop.permute.xlu2 %4482  ;;  %v4547_v60 = vpop.permute.xlu0 %4546  ;;  %v4570_v24 = vsel %vm1009_vm9, %v4531_v46, %v4533_v48 }
 0xfcd   : > { %v4575_v2 = vsel %vm1009_vm9, %v4545_v0, %v4547_v60  ;;  %v4439_v0 = vpack.c.b16 %v4437_v3, %v4437_v3  ;;  %v4171_v46 = vpop.f32.mrf.mxu0 }
 0xfce   : > { %4653 = vmatpush.bf16.msrb.mxu0 %v4575_v2 }
 0xfd0   : > { %v4158_v26 = vpop.f32.mrf.mxu2 }
 0xfd1   : > { %5385 = vmatmul.msk.bf16.vlgmr.msrb.gmra.mxu0 %vm9942_vm15, %v4440_v53 }
 0xfd3   : > { %v4539_v5 = vpop.permute.xlu1 %4538 }
 0xfd4   : > { %v4572_v29 = vsel %vm1009_vm9, %v4537_v34, %v4539_v5  ;;  %v4573_v59 = vsel %vm1009_vm9, %v4539_v5, %v4541_v37  ;;  %v4549_v54 = vpop.permute.xlu2 %4548  ;;  %v4499_v1 = vpop.permute.xlu0 %4498  ;;  %v4144_v37 = vadd.f32 %v4143_v15, %v4005_v51 }
 0xfd5   : > { %v4576_v4 = vsel %vm1009_vm9, %v4547_v60, %v4549_v54  ;;  %4633 = vmatpush.bf16.msrb.mxu2 %v4572_v29  ;;  %4659 = vmatpush.bf16.msra.mxu1 %v4573_v59  ;;  %v4557_v20 = vsel %vm1009_vm9, %v9362_v7, %v4499_v1  ;;  %v4558_v23 = vsel %vm1009_vm9, %v4499_v1, %v4501_v41  ;;  %v4007_v7 = vpop.f32.mrf.mxu3  ;;  %v4702_v60 = vperm.slane %v4700_v10, 0 }
 0xfd6   : > { %4679 = vmatpush.bf16.msra.mxu0 %v4576_v4  ;;  %v4703_v29 = vperm.slane %v4700_v10, 1 }
 0xfd9   : > { %4634 = vmatpush.bf16.msrb.mxu2 %v4569_v61  ;;  %4660 = vmatpush.bf16.msra.mxu1 %v4570_v24  ;;  %v4704_v24 = vperm.slane %v4700_v10, 2 }
 0xfdb   : > { %v4509_v6 = vpop.permute.xlu1 %4508 }
 0xfdc   : > { %v4479_v57 = vpop.permute.xlu0 %4478  ;;  %v4561_v30 = vsel %vm1009_vm9, %v4507_v39, %v4509_v6 }
 0xfdd   : > { %4635 = vmatpush.bf16.msrb.mxu2 %v4566_v31  ;;  %4661 = vmatpush.bf16.msra.mxu1 %v4567_v21  ;;  %v4031_v45 = vpop.f32.mrf.mxu3 }
 0xfde   : > { %v4170_v18 = vadd.f32 %v4169_v49, %v4031_v45 }
 0xfe1   : > { %5386 = vmatmul.msk.bf16.vlgmr.msra.gmra.mxu0 %vm9943_vm11, %v4440_v53 }
 0xfe3   : > { %v4515_v50 = vpop.permute.xlu1 %4514 }
 0xfe4   : > { %v4563_v14 = vsel %vm1009_vm9, %v9364_v35, %v4515_v50  ;;  %v4564_v43 = vsel %vm1009_vm9, %v4515_v50, %v4517_v13  ;;  %v4493_v40 = vpop.permute.xlu0 %4492  ;;  %v4145_v13 = vpop.f32.mrf.mxu1 }
 0xfe5   : > { %4636 = vmatpush.bf16.msrb.mxu2 %v4563_v14  ;;  %4662 = vmatpush.bf16.msra.mxu1 %v4564_v43  ;;  %v4033_v33 = vpop.f32.mrf.mxu3 }
 0xfe9   : > { %4637 = vmatpush.bf16.msrb.mxu2 %v4560_v25  ;;  %4663 = vmatpush.bf16.msra.mxu1 %v4561_v30 }
 0xfeb   : > { %v4491_v62 = vpop.permute.xlu1 %4490 }
 0xfec   : > { %v4554_v32 = vsel %vm1009_vm9, %v4489_v19, %v4491_v62  ;;  %v4555_v38 = vsel %vm1009_vm9, %v4491_v62, %v4493_v40 }
 0xfed   : > { %4638 = vmatpush.bf16.msrb.mxu2 %v4557_v20  ;;  %4664 = vmatpush.bf16.msra.mxu1 %v4558_v23 }
 0xff1   : > { %4639 = vmatpush.bf16.msrb.mxu2 %v4554_v32  ;;  %4665 = vmatpush.bf16.msra.mxu1 %v4555_v38 }
 0xff3   : > { %v4481_v55 = vpop.permute.xlu1 %4480 }
 0xff4   : > { %v4550_v34 = vsel %vm1009_vm9, %v4479_v57, %v4481_v55  ;;  %v4551_v47 = vsel %vm1009_vm9, %v4481_v55, %v4483_v42 }
 0xff5   : > { %4614 = vmatpush.bf16.msra.mxu3 %v4550_v34  ;;  %4640 = vmatpush.bf16.msrb.mxu2 %v4551_v47 }
 0xff8   : > { %4615 = vmatmul.bf16.vlgmr.msra.gmra.mxu3 %v4439_v0  ;;  %4641 = vmatmul.bf16.vlgmr.msrb.gmra.mxu2 %v4439_v0 }
 0xffb   : > { %v4485_v35 = vpop.permute.xlu1 %4484 }
 0xffc   : > { %v4552_v11 = vsel %vm1009_vm9, %v4483_v42, %v4485_v35  ;;  %v4692_v42 = vpop.permute.xlu0 %4691 }
 0xffd   : > { %4666 = vmatpush.bf16.msra.mxu1 %v4552_v11 }
0x1000   : > { %4667 = vmatmul.bf16.vlgmr.msra.gmra.mxu1 %v4439_v0 }
0x102d   : > { %v4629_v36 = vpop.f32.mrf.mxu1 }
0x1035   : > { %v4631_v39 = vpop.f32.mrf.mxu1 }
0x104e   : > { %v4655_v12 = vpop.f32.mrf.mxu0 }
0x1056   : > { %v4657_v19 = vpop.f32.mrf.mxu0 }
0x105e   : > { %v4681_v27 = vpop.f32.mrf.mxu0 }
0x1066   : > { %v4683_v9 = vpop.f32.mrf.mxu0 }
0x107b   : > { %v4616_v63 = vpop.f32.mrf.mxu3  ;;  %v4642_v41 = vpop.f32.mrf.mxu2 }
0x107c   : > { %v4630_v8 = vadd.f32 %v4629_v36, %v4616_v63  ;;  %v4656_v16 = vadd.f32 %v4655_v12, %v4642_v41 }
0x107d   : > { %v4668_v22 = vpop.f32.mrf.mxu1 }
0x107e   : > { %v4685_v28 = vadd.f32 %v4630_v8, %v4144_v37  ;;  %v4686_v53 = vadd.f32 %v4656_v16, %v4157_v44  ;;  %v4682_v48 = vadd.f32 %v4681_v27, %v4668_v22 }
0x1080   : > { %v4694_v2 = vadd.f32 %v4692_v42, %v4685_v28  ;;  %v4695_v5 = vadd.f32 %v4692_v42, %v4686_v53  ;;  %v4687_v59 = vadd.f32 %v4682_v48, %v4170_v18 }
0x1082   : > { %v4697_v54 = vmax.f32 %v4694_v2, 0.0  ;;  %v4698_v4 = vmax.f32 %v4695_v5, 0.0  ;;  %v4696_v61 = vadd.f32 %v4692_v42, %v4687_v59 }
0x1083   : > { %v4618_v1 = vpop.f32.mrf.mxu3  ;;  %v4644_v6 = vpop.f32.mrf.mxu2 }
0x1084   : > { %v9413_v31 = vmul.f32 %v4702_v60, %v4697_v54  ;;  %v9415_v21 = vmul.f32 %v4703_v29, %v4698_v4  ;;  %v4699_v50 = vmax.f32 %v4696_v61, 0.0 }
0x1085   : > { %v4670_v14 = vpop.f32.mrf.mxu1 }
0x1086   : > { %v4710_v43 = vmul.f32 %v4704_v24, %v4699_v50  ;;  %v6282_v25 = vpack.i.bf16 %v9413_v31, %v9028_v17  ;;  %v6292_v30 = vpack.i.bf16 %v9415_v21, %v9413_v31  ;;  %v6338_v24 = vld [vmem:[#allocation2] sm:$0xff] }
0x1088   : > { %4713 = vst.msk [vmem:[#allocation10 + $0x18] sm:$0xff] %vm9944_vm10, %v4710_v43 }
0x108f   : > { %v9418_v57 = vld [vmem:[#allocation10 + $0x18] sm:$0xff] }
0x1090   : > { %4808 = vrot.lane.b32.xlu0 %v9418_v57, %s9753_s5  ;;  %4796 = vrot.lane.b32.xlu1 %v9418_v57, %s9754_s7  ;;  %v6312_v17 = vpack.i.bf16 %v9418_v57, %v9415_v21 }
0x1091   : > { %4820 = vrot.lane.b32.xlu2 %v9418_v57, %s9755_s26 }
0x1098   : > { %4784 = vrot.lane.b32.xlu1 %v9418_v57, %s9752_s9  ;;  %6283 = vrot.lane.b32.xlu0 %v6282_v25, %s9747_s8 }
0x1099   : > { %4772 = vrot.lane.b32.xlu2 %v9418_v57, %s9751_s3 }
0x10a0   : > { %6293 = vrot.lane.b32.xlu0 %v6292_v30, %s9754_s7  ;;  %6278 = vrot.lane.b32.xlu1 %v6282_v25, %s9750_s1  ;;  %s9950_s7 = sld [smem:[#allocation53_spill]] }
0x10a1   : > { %6273 = vrot.lane.b32.xlu2 %v6282_v25, %s9748_s27 }
0x10a8   : > { %6308 = vrot.lane.b32.xlu0 %v6292_v30, %s9752_s9  ;;  %6288 = vrot.lane.b32.xlu1 %v6292_v30, %s9755_s26 }
0x10a9   : > { %6298 = vrot.lane.b32.xlu2 %v6292_v30, %s9753_s5 }
0x10b0   : > { %6313 = vrot.lane.b32.xlu0 %v6312_v17, %s9748_s27  ;;  %6303 = vrot.lane.b32.xlu1 %v6292_v30, %s9751_s3  ;;  %s9949_s3 = sld [smem:[#allocation12_spill]] }
0x10b1   : > { %6318 = vrot.lane.b32.xlu2 %v6312_v17, %s9750_s1  ;;  %s9945_s1 = sld [smem:[#allocation54_spill]] }
0x10b6   : > { %s5467_s26 = smul.u32 24, %s9949_s3 }
0x10b8   : > { %6323 = vrot.lane.b32.xlu1 %v6312_v17, %s9747_s8  ;;  %s764_s0 = scalar_lea.vmem %s9954_s17, %s5467_s26 }
0x10eb   : > { %v4821_v56 = vpop.permute.xlu2 %4820 }
0x10ec   : > { %v4847_v48 = vpack.c.bf16 %v4821_v56, %v4821_v56 }
0x10f3   : > { %v9447_v20 = vpop.permute.xlu2 %4772 }
0x10fb   : > { %v9454_v38 = vpop.permute.xlu2 %6273 }
0x10fc   : > { %v6276_v51 = vunpack.i.h.bf16 %v9454_v38  ;;  %v6275_v52 = vunpack.i.l.bf16 %v9454_v38 }
0x10fe   : > { %v4746_v0 = vsel %vm834_vm0, %v6275_v52, %v6276_v51 }
0x1102   : > { %v4797_v62 = vpop.permute.xlu1 %4796  ;;  %v4809_v23 = vpop.permute.xlu0 %4808 }
0x1103   : > { %v6299_v18 = vpop.permute.xlu2 %6298  ;;  %v4843_v42 = vpack.c.bf16 %v4809_v23, %v4797_v62 }
0x1104   : > { %v6301_v46 = vunpack.i.h.bf16 %v6299_v18  ;;  %v6300_v19 = vunpack.i.l.bf16 %v6299_v18 }
0x1106   : > { %v4811_v27 = vsel %vm903_vm4, %v6301_v46, %v4809_v23  ;;  %v4810_v17 = vsel %vm903_vm4, %v6300_v19, %v6301_v46 }
0x110a   : > { %v9449_v40 = vpop.permute.xlu1 %4784  ;;  %v9456_v3 = vpop.permute.xlu0 %6283 }
0x110b   : > { %v4839_v32 = vpack.c.bf16 %v9449_v40, %v9447_v20  ;;  %v6286_v2 = vunpack.i.h.bf16 %v9456_v3  ;;  %v6285_v5 = vunpack.i.l.bf16 %v9456_v3 }
0x110d   : > { %4896 = vrot.lane.b32.xlu1 %v4839_v32, %s9757_s6  ;;  %v4731_v54 = vsel %vm818_vm7, %v6285_v5, %v6286_v2 }
0x110e   : > { %v4828_v1 = vpack.c.bf16 %v4731_v54, %v6338_v24 }
0x1112   : > { %v9460_v55 = vpop.permute.xlu1 %6278  ;;  %v6294_v11 = vpop.permute.xlu0 %6293 }
0x1113   : > { %v6281_v34 = vunpack.i.h.bf16 %v9460_v55  ;;  %v6280_v47 = vunpack.i.l.bf16 %v9460_v55  ;;  %v6296_v44 = vunpack.i.h.bf16 %v6294_v11  ;;  %v6295_v13 = vunpack.i.l.bf16 %v6294_v11 }
0x1115   : > { %v4761_v7 = vsel %vm850_vm1, %v6280_v47, %v6281_v34  ;;  %v4799_v12 = vsel %vm890_vm3, %v6296_v44, %v4797_v62  ;;  %v4840_v63 = vpack.c.bf16 %v6300_v19, %v6295_v13  ;;  %v4798_v43 = vsel %vm890_vm3, %v6295_v13, %v6296_v44  ;;  %v6319_v62 = vpop.permute.xlu2 %6318  ;;  %vm9951_vm3 = vmmov %vm9939_vm8 }
0x1116   : > { %v4832_v35 = vpack.c.bf16 %v4761_v7, %v4746_v0  ;;  %v4842_v41 = vpack.c.bf16 %v4811_v27, %v4799_v12  ;;  %v4841_v23 = vpack.c.bf16 %v4810_v17, %v4798_v43  ;;  %v6320_v52 = vunpack.i.l.bf16 %v6319_v62  ;;  %vm9952_vm4 = vmmov %vm9951_vm3 }
0x1118   : > { %4882 = vrot.lane.b32.xlu1 %v4832_v35, %s9757_s6  ;;  %v4762_v0 = vsel %vm850_vm1, %v6281_v34, %v6320_v52 }
0x111a   : > { %v6289_v45 = vpop.permute.xlu1 %6288  ;;  %v6309_v26 = vpop.permute.xlu0 %6308 }
0x111b   : > { %v6291_v33 = vunpack.i.h.bf16 %v6289_v45  ;;  %v6290_v49 = vunpack.i.l.bf16 %v6289_v45  ;;  %v6310_v9 = vunpack.i.l.bf16 %v6309_v26  ;;  %v6311_v16 = vunpack.i.h.bf16 %v6309_v26 }
0x111d   : > { %v4823_v15 = vsel %vm916_vm2, %v6291_v33, %v4821_v56  ;;  %v4844_v58 = vpack.c.bf16 %v6290_v49, %v6290_v49  ;;  %v4786_v53 = vsel %vm877_vm6, %v6310_v9, %v6311_v16  ;;  %v4822_v61 = vsel %vm916_vm2, %v6290_v49, %v6291_v33 }
0x111e   : > { %v4846_v37 = vpack.c.bf16 %v4823_v15, %v4823_v15  ;;  %v4845_v50 = vpack.c.bf16 %v4822_v61, %v4822_v61  ;;  %v4787_v30 = vsel %vm877_vm6, %v6311_v16, %v9449_v40  ;;  %v4714_v61 = vld [vmem:[%s9950_s7] sm:$0xf]  ;;  %vm9955_vm6 = vmmov %vm9944_vm10 }
0x111f   : > { %4906 = vrot.lane.b32.xlu2 %v4844_v58, %s9757_s6 }
0x1120   : > { %4910 = vrot.lane.b32.xlu1 %v4846_v37, %s9757_s6 }
0x1122   : > { %v6304_v36 = vpop.permute.xlu1 %6303  ;;  %v6314_v25 = vpop.permute.xlu0 %6313 }
0x1123   : > { %v6305_v39 = vunpack.i.l.bf16 %v6304_v36  ;;  %v6306_v8 = vunpack.i.h.bf16 %v6304_v36  ;;  %v6315_v32 = vunpack.i.l.bf16 %v6314_v25  ;;  %v6316_v3 = vunpack.i.h.bf16 %v6314_v25 }
0x1125   : > { %v4836_v10 = vpack.c.bf16 %v6310_v9, %v6305_v39  ;;  %v4774_v22 = vsel %vm864_vm5, %v6305_v39, %v6306_v8  ;;  %v4775_v14 = vsel %vm864_vm5, %v6306_v8, %v9447_v20  ;;  %v6321_v20 = vunpack.i.h.bf16 %v6319_v62  ;;  %vm9953_vm5 = vmmov %vm9951_vm3 }
0x1126   : > { %v4837_v60 = vpack.c.bf16 %v4786_v53, %v4774_v22  ;;  %v4838_v56 = vpack.c.bf16 %v4787_v30, %v4775_v14  ;;  %v4747_v40 = vsel %vm834_vm0, %v6276_v51, %v6315_v32  ;;  %v4748_v47 = vsel %vm834_vm0, %v6315_v32, %v6316_v3 }
0x1127   : > { %4898 = vrot.lane.b32.xlu2 %v4840_v63, %s9757_s6  ;;  %4890 = vrot.lane.b32.xlu0 %v4836_v10, %s9757_s6  ;;  %v4763_v7 = vsel %vm850_vm1, %v6320_v52, %v6321_v20  ;;  %v4833_v35 = vpack.c.bf16 %v4762_v0, %v4747_v40  ;;  %v4835_v33 = vpack.c.bf16 %v6321_v20, %v6316_v3  ;;  %vm9946_vm0 = vcmask 1043456  }
0x1128   : > { %4902 = vrot.lane.b32.xlu1 %v4842_v41, %s9757_s6  ;;  %v4834_v11 = vpack.c.bf16 %v4763_v7, %v4748_v47  ;;  %vm9947_vm1 = vmmov %vm9946_vm0 }
0x1129   : > { %vm9948_vm2 = vmmov %vm9946_vm0 }
0x112a   : > { %v6324_v28 = vpop.permute.xlu1 %6323 }
0x112b   : > { %v6326_v29 = vunpack.i.h.bf16 %v6324_v28  ;;  %v6325_v59 = vunpack.i.l.bf16 %v6324_v28 }
0x112d   : > { %v4733_v4 = vsel %vm818_vm7, %v6325_v59, %v6326_v29  ;;  %v4732_v45 = vsel %vm818_vm7, %v6286_v2, %v6325_v59  ;;  %v4831_v51 = vpack.c.bf16 %v6326_v29, %v9418_v57 }
0x112e   : > { %v4830_v6 = vpack.c.bf16 %v4733_v4, %v9415_v21  ;;  %v4848_v21 = vld [vmem:[%s9945_s1] sm:$0xff]  ;;  %v4829_v38 = vpack.c.bf16 %v4732_v45, %v9413_v31 }
0x112f   : > { %4912 = vrot.lane.b32.xlu2 %v4847_v48, %s9757_s6  ;;  %4904 = vrot.lane.b32.xlu0 %v4843_v42, %s9757_s6 }
0x1130   : > { %4892 = vrot.lane.b32.xlu1 %v4837_v60, %s9757_s6 }
0x1137   : > { %4874 = vrot.lane.b32.xlu2 %v4828_v1, %s9757_s6  ;;  %4908 = vrot.lane.b32.xlu0 %v4845_v50, %s9757_s6 }
0x1138   : > { %4878 = vrot.lane.b32.xlu1 %v4830_v6, %s9757_s6 }
0x113f   : > { %4894 = vrot.lane.b32.xlu2 %v4838_v56, %s9757_s6  ;;  %4900 = vrot.lane.b32.xlu0 %v4841_v23, %s9757_s6 }
0x1140   : > { %4851 = vperm.xlu1 %5580, %v4848_v21  }
0x1147   : > { %4884 = vrot.lane.b32.xlu2 %v4833_v35, %s9757_s6  ;;  %4886 = vrot.lane.b32.xlu0 %v4834_v11, %s9757_s6 }
0x114f   : > { %4888 = vrot.lane.b32.xlu2 %v4835_v33, %s9757_s6  ;;  %4876 = vrot.lane.b32.xlu0 %v4829_v38, %s9757_s6 }
0x1157   : > { %4880 = vrot.lane.b32.xlu0 %v4831_v51, %s9757_s6 }
0x1179   : > { %v4907_v55 = vpop.permute.xlu2 %4906 }
0x117f   : > { %v4897_v34 = vpop.permute.xlu1 %4896 }
0x1181   : > { %v4899_v49 = vpop.permute.xlu2 %4898 }
0x1189   : > { %v4913_v18 = vpop.permute.xlu2 %4912 }
0x118a   : > { %v4883_v15 = vpop.permute.xlu1 %4882 }
0x1191   : > { %v4875_v31 = vpop.permute.xlu2 %4874 }
0x1192   : > { %v4911_v37 = vpop.permute.xlu1 %4910 }
0x1193   : > { %v4928_v58 = vsel %vm1009_vm9, %v4911_v37, %v4913_v18 }
0x1194   : > { %v4951_v44 = vsel %vm9946_vm0, %v4928_v58, 0 }
0x1195   : > { %4982 = vmatpush.bf16.msrb.mxu0 %v4951_v44 }
0x1199   : > { %v4891_v46 = vpop.permute.xlu0 %4890  ;;  %v4895_v57 = vpop.permute.xlu2 %4894 }
0x119a   : > { %v4903_v13 = vpop.permute.xlu1 %4902  ;;  %v4922_v12 = vsel %vm1009_vm9, %v4895_v57, %v4897_v34 }
0x11a1   : > { %v4905_v26 = vpop.permute.xlu0 %4904  ;;  %v4885_v41 = vpop.permute.xlu2 %4884 }
0x11a2   : > { %v4925_v36 = vsel %vm1009_vm9, %v4903_v13, %v4905_v26  ;;  %v4893_v22 = vpop.permute.xlu1 %4892  ;;  %v4917_v60 = vsel %vm1009_vm9, %v4883_v15, %v4885_v41 }
0x11a3   : > { %4983 = vmatpush.bf16.msrb.mxu0 %v4925_v36  ;;  %v4920_v28 = vsel %vm1009_vm9, %v4891_v46, %v4893_v22  ;;  %v4921_v53 = vsel %vm1009_vm9, %v4893_v22, %v4895_v57 }
0x11a7   : > { %4984 = vmatpush.bf16.msrb.mxu0 %v4922_v12 }
0x11a9   : > { %v4909_v39 = vpop.permute.xlu0 %4908  ;;  %v4889_v48 = vpop.permute.xlu2 %4888 }
0x11aa   : > { %v4926_v19 = vsel %vm1009_vm9, %v4907_v55, %v4909_v39  ;;  %v4927_v27 = vsel %vm1009_vm9, %v4909_v39, %v4911_v37  ;;  %v4879_v29 = vpop.permute.xlu1 %4878 }
0x11ab   : > { %v4945_v9 = vsel %vm9947_vm1, %v4926_v19, 0  ;;  %v4948_v63 = vsel %vm9948_vm2, %v4927_v27, 0 }
0x11ac   : > { %4956 = vmatpush.bf16.msrb.mxu3 %v4945_v9  ;;  %4969 = vmatpush.bf16.msra.mxu2 %v4948_v63 }
0x11b1   : > { %v4901_v8 = vpop.permute.xlu0 %4900 }
0x11b2   : > { %v4923_v10 = vsel %vm1009_vm9, %v4899_v49, %v4901_v8  ;;  %v4924_v16 = vsel %vm1009_vm9, %v4901_v8, %v4903_v13  ;;  %v4852_v6 = vpop.permute.xlu1 %4851 }
0x11b3   : > { %4957 = vmatpush.bf16.msrb.mxu3 %v4923_v10  ;;  %4970 = vmatpush.bf16.msra.mxu2 %v4924_v16 }
0x11b7   : > { %4958 = vmatpush.bf16.msrb.mxu3 %v4920_v28  ;;  %4971 = vmatpush.bf16.msra.mxu2 %v4921_v53 }
0x11b9   : > { %v4887_v42 = vpop.permute.xlu0 %4886 }
0x11ba   : > { %v4918_v2 = vsel %vm1009_vm9, %v4885_v41, %v4887_v42  ;;  %v4919_v5 = vsel %vm1009_vm9, %v4887_v42, %v4889_v48 }
0x11bb   : > { %4959 = vmatpush.bf16.msrb.mxu3 %v4917_v60  ;;  %4972 = vmatpush.bf16.msra.mxu2 %v4918_v2 }
0x11bc   : > { %4985 = vmatpush.bf16.msrb.mxu0 %v4919_v5 }
0x11c1   : > { %v4877_v59 = vpop.permute.xlu0 %4876 }
0x11c2   : > { %v4914_v54 = vsel %vm1009_vm9, %v4875_v31, %v4877_v59  ;;  %v4915_v4 = vsel %vm1009_vm9, %v4877_v59, %v4879_v29 }
0x11c3   : > { %4960 = vmatpush.bf16.msrb.mxu3 %v4914_v54  ;;  %4973 = vmatpush.bf16.msra.mxu2 %v4915_v4 }
0x11c6   : > { %5387 = vmatmul.msk.bf16.vlgmr.msrb.gmra.mxu3 %vm9951_vm3, %v4714_v61  ;;  %5388 = vmatmul.msk.bf16.vlgmr.msra.gmra.mxu2 %vm9952_vm4, %v4714_v61 }
0x11c9   : > { %v4881_v24 = vpop.permute.xlu0 %4880 }
0x11ca   : > { %v4916_v1 = vsel %vm1009_vm9, %v4879_v29, %v4881_v24 }
0x11cb   : > { %4986 = vmatpush.bf16.msrb.mxu0 %v4916_v1 }
0x11ce   : > { %5389 = vmatmul.msk.bf16.vlgmr.msrb.gmra.mxu0 %vm9953_vm5, %v4714_v61 }
0x1249   : > { %v4962_v50 = vpop.f32.mrf.mxu3  ;;  %v4975_v14 = vpop.f32.mrf.mxu2 }
0x124a   : > { %v4963_v43 = vadd.f32 %v4962_v50, %v4852_v6  ;;  %v4976_v25 = vadd.f32 %v4975_v14, %v4852_v6 }
0x124b   : > { %v4988_v30 = vpop.f32.mrf.mxu0 }
0x124c   : > { %4992 = vst [vmem:[%s764_s0] sm:$0xff] %v4963_v43  ;;  %v4989_v21 = vadd.f32 %v4988_v30, %v4852_v6 }
0x124d   : > { %4993 = vst [vmem:[%s764_s0 + $0x8] sm:$0xff] %v4976_v25 }
0x124e   : > { %4994 = vst.msk [vmem:[%s764_s0 + $0x10] sm:$0xff] %vm9955_vm6, %v4989_v21 }
0x1251   : > { %v4964_v17 = vpop.f32.mrf.mxu3  ;;  %v4977_v56 = vpop.f32.mrf.mxu2 }
0x1253   : > { %v4990_v62 = vpop.f32.mrf.mxu0 }
0x1254 PF: > { %s9956_s25 = sld [smem:[#allocation11_spill]] }
0x125a   : > { %s35_s29 = sadd.s32 1, %s9956_s25  }
0x125b   : > { %p32_p4 = scmp.ge.s32.totalorder %s35_s29, 4  }
0x125d   :  { %34 = sbr.rel (!%p32_p4) target bundleno = 18 (0x12), region = 150 }

</bundles_post_ra>
